<compile_context>
chip_gen: v6e
topology: v6e:2x2x1
jax: 0.10.0
libtpu: 0.0.40
codegen_flags: <defaults>
</compile_context>

<pallas_src>
import functools

import jax
import jax.numpy as jnp
from jax import lax
from jax.experimental import pallas as pl
from jax.experimental.pallas import tpu as pltpu

NEG_SLOPE = 0.01          # PyTorch nn.LeakyReLU default
HIDDEN = 1000
HIDDEN_PAD = 1024         # multiple of 128
NUM_HIDDEN = 5            # number of 1000->1000 Linear layers in the module
OUT = 2
OUT_PAD = 128


def _round_up(n, m):
  return ((n + m - 1) // m) * m


def _leaky_relu(x):
  return jnp.where(x > 0, x, NEG_SLOPE * x)


def fc_disc_kernel(x_ref, w0_ref, b0_ref, wh_ref, bh_ref, wl_ref, bl_ref,
                   logits_ref, probs_ref, h_ref):
  """One grid step == one hidden (1000->1000) layer; weights stream per step."""
  l = pl.program_id(0)

  # ---- first step: input layer num_latent -> 1000 (weights VMEM-resident) ---
  @pl.when(l == 0)
  def _():
    h0 = jnp.dot(x_ref[...], w0_ref[...],
                 preferred_element_type=jnp.float32) + b0_ref[...]
    h_ref[...] = _leaky_relu(h0)

  # ---- hidden layer l: bf16 x bf16 -> f32 accumulation on the MXU -----------
  h = jnp.dot(h_ref[...].astype(jnp.bfloat16), wh_ref[0],
              preferred_element_type=jnp.float32) + bh_ref[0]
  h_ref[...] = _leaky_relu(h)

  # ---- last step: final projection, softmax over 2 real classes, clamp ------
  @pl.when(l == pl.num_programs(0) - 1)
  def _():
    logits = jnp.dot(h_ref[...].astype(jnp.bfloat16), wl_ref[...],
                     preferred_element_type=jnp.float32) + bl_ref[...]
    logits_ref[...] = logits

    col = lax.broadcasted_iota(jnp.int32, logits.shape, 1)
    masked = jnp.where(col < OUT, logits, -jnp.inf)
    m = jnp.max(masked, axis=-1, keepdims=True)
    e = jnp.exp(masked - m)                         # exp(-inf)=0 on padded lanes
    denom = jnp.sum(e, axis=-1, keepdims=True)
    probs = e * pl.reciprocal(denom, approx=True)   # EUP slot, ~free
    probs_ref[...] = jnp.clip(probs, 1e-6, 1.0 - 1e-6)


def make_params(num_latent, key):
  """Deterministic synthetic parameters (PyTorch Linear init, stored (in, out))."""
  dims = [num_latent] + [HIDDEN] * (NUM_HIDDEN + 1) + [OUT]
  params = []
  for i in range(len(dims) - 1):
    key, kw, kb = jax.random.split(key, 3)
    scale = 1.0 / jnp.sqrt(jnp.float32(dims[i]))
    w = jax.random.uniform(kw, (dims[i], dims[i + 1]), jnp.float32, -scale, scale)
    b = jax.random.uniform(kb, (dims[i + 1],), jnp.float32, -scale, scale)
    params.append((w, b))
  return params


def pack_params(params, num_latent):
  """One-time packing: zero-pad, cast weights to bf16, stack hidden layers."""
  nl_pad = _round_up(max(num_latent, 128), 128)

  w0, b0 = params[0]
  w0p = jnp.zeros((nl_pad, HIDDEN_PAD), jnp.bfloat16)
  w0p = w0p.at[:num_latent, :HIDDEN].set(w0.astype(jnp.bfloat16))
  b0p = jnp.zeros((1, HIDDEN_PAD), jnp.float32).at[0, :HIDDEN].set(b0)

  wh = jnp.zeros((NUM_HIDDEN, HIDDEN_PAD, HIDDEN_PAD), jnp.bfloat16)
  bh = jnp.zeros((NUM_HIDDEN, 1, HIDDEN_PAD), jnp.float32)
  for i in range(NUM_HIDDEN):
    w, b = params[1 + i]
    wh = wh.at[i, :HIDDEN, :HIDDEN].set(w.astype(jnp.bfloat16))
    bh = bh.at[i, 0, :HIDDEN].set(b)

  wl, bl = params[-1]
  wlp = jnp.zeros((HIDDEN_PAD, OUT_PAD), jnp.bfloat16)
  wlp = wlp.at[:HIDDEN, :OUT].set(wl.astype(jnp.bfloat16))
  blp = jnp.zeros((1, OUT_PAD), jnp.float32).at[0, :OUT].set(bl)

  return (w0p, b0p, wh, bh, wlp, blp)


@jax.jit
def fc_discriminator_forward(x, packed):
  """Returns (logits (B, 2), clipped_probs (B, 2)) matching the PyTorch module."""
  w0, b0, wh, bh, wl, bl = packed
  b = x.shape[0]
  x2 = x.reshape(b, -1)
  num_latent = x2.shape[1]
  nl_pad = w0.shape[0]
  b_pad = _round_up(max(b, 8), 8)

  x_pad = jnp.zeros((b_pad, nl_pad), jnp.bfloat16)
  x_pad = x_pad.at[:b, :num_latent].set(x2.astype(jnp.bfloat16))

  logits_pad, probs_pad = pl.pallas_call(
      fc_disc_kernel,
      out_shape=(jax.ShapeDtypeStruct((b_pad, OUT_PAD), jnp.float32),
                 jax.ShapeDtypeStruct((b_pad, OUT_PAD), jnp.float32)),
      grid_spec=pltpu.PrefetchScalarGridSpec(
          num_scalar_prefetch=0,
          grid=(NUM_HIDDEN,),
          in_specs=[
              # Resident across the whole grid (constant block index):
              pl.BlockSpec((b_pad, nl_pad), lambda l: (0, 0)),            # x
              pl.BlockSpec((nl_pad, HIDDEN_PAD), lambda l: (0, 0)),       # w0
              pl.BlockSpec((1, HIDDEN_PAD), lambda l: (0, 0)),            # b0
              # Streamed per layer (double-buffered -> DMA/compute overlap).
              # On v5e consider pipeline_mode=pl.Buffered(3) here.
              pl.BlockSpec((1, HIDDEN_PAD, HIDDEN_PAD), lambda l: (l, 0, 0)),  # wh
              pl.BlockSpec((1, 1, HIDDEN_PAD), lambda l: (l, 0, 0)),      # bh
              # Resident:
              pl.BlockSpec((HIDDEN_PAD, OUT_PAD), lambda l: (0, 0)),      # wl
              pl.BlockSpec((1, OUT_PAD), lambda l: (0, 0)),               # bl
          ],
          out_specs=[pl.BlockSpec((b_pad, OUT_PAD), lambda l: (0, 0)),
                     pl.BlockSpec((b_pad, OUT_PAD), lambda l: (0, 0))],
          scratch_shapes=[pltpu.VMEM((b_pad, HIDDEN_PAD), jnp.float32)]),
      compiler_params=pltpu.CompilerParams(
          dimension_semantics=("arbitrary",),   # sequential layer dependence
          vmem_limit_bytes=16 << 20),           # actual footprint ~6 MiB
  )(x_pad, w0, b0, wh, bh, wl, bl)

  return logits_pad[:b, :OUT], probs_pad[:b, :OUT]


def _reference_bf16(x, params):
  """Mirrors kernel numerics: bf16 weights/inputs, f32 accumulation, f32 bias."""
  h = x.reshape(x.shape[0], -1).astype(jnp.bfloat16)
  logits = None
  for i, (w, b) in enumerate(params):
    z = jnp.dot(h, w.astype(jnp.bfloat16),
                preferred_element_type=jnp.float32) + b
    if i < len(params) - 1:
      h = _leaky_relu(z).astype(jnp.bfloat16)
    else:
      logits = z
  probs = jax.nn.softmax(logits, axis=1)
  return logits, jnp.clip(probs, 1e-6, 1.0 - 1e-6)


def _reference_f32(x, params):
  """Pure-f32 semantics of the original PyTorch module."""
  h = x.reshape(x.shape[0], -1).astype(jnp.float32)
  for w, b in params[:-1]:
    h = _leaky_relu(h @ w + b)
  logits = h @ params[-1][0] + params[-1][1]
  probs = jax.nn.softmax(logits, axis=1)
  return logits, jnp.clip(probs, 1e-6, 1.0 - 1e-6)


if __name__ == "__main__":
  key = jax.random.PRNGKey(0)
  k_x, k_p = jax.random.split(key)

  num_latent = 10
  batch = 8   # in FactorVAE, batch z and z_permuted together in one call
  x = jax.random.normal(k_x, (batch, num_latent), jnp.float32)
  params = make_params(num_latent, k_p)
  packed = pack_params(params, num_latent)

  logits, probs = fc_discriminator_forward(x, packed)
  jax.block_until_ready((logits, probs))

  assert logits.shape == (batch, OUT) and probs.shape == (batch, OUT)

  # Tight check against a reference with identical (bf16-weight) numerics.
  ref_logits, ref_probs = _reference_bf16(x, params)
  assert jnp.allclose(logits, ref_logits, atol=2e-3, rtol=2e-3)
  assert jnp.allclose(probs, ref_probs, atol=3e-3, rtol=3e-3)

  # Loose sanity check against the pure-f32 module semantics.
  f32_logits, f32_probs = _reference_f32(x, params)
  assert jnp.allclose(logits, f32_logits, atol=5e-2, rtol=5e-2)
  assert jnp.allclose(probs, f32_probs, atol=2e-2)

  print("KERNEL_OK")
</pallas_src>

<mosaic_0001>
module attributes {stable_mosaic.version = 11 : i64} {
  func.func @fc_disc_kernel(%arg0: i32, %arg1: memref<8x128xbf16, #tpu.memory_space<vmem>>, %arg2: memref<128x1024xbf16, #tpu.memory_space<vmem>>, %arg3: memref<1x1024xf32, #tpu.memory_space<vmem>>, %arg4: memref<1x1024x1024xbf16, #tpu.memory_space<vmem>>, %arg5: memref<1x1x1024xf32, #tpu.memory_space<vmem>>, %arg6: memref<1024x128xbf16, #tpu.memory_space<vmem>>, %arg7: memref<1x128xf32, #tpu.memory_space<vmem>>, %arg8: memref<8x128xf32, #tpu.memory_space<vmem>>, %arg9: memref<8x128xf32, #tpu.memory_space<vmem>>, %arg10: memref<8x1024xf32, #tpu.memory_space<vmem>>) attributes {dimension_semantics = [#tpu.dimension_semantics<arbitrary>], iteration_bounds = array<i64: 5>, scalar_prefetch = 0 : i64, scratch_operands = 1 : i64, tpu.core_type = #tpu.core_type<tc>, window_params = [{pipeline_mode = #tpu.pipeline_mode<synchronous>, transform_indices = @transform_0, window_bounds = array<i64: 8, 128>}, {pipeline_mode = #tpu.pipeline_mode<synchronous>, transform_indices = @transform_1, window_bounds = array<i64: 128, 1024>}, {pipeline_mode = #tpu.pipeline_mode<synchronous>, transform_indices = @transform_2, window_bounds = array<i64: 1, 1024>}, {transform_indices = @transform_3, window_bounds = array<i64: 1, 1024, 1024>}, {transform_indices = @transform_4, window_bounds = array<i64: 1, 1, 1024>}, {pipeline_mode = #tpu.pipeline_mode<synchronous>, transform_indices = @transform_5, window_bounds = array<i64: 1024, 128>}, {pipeline_mode = #tpu.pipeline_mode<synchronous>, transform_indices = @transform_6, window_bounds = array<i64: 1, 128>}, {pipeline_mode = #tpu.pipeline_mode<synchronous>, transform_indices = @transform_7, window_bounds = array<i64: 8, 128>}, {pipeline_mode = #tpu.pipeline_mode<synchronous>, transform_indices = @transform_8, window_bounds = array<i64: 8, 128>}]} {
    %c0_i32 = arith.constant 0 : i32
    %0 = arith.cmpi eq, %arg0, %c0_i32 : i32
    %1 = arith.extui %0 : i1 to i32
    %c0_i32_0 = arith.constant 0 : i32
    %2 = arith.cmpi ne, %1, %c0_i32_0 : i32
    scf.if %2 {
      %c0_13 = arith.constant 0 : index
      %c0_14 = arith.constant 0 : index
      %21 = vector.load %arg1[%c0_13, %c0_14] : memref<8x128xbf16, #tpu.memory_space<vmem>>, vector<8x128xbf16>
      %c0_15 = arith.constant 0 : index
      %c0_16 = arith.constant 0 : index
      %22 = vector.load %arg2[%c0_15, %c0_16] : memref<128x1024xbf16, #tpu.memory_space<vmem>>, vector<128x1024xbf16>
      %cst_17 = arith.constant dense<0.000000e+00> : vector<8x1024xf32>
      %23 = tpu.matmul %21, %22, %cst_17 {dimension_numbers = #tpu.dot_dimension_numbers<[1], [0], [0], [1], [0, 0, 1, 1], [], []>} : vector<8x128xbf16>, vector<128x1024xbf16>, vector<8x1024xf32> -> vector<8x1024xf32>
      %c0_18 = arith.constant 0 : index
      %c0_19 = arith.constant 0 : index
      %24 = vector.load %arg3[%c0_18, %c0_19] : memref<1x1024xf32, #tpu.memory_space<vmem>>, vector<1x1024xf32>
      %25 = vector.broadcast %24 : vector<1x1024xf32> to vector<8x1024xf32>
      %26 = arith.addf %23, %25 : vector<8x1024xf32>
      %cst_20 = arith.constant 0.000000e+00 : f32
      %27 = vector.broadcast %cst_20 : f32 to vector<8x1024xf32>
      %28 = arith.cmpf ogt, %26, %27 : vector<8x1024xf32>
      %cst_21 = arith.constant 0.00999999977 : f32
      %29 = vector.broadcast %cst_21 : f32 to vector<8x1024xf32>
      %30 = arith.mulf %29, %26 : vector<8x1024xf32>
      %31 = arith.select %28, %26, %30 : vector<8x1024xi1>, vector<8x1024xf32>
      %c0_22 = arith.constant 0 : index
      %c0_23 = arith.constant 0 : index
      %32 = vector.load %arg10[%c0_22, %c0_23] : memref<8x1024xf32, #tpu.memory_space<vmem>>, vector<8x1024xf32>
      tpu.vector_store %arg10[%c0_22, %c0_23], %31 {strides = array<i32>} : memref<8x1024xf32, #tpu.memory_space<vmem>>, vector<8x1024xf32>,
    } else {
    }
    %c0 = arith.constant 0 : index
    %c0_1 = arith.constant 0 : index
    %3 = vector.load %arg10[%c0, %c0_1] : memref<8x1024xf32, #tpu.memory_space<vmem>>, vector<8x1024xf32>
    %4 = arith.truncf %3 : vector<8x1024xf32> to vector<8x1024xbf16>
    %c0_2 = arith.constant 0 : index
    %c0_3 = arith.constant 0 : index
    %c0_4 = arith.constant 0 : index
    %5 = vector.load %arg4[%c0_2, %c0_3, %c0_4] : memref<1x1024x1024xbf16, #tpu.memory_space<vmem>>, vector<1x1024x1024xbf16>
    %6 = vector.shape_cast %5 : vector<1x1024x1024xbf16> to vector<1024x1024xbf16>
    %cst = arith.constant dense<0.000000e+00> : vector<8x1024xf32>
    %7 = tpu.matmul %4, %6, %cst {dimension_numbers = #tpu.dot_dimension_numbers<[1], [0], [0], [1], [0, 0, 1, 1], [], []>} : vector<8x1024xbf16>, vector<1024x1024xbf16>, vector<8x1024xf32> -> vector<8x1024xf32>
    %c0_5 = arith.constant 0 : index
    %c0_6 = arith.constant 0 : index
    %c0_7 = arith.constant 0 : index
    %8 = vector.load %arg5[%c0_5, %c0_6, %c0_7] : memref<1x1x1024xf32, #tpu.memory_space<vmem>>, vector<1x1x1024xf32>
    %9 = vector.shape_cast %8 : vector<1x1x1024xf32> to vector<1x1024xf32>
    %10 = vector.broadcast %9 : vector<1x1024xf32> to vector<8x1024xf32>
    %11 = arith.addf %7, %10 : vector<8x1024xf32>
    %cst_8 = arith.constant 0.000000e+00 : f32
    %12 = vector.broadcast %cst_8 : f32 to vector<8x1024xf32>
    %13 = arith.cmpf ogt, %11, %12 : vector<8x1024xf32>
    %cst_9 = arith.constant 0.00999999977 : f32
    %14 = vector.broadcast %cst_9 : f32 to vector<8x1024xf32>
    %15 = arith.mulf %14, %11 : vector<8x1024xf32>
    %16 = arith.select %13, %11, %15 : vector<8x1024xi1>, vector<8x1024xf32>
    %c0_10 = arith.constant 0 : index
    %c0_11 = arith.constant 0 : index
    %17 = vector.load %arg10[%c0_10, %c0_11] : memref<8x1024xf32, #tpu.memory_space<vmem>>, vector<8x1024xf32>
    tpu.vector_store %arg10[%c0_10, %c0_11], %16 {strides = array<i32>} : memref<8x1024xf32, #tpu.memory_space<vmem>>, vector<8x1024xf32>,
    %c4_i32 = arith.constant 4 : i32
    %18 = arith.cmpi eq, %arg0, %c4_i32 : i32
    %19 = arith.extui %18 : i1 to i32
    %c0_i32_12 = arith.constant 0 : i32
    %20 = arith.cmpi ne, %19, %c0_i32_12 : i32
    scf.if %20 {
      %c0_13 = arith.constant 0 : index
      %c0_14 = arith.constant 0 : index
      %21 = vector.load %arg10[%c0_13, %c0_14] : memref<8x1024xf32, #tpu.memory_space<vmem>>, vector<8x1024xf32>
      %22 = arith.truncf %21 : vector<8x1024xf32> to vector<8x1024xbf16>
      %c0_15 = arith.constant 0 : index
      %c0_16 = arith.constant 0 : index
      %23 = vector.load %arg6[%c0_15, %c0_16] : memref<1024x128xbf16, #tpu.memory_space<vmem>>, vector<1024x128xbf16>
      %cst_17 = arith.constant dense<0.000000e+00> : vector<8x128xf32>
      %24 = tpu.matmul %22, %23, %cst_17 {dimension_numbers = #tpu.dot_dimension_numbers<[1], [0], [0], [1], [0, 0, 1, 1], [], []>} : vector<8x1024xbf16>, vector<1024x128xbf16>, vector<8x128xf32> -> vector<8x128xf32>
      %c0_18 = arith.constant 0 : index
      %c0_19 = arith.constant 0 : index
      %25 = vector.load %arg7[%c0_18, %c0_19] : memref<1x128xf32, #tpu.memory_space<vmem>>, vector<1x128xf32>
      %26 = vector.broadcast %25 : vector<1x128xf32> to vector<8x128xf32>
      %27 = arith.addf %24, %26 : vector<8x128xf32>
      %c0_20 = arith.constant 0 : index
      %c0_21 = arith.constant 0 : index
      %28 = vector.load %arg8[%c0_20, %c0_21] : memref<8x128xf32, #tpu.memory_space<vmem>>, vector<8x128xf32>
      tpu.vector_store %arg8[%c0_20, %c0_21], %27 {strides = array<i32>} : memref<8x128xf32, #tpu.memory_space<vmem>>, vector<8x128xf32>,
      %29 = tpu.iota {dimensions = array<i32: 1>} : vector<8x128xi32>
      %c2_i32 = arith.constant 2 : i32
      %30 = vector.broadcast %c2_i32 : i32 to vector<8x128xi32>
      %31 = arith.cmpi slt, %29, %30 : vector<8x128xi32>
      %cst_22 = arith.constant 0xFF800000 : f32
      %32 = vector.broadcast %cst_22 : f32 to vector<8x128xf32>
      %33 = arith.select %31, %27, %32 : vector<8x128xi1>, vector<8x128xf32>
      %cst_23 = arith.constant dense<0xFF800000> : vector<8xf32>
      %34 = vector.multi_reduction <maximumf>, %33, %cst_23 [1] : vector<8x128xf32> to vector<8xf32>
      %35 = vector.shape_cast %34 : vector<8xf32> to vector<8x1xf32>
      %36 = vector.broadcast %35 : vector<8x1xf32> to vector<8x128xf32>
      %37 = arith.subf %33, %36 : vector<8x128xf32>
      %38 = math.exp %37 : vector<8x128xf32>
      %cst_24 = arith.constant dense<0.000000e+00> : vector<8xf32>
      %39 = vector.multi_reduction <add>, %38, %cst_24 [1] : vector<8x128xf32> to vector<8xf32>
      %40 = vector.shape_cast %39 : vector<8xf32> to vector<8x1xf32>
      %41 = tpu.reciprocal %40 {approx = true} : vector<8x1xf32> -> vector<8x1xf32>
      %42 = vector.broadcast %41 : vector<8x1xf32> to vector<8x128xf32>
      %43 = arith.mulf %38, %42 : vector<8x128xf32>
      %cst_25 = arith.constant 9.99999997E-7 : f32
      %cst_26 = arith.constant 0.999998986 : f32
      %44 = vector.broadcast %cst_25 : f32 to vector<8x128xf32>
      %45 = arith.maximumf %44, %43 : vector<8x128xf32>
      %46 = vector.broadcast %cst_26 : f32 to vector<8x128xf32>
      %47 = arith.minimumf %46, %45 : vector<8x128xf32>
      %c0_27 = arith.constant 0 : index
      %c0_28 = arith.constant 0 : index
      %48 = vector.load %arg9[%c0_27, %c0_28] : memref<8x128xf32, #tpu.memory_space<vmem>>, vector<8x128xf32>
      tpu.vector_store %arg9[%c0_27, %c0_28], %47 {strides = array<i32>} : memref<8x128xf32, #tpu.memory_space<vmem>>, vector<8x128xf32>,
    } else {
    }
    return
  }
  func.func @transform_0(%arg0: i32) -> (i32, i32) {
    %c0_i32 = arith.constant 0 : i32
    %c0_i32_0 = arith.constant 0 : i32
    %c0_i32_1 = arith.constant 0 : i32
    return %c0_i32, %c0_i32_0 : i32, i32
  }
  func.func @transform_1(%arg0: i32) -> (i32, i32) {
    %c0_i32 = arith.constant 0 : i32
    %c0_i32_0 = arith.constant 0 : i32
    %c0_i32_1 = arith.constant 0 : i32
    return %c0_i32, %c0_i32_0 : i32, i32
  }
  func.func @transform_2(%arg0: i32) -> (i32, i32) {
    %c0_i32 = arith.constant 0 : i32
    %c0_i32_0 = arith.constant 0 : i32
    %c0_i32_1 = arith.constant 0 : i32
    return %c0_i32, %c0_i32_0 : i32, i32
  }
  func.func @transform_3(%arg0: i32) -> (i32, i32, i32) {
    %c0_i32 = arith.constant 0 : i32
    %c0_i32_0 = arith.constant 0 : i32
    %c0_i32_1 = arith.constant 0 : i32
    return %arg0, %c0_i32, %c0_i32_0 : i32, i32, i32
  }
  func.func @transform_4(%arg0: i32) -> (i32, i32, i32) {
    %c0_i32 = arith.constant 0 : i32
    %c0_i32_0 = arith.constant 0 : i32
    %c0_i32_1 = arith.constant 0 : i32
    return %arg0, %c0_i32, %c0_i32_0 : i32, i32, i32
  }
  func.func @transform_5(%arg0: i32) -> (i32, i32) {
    %c0_i32 = arith.constant 0 : i32
    %c0_i32_0 = arith.constant 0 : i32
    %c0_i32_1 = arith.constant 0 : i32
    return %c0_i32, %c0_i32_0 : i32, i32
  }
  func.func @transform_6(%arg0: i32) -> (i32, i32) {
    %c0_i32 = arith.constant 0 : i32
    %c0_i32_0 = arith.constant 0 : i32
    %c0_i32_1 = arith.constant 0 : i32
    return %c0_i32, %c0_i32_0 : i32, i32
  }
  func.func @transform_7(%arg0: i32) -> (i32, i32) {
    %c0_i32 = arith.constant 0 : i32
    %c0_i32_0 = arith.constant 0 : i32
    %c0_i32_1 = arith.constant 0 : i32
    return %c0_i32, %c0_i32_0 : i32, i32
  }
  func.func @transform_8(%arg0: i32) -> (i32, i32) {
    %c0_i32 = arith.constant 0 : i32
    %c0_i32_0 = arith.constant 0 : i32
    %c0_i32_1 = arith.constant 0 : i32
    return %c0_i32, %c0_i32_0 : i32, i32
  }
}

</mosaic_0001>

<bundles_post_ra>
// kernel: fc_discriminator_forward.1
= control target key start
LH: loop header
LB: loop body
LE: loop exit
PB: predicated region body
PF: predicated region fallthrough
CT: control target
= control target key end

     0   :  { %s7674_s0 = inlined_call_operand.vmem [shape: bf16[8,128], index: 0, kind: input, shape index: {}]   ;;  %s7675_s1 = inlined_call_operand.hbm [shape: bf16[128,1024], index: 1, kind: input, shape index: {}]   ;;  %s7676_s2 = inlined_call_operand.hbm [shape: f32[1,1024], index: 2, kind: input, shape index: {}]   ;;  %s7677_s3 = inlined_call_operand.hbm [shape: bf16[5,1024,1024], index: 3, kind: input, shape index: {}]   ;;  %s7678_s4 = inlined_call_operand.hbm [shape: f32[5,1,1024], index: 4, kind: input, shape index: {}]   ;;  %s7679_s5 = inlined_call_operand.hbm [shape: bf16[1024,128], index: 5, kind: input, shape index: {}]   ;;  %s7680_s6 = inlined_call_operand.hbm [shape: f32[1,128], index: 6, kind: input, shape index: {}]   ;;  %s7681_s7 = inlined_call_operand.vmem [shape: f32[8,128], index: 7, kind: output, shape index: {0}]   ;;  %s7682_s8 = inlined_call_operand.vmem [shape: f32[8,128], index: 8, kind: output, shape index: {1}]  }
   0x1   :  { %7690 = sst [smem:[#allocation17_spill]] %s7675_s1 }
   0x2   :  { %14 = vsyncpa [#allocation4], 0 }
   0x3   :  { %15 = vsyncpa [#allocation6], 0 }
   0x4   :  { %16 = vsyncpa [#allocation11], 0  ;;  %s6843_s27 = smov 0   ;;  %s6845_s28 = smov 0  }
   0x5   :  { %s6847_s29 = smov 0   ;;  %s6849_s30 = smov 0  }
   0x6 LB: > { %s6862_s9 = sadd.s32 4294967295, %s6785_s30   ;;  %p105_p0 = scmp.ne.s32.totalorder %s6777_s28, %s6773_s27  ;;  %s6785_s30 = sphi %s6849_s30, %s7715_s30   ;;  %s6781_s29 = sphi %s6847_s29, %s7714_s29   ;;  %s6777_s28 = sphi %s6845_s28, %s7713_s28   ;;  %s6773_s27 = sphi %s6843_s27, %s7712_s27  }
   0x7   : > { %p7686_p1 = scmp.eq.s32.totalorder %s6862_s9, 0  ;;  %p5662_p2 = scmp.ge.s32.totalorder %s6785_s30, 1 }
   0x8   : > { %p226_p3 = scmp.lt.s32.totalorder %s6785_s30, 6  ;;  %s6787_s12 = smov [#allocation3]  }
   0x9   : > { %p6871_p5 = por %p7686_p1, %p105_p0  ;;  %s241_s13 = sshll.u32 %s6787_s12, 4  ;;  %s242_s13 = int_to_ptr.vmem [resolvable:$true] %s241_s13 }
   0xa   : > { %p6875_p6 = pnand %p5662_p2, %p226_p3  ;;  %s6788_s15 = smov [#allocation5]  }
   0xb   : > { %s7691_s10 = scalar_select %p6871_p5, 1, 0 }
   0xc   : > { %s7692_s11 = scalar_select %p6875_p6, 1, 0 }
   0xd   : > { %p6436_p7 = pneg %p6875_p6  ;;  %s255_s16 = sshll.u32 %s6788_s15, 4  ;;  %s256_s16 = int_to_ptr.vmem [resolvable:$true] %s255_s16 }
   0xe   : > { %s6586_s17 = scalar_lea.vmem %s242_s13, 8192  ;;  %p6594_p13 = scmp.lt.s32.totalorder %s242_s13, %s242_s13 }
   0xf   : > { %p6883_p8 = pnand %p6436_p7, %p7686_p1  ;;  %p6587_p10 = scmp.ne.s32.totalorder %s242_s13, %s6586_s17 }
  0x10   : > { %p6595_p0 = scmp.lt.s32.totalorder %s6586_s17, %s6586_s17 }
  0x11   : > { %p7687_p9 = pneg %p6883_p8 }
  0x12   : > { %p6596_p2 = por %p6595_p0, %p6594_p13 }
  0x13   : > { %p6589_p11 = pnand %p6587_p10, %p7687_p9 }
  0x15   : > { %p6590_p12 = pneg %p6589_p11 }
  0x17   : > { %p6597_p3 = pnand %p6596_p2, %p6590_p12 }
  0x19   : > { %6600 = shalt.err (!%p6597_p3)
}
  0x1a   : > { %s7684_s18 = smov 512   ;;  %s7685_s19 = smov 32  }
  0x1b   : > { %s7694_s1 = sld [smem:[#allocation17_spill]]  ;;  %s6612_s22 = scalar_lea.vmem %s256_s16, 128 }
  0x1c   : > { %p6613_p7 = scmp.ne.s32.totalorder %s256_s16, %s6612_s22  ;;  %p6620_p12 = scmp.lt.s32.totalorder %s256_s16, %s256_s16 }
  0x1d   : > { %p6621_p13 = scmp.lt.s32.totalorder %s6612_s22, %s6612_s22 }
  0x1e   : > { %p6615_p10 = pnand %p6613_p7, %p7687_p9 }
  0x1f   : > { %p6622_p0 = por %p6621_p13, %p6620_p12 }
  0x20   : > { %p6616_p11 = pneg %p6615_p10 }
  0x21   : > { %6439 = dma.hbm_to_vmem [thread:$0]  (!%p6883_p8), %s7694_s1, 8192, %s242_s13, [#allocation4], %s7684_s18, %s7684_s18, %s7685_s19  }
  0x22   : > { %p6623_p2 = pnand %p6622_p0, %p6616_p11 }
  0x24   : > { %6626 = shalt.err (!%p6623_p2)
}
  0x25   : > { %6442 = dma.hbm_to_vmem [thread:$0]  (!%p6883_p8), %s7676_s2, 128, %s256_s16, [#allocation6]  }
  0x26   : > { %s6909_s25 = sadd.s32 1, %s6785_s30   ;;  %s92_s26 = sadd.s32 1, %s6781_s29 }
  0x27   : > { %s89_s27 = ssub.s32 %s6785_s30, %s6909_s25  ;;  %p99_p3 = scmp.ne.s32.totalorder %s6781_s29, %s6777_s28 }
  0x28   : > { %p90_p7 = scmp.eq.s32.totalorder %s89_s27, 0  ;;  %p100_p10 = scmp.eq.s32.totalorder %s6785_s30, 0 }
  0x29   : > { %p6460_p11 = scmp.lt.s32.totalorder %s6785_s30, 5  ;;  %s290_s12 = sand.u32 1, %s6785_s30  }
  0x2a   : > { %s6920_s13 = scalar_select %p90_p7, %s6781_s29, %s92_s26  }
  0x2b   : > { %p101_p12 = por %p100_p10, %p99_p3  ;;  %s7683_s15 = sand.u32 1, %s6781_s29  }
  0x2c   : > { %s6326_s17 = sshll.u32 %s6785_s30, 16  ;;  %s5668_s20 = sshll.u32 %s7683_s15, 12 }
  0x2d   : > { %s6929_s16 = scalar_lea.hbm %s7677_s3, %s6326_s17  ;;  %p6931_p13 = pnand %p6460_p11, %p101_p12 }
  0x2e   : > { %s294_s24 = scalar_lea.vmem [#allocation7], %s5668_s20  ;;  %s6937_s27 = scalar_lea.sflag [#allocation4], %s290_s12 }
  0x2f   : > { %s301_s26 = sshll.u32 %s294_s24, 4  ;;  %s6627_s15 = scalar_lea.hbm %s6929_s16, 65536  ;;  %s6935_s26 = int_to_ptr.vmem [resolvable:$true] %s301_s26 }
  0x30   : > { %p6628_p0 = scmp.ne.s32.totalorder %s6929_s16, %s6627_s15  ;;  %p6629_p2 = pneg %p6931_p13 }
  0x31   : > { %s6632_s22 = scalar_lea.hbm %s7677_s3, 327680  ;;  %p6633_p10 = scmp.lt.s32.totalorder %s6929_s16, %s7677_s3 }
  0x32   : > { %p6630_p3 = pnand %p6629_p2, %p6628_p0  ;;  %p6634_p11 = scmp.lt.s32.totalorder %s6632_s22, %s6627_s15 }
  0x34   : > { %p6631_p7 = pneg %p6630_p3  ;;  %p6635_p12 = por %p6634_p11, %p6633_p10 }
  0x36   : > { %p6636_p4 = pnand %p6635_p12, %p6631_p7 }
  0x38   : > { %6639 = shalt.err (!%p6636_p4)
}
  0x39   : > { %s6640_s12 = scalar_lea.vmem %s6935_s26, 65536  ;;  %s6791_s20 = smov [#allocation7]  }
  0x3a   : > { %p6641_p1 = scmp.ne.s32.totalorder %s6935_s26, %s6640_s12  ;;  %s6645_s24 = sshll.u32 %s6791_s20, 4  ;;  %s6646_s24 = int_to_ptr.vmem [resolvable:$false] %s6645_s24 }
  0x3b   : > { %s6647_s17 = scalar_lea.vmem %s6646_s24, 131072  ;;  %p6648_p9 = scmp.lt.s32.totalorder %s6935_s26, %s6646_s24 }
  0x3c   : > { %p6643_p0 = pnand %p6641_p1, %p6629_p2  ;;  %p6649_p5 = scmp.lt.s32.totalorder %s6647_s17, %s6640_s12 }
  0x3e   : > { %p6644_p3 = pneg %p6643_p0  ;;  %p6650_p6 = por %p6649_p5, %p6648_p9 }
  0x40   : > { %p6651_p10 = pnand %p6650_p6, %p6644_p3 }
  0x42   : > { %6654 = shalt.err (!%p6651_p10)
}
  0x43   : > { %s7696_s18 = smov 32   ;;  %s7697_s19 = smov 512  }
  0x44   : > { %6452 = dma.hbm_to_vmem [thread:$0]  (!%p6931_p13), %s6929_s16, 65536, %s6935_s26, %s6937_s27, %s7697_s19, %s7697_s19, %s7696_s18  }
  0x45   : > { %s6792_s15 = smov [#allocation9]   ;;  %p7698_p4 = pneg %p6883_p8 }
  0x46   : > { %s265_s21 = sshll.u32 %s6792_s15, 4  ;;  %s266_s21 = int_to_ptr.vmem [resolvable:$true] %s265_s21 }
  0x47   : > { %s6666_s22 = scalar_lea.vmem %s266_s21, 8192  ;;  %p6674_p9 = scmp.lt.s32.totalorder %s266_s21, %s266_s21 }
  0x48   : > { %p6667_p1 = scmp.ne.s32.totalorder %s266_s21, %s6666_s22  ;;  %p6675_p7 = scmp.lt.s32.totalorder %s6666_s22, %s6666_s22 }
  0x4a   : > { %p6669_p5 = pnand %p6667_p1, %p7698_p4  ;;  %p6676_p11 = por %p6675_p7, %p6674_p9 }
  0x4c   : > { %p6670_p6 = pneg %p6669_p5 }
  0x4e   : > { %p6677_p12 = pnand %p6676_p11, %p6670_p6 }
  0x50   : > { %6680 = shalt.err (!%p6677_p12)
}
  0x51   : > { %s6793_s12 = smov 64   ;;  %s6794_s16 = smov 4  }
  0x52   : > { %6445 = dma.hbm_to_vmem [thread:$0]  (!%p6883_p8), %s7679_s5, 8192, %s266_s21, [#allocation6], %s6793_s12, %s6793_s12, %s6794_s16  }
  0x53   : > { %s7699_s24 = sand.u32 1, %s6781_s29   ;;  %s6795_s18 = smov [#allocation10]  }
  0x54   : > { %s5671_s17 = sshll.u32 %s7699_s24, 3  ;;  %s279_s19 = sshll.u32 %s6795_s18, 4  ;;  %s280_s19 = int_to_ptr.vmem [resolvable:$true] %s279_s19 }
  0x55   : > { %s6327_s15 = sshll.u32 %s6785_s30, 7  ;;  %s6692_s22 = scalar_lea.vmem %s280_s19, 16 }
  0x56   : > { %p6693_p0 = scmp.ne.s32.totalorder %s280_s19, %s6692_s22  ;;  %p7700_p3 = pmov %p7698_p4 }
  0x57   : > { %s6699_s1 = scalar_lea.vmem %s280_s19, 32  ;;  %p6700_p4 = scmp.lt.s32.totalorder %s280_s19, %s280_s19 }
  0x58   : > { %p6695_p10 = pnand %p6693_p0, %p7700_p3  ;;  %p6701_p5 = scmp.lt.s32.totalorder %s6699_s1, %s6692_s22 }
  0x5a   : > { %p6696_p1 = pneg %p6695_p10  ;;  %p6702_p6 = por %p6701_p5, %p6700_p4 }
  0x5c   : > { %p6703_p9 = pnand %p6702_p6, %p6696_p1 }
  0x5e   : > { %6706 = shalt.err (!%p6703_p9)
}
  0x5f   : > { %6448 = dma.hbm_to_vmem [thread:$0]  (!%p6883_p8), %s7680_s6, 16, %s280_s19, [#allocation11]  }
  0x60   : > { %s321_s26 = scalar_lea.hbm %s7678_s4, %s6327_s15  ;;  %s315_s20 = scalar_lea.vmem [#allocation8], %s5671_s17 }
  0x61   : > { %s323_s24 = sshll.u32 %s315_s20, 4  ;;  %s6707_s18 = scalar_lea.hbm %s321_s26, 128  ;;  %s324_s24 = int_to_ptr.vmem [resolvable:$true] %s323_s24 }
  0x62   : > { %p6708_p7 = scmp.ne.s32.totalorder %s321_s26, %s6707_s18  ;;  %s6712_s22 = scalar_lea.hbm %s7678_s4, 640 }
  0x63   : > { %p6713_p8 = scmp.lt.s32.totalorder %s321_s26, %s7678_s4  ;;  %p6714_p0 = scmp.lt.s32.totalorder %s6712_s22, %s6707_s18 }
  0x64   : > { %p6710_p11 = pnand %p6708_p7, %p6629_p2 }
  0x65   : > { %p6715_p3 = por %p6714_p0, %p6713_p8 }
  0x66   : > { %p6711_p12 = pneg %p6710_p11 }
  0x68   : > { %p6716_p10 = pnand %p6715_p3, %p6711_p12 }
  0x6a   : > { %6719 = shalt.err (!%p6716_p10)
}
  0x6b   : > { %s6720_s17 = scalar_lea.vmem %s324_s24, 128  ;;  %s6796_s19 = smov [#allocation8]  }
  0x6c   : > { %p6721_p1 = scmp.ne.s32.totalorder %s324_s24, %s6720_s17  ;;  %s6725_s15 = sshll.u32 %s6796_s19, 4  ;;  %s6726_s15 = int_to_ptr.vmem [resolvable:$false] %s6725_s15 }
  0x6d   : > { %s6727_s30 = scalar_lea.vmem %s6726_s15, 256  ;;  %p6728_p6 = scmp.lt.s32.totalorder %s324_s24, %s6726_s15 }
  0x6e   : > { %p6723_p4 = pnand %p6721_p1, %p6629_p2  ;;  %p6729_p9 = scmp.lt.s32.totalorder %s6727_s30, %s6720_s17 }
  0x70   : > { %p6724_p5 = pneg %p6723_p4  ;;  %p6730_p7 = por %p6729_p9, %p6728_p6 }
  0x72   : > { %p6731_p11 = pnand %p6730_p7, %p6724_p5 }
  0x74   : > { %6734 = shalt.err (!%p6731_p11)
}
  0x75   : > { %6455 = dma.hbm_to_vmem [thread:$0]  (!%p6931_p13), %s321_s26, 128, %s324_s24, %s6937_s27  }
  0x76   : > { %p7701_p12 = scmp.ne.s32.totalorder %s7692_s11, 0 }
  0x77   : > { %p7702_p8 = scmp.eq.s32.totalorder (!%p7701_p12), %s6862_s9, 0 }
  0x78   : > { %332 = sbr.rel (%p7701_p12) target bundleno = 1720 (0x6b8), region = 48 }
  0x7d   : > { %6752 = dma.done.wait (%p7702_p8), [#allocation4], 8192   ;;  %p7703_p2 = pmov %p7702_p8 }
  0x7f   : > { %6754 = vsyncadd (%p7703_p2), [#allocation4], 4294959104  ;;  %p7704_p0 = pmov %p7703_p2 }
  0x81   : > { %6756 = dma.done.wait (%p7704_p0), [#allocation6], 128   ;;  %p7705_p3 = pmov %p7704_p0 }
  0x82   : > { %s342_s23 = sand.u32 1, %s6862_s9   ;;  %s344_s27 = sand.u32 1, %s6777_s28  }
  0x83   : > { %6758 = vsyncadd (%p7705_p3), [#allocation6], 4294967168  ;;  %s5677_s16 = sshll.u32 %s344_s27, 12  ;;  %s343_s11 = scalar_lea.sflag [#allocation4], %s342_s23 }
  0x84   : > { %s7016_s26 = scalar_lea.vmem [#allocation7], %s5677_s16  ;;  %p7706_p13 = scmp.ne.s32.totalorder %s7691_s10, 0 }
  0x86   : > { %6760 = dma.done.wait (%p7706_p13), %s343_s11, 65664  }
  0x87   : > { %6762 = vsyncadd (%p7706_p13), %s343_s11, 4294901632  ;;  %s7022_s20 = sshll.u32 %s344_s27, 3  ;;  %p7707_p10 = pmov %p7704_p0 }
  0x88   : > { %s355_s24 = scalar_lea.vmem [#allocation8], %s7022_s20 }
  0x89   : > { %6764 = dma.done.wait (%p7707_p10), [#allocation6], 8192   ;;  %p7708_p1 = pmov %p7704_p0 }
  0x8a   : > { %p7709_p4 = pmov %p7704_p0 }
  0x8b   : > { %6766 = vsyncadd (%p7708_p1), [#allocation6], 4294959104 }
  0x8c   : > { %6768 = dma.done.wait (%p7709_p4), [#allocation11], 16   ;;  %p7710_p5 = pmov %p7704_p0 }
  0x8d   : > { %p7711_p6 = scmp.ne.s32.totalorder %s6862_s9, 0 }
  0x8e   : > { %6770 = vsyncadd (%p7710_p5), [#allocation11], 4294967280 }
  0x8f   : > { %400 = sbr.rel (%p7711_p6) target bundleno = 418 (0x1a2), region = 76 }
  0x94   : > { %v458_v0 = vld [vmem:[#allocation3 + $0x1c0] sm:$0xff]  ;;  %v459_v2 = vld [vmem:[#allocation3 + $0x1c8] sm:$0xff]  ;;  %v6797_v8 = vmov 0   ;;  %v460_v63 = vld [vmem:[#allocation3 + $0x1d0] sm:$0xff] }
  0x95   : > { %v462_v1 = vld [vmem:[#allocation3 + $0x1e0] sm:$0xff]  ;;  %v463_v4 = vld [vmem:[#allocation3 + $0x1e8] sm:$0xff]  ;;  %860 = vmatprep.mubr.bf16.mxu0 %v6797_v8  ;;  %901 = vmatprep.mubr.bf16.mxu1 %v6797_v8 }
  0x96   : > { %v5739_v3 = vcombine.high %v458_v0, %v462_v1  ;;  %v5738_v5 = vcombine.low %v458_v0, %v462_v1  ;;  %v450_v6 = vld [vmem:[#allocation3 + $0x180] sm:$0xff]  ;;  %v5741_v9 = vcombine.high %v459_v2, %v463_v4  ;;  %v5740_v10 = vcombine.low %v459_v2, %v463_v4  ;;  %v451_v12 = vld [vmem:[#allocation3 + $0x188] sm:$0xff]  ;;  %v464_v0 = vld [vmem:[#allocation3 + $0x1f0] sm:$0xff] }
  0x97   : > { %v454_v7 = vld [vmem:[#allocation3 + $0x1a0] sm:$0xff]  ;;  %v455_v13 = vld [vmem:[#allocation3 + $0x1a8] sm:$0xff]  ;;  %v461_v1 = vld [vmem:[#allocation3 + $0x1d8] sm:$0xff] }
  0x98   : > { %v5731_v11 = vcombine.high %v450_v6, %v454_v7  ;;  %v442_v14 = vld [vmem:[#allocation3 + $0x140] sm:$0xff]  ;;  %828 = vmatprep.subr.bf16.mxu0 %v5739_v3  ;;  %v5733_v15 = vcombine.high %v451_v12, %v455_v13  ;;  %v443_v17 = vld [vmem:[#allocation3 + $0x148] sm:$0xff]  ;;  %869 = vmatprep.subr.bf16.mxu1 %v5741_v9  ;;  %v5730_v19 = vcombine.low %v450_v6, %v454_v7  ;;  %v465_v2 = vld [vmem:[#allocation3 + $0x1f8] sm:$0xff] }
  0x99   : > { %v446_v16 = vld [vmem:[#allocation3 + $0x160] sm:$0xff]  ;;  %v447_v18 = vld [vmem:[#allocation3 + $0x168] sm:$0xff]  ;;  %829 = vmatpush1.bf16.msra.mxu0 %v5738_v5  ;;  %870 = vmatpush1.bf16.msra.mxu1 %v5740_v10  ;;  %v5732_v20 = vcombine.low %v451_v12, %v455_v13  ;;  %v5743_v5 = vcombine.high %v460_v63, %v464_v0  ;;  %v5745_v6 = vcombine.high %v461_v1, %v465_v2  ;;  %v452_v7 = vld [vmem:[#allocation3 + $0x190] sm:$0xff] }
  0x9a   : > { %830 = vmatprep.subr.bf16.mxu0 %v5731_v11  ;;  %v5723_v21 = vcombine.high %v442_v14, %v446_v16  ;;  %871 = vmatprep.subr.bf16.mxu1 %v5733_v15  ;;  %v5725_v22 = vcombine.high %v443_v17, %v447_v18  ;;  %v434_v23 = vld [vmem:[#allocation3 + $0x100] sm:$0xff]  ;;  %v435_v25 = vld [vmem:[#allocation3 + $0x108] sm:$0xff]  ;;  %v5722_v27 = vcombine.low %v442_v14, %v446_v16  ;;  %v456_v9 = vld [vmem:[#allocation3 + $0x1b0] sm:$0xff] }
  0x9b   : > { %v438_v24 = vld [vmem:[#allocation3 + $0x120] sm:$0xff]  ;;  %v439_v26 = vld [vmem:[#allocation3 + $0x128] sm:$0xff]  ;;  %v5724_v28 = vcombine.low %v443_v17, %v447_v18  ;;  %v453_v10 = vld [vmem:[#allocation3 + $0x198] sm:$0xff]  ;;  %v5742_v13 = vcombine.low %v460_v63, %v464_v0  ;;  %v5744_v14 = vcombine.low %v461_v1, %v465_v2  ;;  %v5735_v15 = vcombine.high %v452_v7, %v456_v9 }
  0x9c   : > { %v5715_v29 = vcombine.high %v434_v23, %v438_v24  ;;  %v5717_v30 = vcombine.high %v435_v25, %v439_v26  ;;  %v426_v31 = vld [vmem:[#allocation3 + $0xc0] sm:$0xff]  ;;  %v427_v33 = vld [vmem:[#allocation3 + $0xc8] sm:$0xff]  ;;  %v5714_v35 = vcombine.low %v434_v23, %v438_v24  ;;  %v5716_v36 = vcombine.low %v435_v25, %v439_v26  ;;  %v457_v11 = vld [vmem:[#allocation3 + $0x1b8] sm:$0xff] }
  0x9d   : > { %831 = vmatpush1.bf16.msra.mxu0 %v5730_v19  ;;  %872 = vmatpush1.bf16.msra.mxu1 %v5732_v20  ;;  %v430_v32 = vld [vmem:[#allocation3 + $0xe0] sm:$0xff]  ;;  %v431_v34 = vld [vmem:[#allocation3 + $0xe8] sm:$0xff]  ;;  %v5737_v16 = vcombine.high %v453_v10, %v457_v11  ;;  %v444_v17 = vld [vmem:[#allocation3 + $0x150] sm:$0xff]  ;;  %v468_v2 = vlaneseq }
  0x9e   : > { %832 = vmatprep.subr.bf16.mxu0 %v5723_v21  ;;  %873 = vmatprep.subr.bf16.mxu1 %v5725_v22  ;;  %v5707_v37 = vcombine.high %v426_v31, %v430_v32  ;;  %v5709_v38 = vcombine.high %v427_v33, %v431_v34  ;;  %v418_v39 = vld [vmem:[#allocation3 + $0x80] sm:$0xff]  ;;  %v419_v41 = vld [vmem:[#allocation3 + $0x88] sm:$0xff]  ;;  %v5706_v43 = vcombine.low %v426_v31, %v430_v32  ;;  %v448_v18 = vld [vmem:[#allocation3 + $0x170] sm:$0xff] }
  0x9f   : > { %v422_v40 = vld [vmem:[#allocation3 + $0xa0] sm:$0xff]  ;;  %v423_v42 = vld [vmem:[#allocation3 + $0xa8] sm:$0xff]  ;;  %v5708_v44 = vcombine.low %v427_v33, %v431_v34  ;;  %v445_v19 = vld [vmem:[#allocation3 + $0x158] sm:$0xff]  ;;  %v5734_v21 = vcombine.low %v452_v7, %v456_v9  ;;  %v5736_v22 = vcombine.low %v453_v10, %v457_v11  ;;  %v5727_v23 = vcombine.high %v444_v17, %v448_v18 }
  0xa0   : > { %v5699_v45 = vcombine.high %v418_v39, %v422_v40  ;;  %v5701_v46 = vcombine.high %v419_v41, %v423_v42  ;;  %v410_v47 = vld [vmem:[#allocation3 + $0x40] sm:$0xff]  ;;  %v411_v49 = vld [vmem:[#allocation3 + $0x48] sm:$0xff]  ;;  %v5698_v51 = vcombine.low %v418_v39, %v422_v40  ;;  %v5700_v52 = vcombine.low %v419_v41, %v423_v42  ;;  %v449_v20 = vld [vmem:[#allocation3 + $0x178] sm:$0xff] }
  0xa1   : > { %833 = vmatpush1.bf16.msra.mxu0 %v5722_v27  ;;  %874 = vmatpush1.bf16.msra.mxu1 %v5724_v28  ;;  %v414_v48 = vld [vmem:[#allocation3 + $0x60] sm:$0xff]  ;;  %v415_v50 = vld [vmem:[#allocation3 + $0x68] sm:$0xff]  ;;  %v5729_v24 = vcombine.high %v445_v19, %v449_v20  ;;  %v436_v25 = vld [vmem:[#allocation3 + $0x110] sm:$0xff] }
  0xa2   : > { %834 = vmatprep.subr.bf16.mxu0 %v5715_v29  ;;  %875 = vmatprep.subr.bf16.mxu1 %v5717_v30  ;;  %v5691_v53 = vcombine.high %v410_v47, %v414_v48  ;;  %v5693_v54 = vcombine.high %v411_v49, %v415_v50  ;;  %v402_v55 = vld [vmem:[#allocation3] sm:$0xff]  ;;  %v403_v57 = vld [vmem:[#allocation3 + $0x8] sm:$0xff]  ;;  %v5690_v59 = vcombine.low %v410_v47, %v414_v48  ;;  %v440_v26 = vld [vmem:[#allocation3 + $0x130] sm:$0xff] }
  0xa3   : > { %v406_v56 = vld [vmem:[#allocation3 + $0x20] sm:$0xff]  ;;  %v407_v58 = vld [vmem:[#allocation3 + $0x28] sm:$0xff]  ;;  %v5692_v60 = vcombine.low %v411_v49, %v415_v50  ;;  %v437_v27 = vld [vmem:[#allocation3 + $0x118] sm:$0xff]  ;;  %v5726_v29 = vcombine.low %v444_v17, %v448_v18  ;;  %v5728_v30 = vcombine.low %v445_v19, %v449_v20  ;;  %v5719_v31 = vcombine.high %v436_v25, %v440_v26 }
  0xa4   : > { %v5683_v61 = vcombine.high %v402_v55, %v406_v56  ;;  %v5685_v62 = vcombine.high %v403_v57, %v407_v58  ;;  %v5682_v3 = vcombine.low %v402_v55, %v406_v56  ;;  %v5684_v4 = vcombine.low %v403_v57, %v407_v58  ;;  %v7040_v12 = vld [vmem:[%s7674_s0] sm:$0xf]  ;;  %v441_v28 = vld [vmem:[#allocation3 + $0x138] sm:$0xff]  ;;  %v428_v33 = vld [vmem:[#allocation3 + $0xd0] sm:$0xff] }
  0xa5   : > { %835 = vmatpush1.bf16.msra.mxu0 %v5714_v35  ;;  %876 = vmatpush1.bf16.msra.mxu1 %v5716_v36  ;;  %v5721_v32 = vcombine.high %v437_v27, %v441_v28  ;;  %v432_v34 = vld [vmem:[#allocation3 + $0xf0] sm:$0xff]  ;;  %v429_v35 = vld [vmem:[#allocation3 + $0xd8] sm:$0xff] }
  0xa6   : > { %836 = vmatprep.subr.bf16.mxu0 %v5707_v37  ;;  %877 = vmatprep.subr.bf16.mxu1 %v5709_v38  ;;  %v433_v36 = vld [vmem:[#allocation3 + $0xf8] sm:$0xff]  ;;  %v5718_v37 = vcombine.low %v436_v25, %v440_v26  ;;  %v5720_v38 = vcombine.low %v437_v27, %v441_v28  ;;  %v5711_v39 = vcombine.high %v428_v33, %v432_v34  ;;  %v420_v40 = vld [vmem:[#allocation3 + $0x90] sm:$0xff] }
  0xa7   : > { %v424_v41 = vld [vmem:[#allocation3 + $0xb0] sm:$0xff]  ;;  %v421_v42 = vld [vmem:[#allocation3 + $0x98] sm:$0xff] }
  0xa8   : > { %v412_v48 = vld [vmem:[#allocation3 + $0x50] sm:$0xff]  ;;  %v413_v50 = vld [vmem:[#allocation3 + $0x58] sm:$0xff] }
  0xa9   : > { %837 = vmatpush1.bf16.msra.mxu0 %v5706_v43  ;;  %878 = vmatpush1.bf16.msra.mxu1 %v5708_v44  ;;  %v425_v43 = vld [vmem:[#allocation3 + $0xb8] sm:$0xff]  ;;  %v5710_v44 = vcombine.low %v428_v33, %v432_v34  ;;  %v416_v49 = vld [vmem:[#allocation3 + $0x70] sm:$0xff] }
  0xaa   : > { %838 = vmatprep.subr.bf16.mxu0 %v5699_v45  ;;  %879 = vmatprep.subr.bf16.mxu1 %v5701_v46  ;;  %v5712_v45 = vcombine.low %v429_v35, %v433_v36  ;;  %v5703_v46 = vcombine.high %v420_v40, %v424_v41  ;;  %v5705_v47 = vcombine.high %v421_v42, %v425_v43  ;;  %v404_v56 = vld [vmem:[#allocation3 + $0x10] sm:$0xff]  ;;  %v405_v58 = vld [vmem:[#allocation3 + $0x18] sm:$0xff] }
  0xab   : > { %v408_v57 = vld [vmem:[#allocation3 + $0x30] sm:$0xff] }
  0xac   : > { %v5686_v0 = vcombine.low %v404_v56, %v408_v57 }
  0xad   : > { %839 = vmatpush1.bf16.msra.mxu0 %v5698_v51  ;;  %880 = vmatpush1.bf16.msra.mxu1 %v5700_v52  ;;  %v417_v51 = vld [vmem:[#allocation3 + $0x78] sm:$0xff]  ;;  %v5702_v52 = vcombine.low %v420_v40, %v424_v41 }
  0xae   : > { %840 = vmatprep.subr.bf16.mxu0 %v5691_v53  ;;  %881 = vmatprep.subr.bf16.mxu1 %v5693_v54  ;;  %v5704_v53 = vcombine.low %v421_v42, %v425_v43  ;;  %v5695_v54 = vcombine.high %v412_v48, %v416_v49  ;;  %v5697_v55 = vcombine.high %v413_v50, %v417_v51 }
  0xb1   : > { %841 = vmatpush1.bf16.msra.mxu0 %v5690_v59  ;;  %882 = vmatpush1.bf16.msra.mxu1 %v5692_v60  ;;  %v409_v59 = vld [vmem:[#allocation3 + $0x38] sm:$0xff]  ;;  %v5694_v60 = vcombine.low %v412_v48, %v416_v49 }
  0xb2   : > { %842 = vmatprep.subr.bf16.mxu0 %v5683_v61  ;;  %883 = vmatprep.subr.bf16.mxu1 %v5685_v62  ;;  %v5696_v61 = vcombine.low %v413_v50, %v417_v51  ;;  %v5687_v62 = vcombine.high %v404_v56, %v408_v57  ;;  %v5689_v63 = vcombine.high %v405_v58, %v409_v59 }
  0xb3   : > { %v5688_v1 = vcombine.low %v405_v58, %v409_v59 }
  0xb5   : > { %843 = vmatpush1.bf16.msra.mxu0 %v5682_v3  ;;  %884 = vmatpush1.bf16.msra.mxu1 %v5684_v4  ;;  %v469_v3 = vshrl.u32 %v468_v2, 7 }
  0xb6   : > { %910 = vmatprep.subr.bf16.mxu0 %v5743_v5  ;;  %951 = vmatprep.subr.bf16.mxu1 %v5745_v6  ;;  %v466_v5 = vld [vmem:[#allocation5] sm:$0xff] }
  0xb7   : > { %v470_v4 = vsub.s32 0, %v469_v3  ;;  %v478_v6 = vsub.s32 2, %v469_v3  ;;  %v474_v7 = vsub.s32 1, %v469_v3  ;;  %v482_v9 = vsub.s32 3, %v469_v3 }
  0xb8   : > { %861 = vmatmul.mubr.bf16.vlgmr.msra.gmra.mxu0 %v7040_v12  ;;  %902 = vmatmul.mubr.bf16.vlgmr.msra.gmra.mxu1 %v7040_v12  ;;  %v486_v34 = vsub.s32 4, %v469_v3 }
  0xb9   : > { %911 = vmatpush1.bf16.msra.mxu0 %v5742_v13  ;;  %952 = vmatpush1.bf16.msra.mxu1 %v5744_v14  ;;  %v471_v10 = vrot.slane %v466_v5, %v470_v4  ;;  %v479_v11 = vrot.slane %v466_v5, %v478_v6  ;;  %v475_v13 = vrot.slane %v466_v5, %v474_v7 }
  0xba   : > { %912 = vmatprep.subr.bf16.mxu0 %v5735_v15  ;;  %953 = vmatprep.subr.bf16.mxu1 %v5737_v16  ;;  %v483_v15 = vrot.slane %v466_v5, %v482_v9 }
  0xbb   : > { %942 = vmatprep.mubr.bf16.mxu0 %v6797_v8  ;;  %983 = vmatprep.mubr.bf16.mxu1 %v6797_v8  ;;  %v5713_v8 = vcombine.high %v429_v35, %v433_v36  ;;  %v494_v35 = vsub.s32 6, %v469_v3  ;;  %v490_v36 = vsub.s32 5, %v469_v3 }
  0xbd   : > { %913 = vmatpush1.bf16.msra.mxu0 %v5734_v21  ;;  %954 = vmatpush1.bf16.msra.mxu1 %v5736_v22 }
  0xbe   : > { %914 = vmatprep.subr.bf16.mxu0 %v5727_v23  ;;  %955 = vmatprep.subr.bf16.mxu1 %v5729_v24 }
  0xc1   : > { %915 = vmatpush1.bf16.msra.mxu0 %v5726_v29  ;;  %956 = vmatpush1.bf16.msra.mxu1 %v5728_v30 }
  0xc2   : > { %916 = vmatprep.subr.bf16.mxu0 %v5719_v31  ;;  %957 = vmatprep.subr.bf16.mxu1 %v5721_v32 }
  0xc5   : > { %917 = vmatpush1.bf16.msra.mxu0 %v5718_v37  ;;  %958 = vmatpush1.bf16.msra.mxu1 %v5720_v38  ;;  %v498_v37 = vsub.s32 7, %v469_v3  ;;  %v487_v38 = vrot.slane %v466_v5, %v486_v34 }
  0xc6   : > { %918 = vmatprep.subr.bf16.mxu0 %v5711_v39  ;;  %959 = vmatprep.subr.bf16.mxu1 %v5713_v8  ;;  %v495_v39 = vrot.slane %v466_v5, %v494_v35  ;;  %v491_v8 = vrot.slane %v466_v5, %v490_v36 }
  0xc7   : > { %v499_v41 = vrot.slane %v466_v5, %v498_v37 }
  0xc9   : > { %919 = vmatpush1.bf16.msra.mxu0 %v5710_v44  ;;  %960 = vmatpush1.bf16.msra.mxu1 %v5712_v45 }
  0xca   : > { %920 = vmatprep.subr.bf16.mxu0 %v5703_v46  ;;  %961 = vmatprep.subr.bf16.mxu1 %v5705_v47 }
  0xcd   : > { %921 = vmatpush1.bf16.msra.mxu0 %v5702_v52  ;;  %962 = vmatpush1.bf16.msra.mxu1 %v5704_v53 }
  0xce   : > { %922 = vmatprep.subr.bf16.mxu0 %v5695_v54  ;;  %963 = vmatprep.subr.bf16.mxu1 %v5697_v55 }
  0xd1   : > { %923 = vmatpush1.bf16.msra.mxu0 %v5694_v60  ;;  %964 = vmatpush1.bf16.msra.mxu1 %v5696_v61 }
  0xd2   : > { %924 = vmatprep.subr.bf16.mxu0 %v5687_v62  ;;  %965 = vmatprep.subr.bf16.mxu1 %v5689_v63 }
  0xd5   : > { %925 = vmatpush1.bf16.msra.mxu0 %v5686_v0  ;;  %966 = vmatpush1.bf16.msra.mxu1 %v5688_v1 }
  0xd8   : > { %943 = vmatmul.mubr.bf16.vlgmr.msra.gmra.mxu0 %v7040_v12  ;;  %984 = vmatmul.mubr.bf16.vlgmr.msra.gmra.mxu1 %v7040_v12 }
 0x178   : > { %v862_v14 = vpop.f32.mrf.mxu0  ;;  %v903_v17 = vpop.f32.mrf.mxu1 }
 0x179   : > { %v863_v16 = vadd.f32 %v862_v14, %v471_v10  ;;  %v904_v18 = vadd.f32 %v903_v17, %v479_v11 }
 0x17a   : > { %v864_v19 = vpop.f32.mrf.mxu0  ;;  %v905_v12 = vpop.f32.mrf.mxu1 }
 0x17b   : > { %vm992_vm0 = vcmp.gt.f32.partialorder %v863_v16, 0.0  ;;  %v1000_v20 = vmul.f32 0.01, %v863_v16  ;;  %v865_v21 = vadd.f32 %v864_v19, %v475_v13  ;;  %vm994_vm1 = vcmp.gt.f32.partialorder %v904_v18, 0.0 }
 0x17c   : > { %v1002_v22 = vmul.f32 0.01, %v904_v18  ;;  %v906_v23 = vadd.f32 %v905_v12, %v483_v15  ;;  %v866_v24 = vpop.f32.mrf.mxu0  ;;  %v907_v27 = vpop.f32.mrf.mxu1 }
 0x17d   : > { %v1008_v25 = vsel %vm992_vm0, %v863_v16, %v1000_v20  ;;  %vm993_vm2 = vcmp.gt.f32.partialorder %v865_v21, 0.0  ;;  %v1001_v26 = vmul.f32 0.01, %v865_v21 }
 0x17e   : > { %1016 = vst [vmem:[#allocation2 + $0x30] sm:$0xff] %v1008_v25  ;;  %v1010_v28 = vsel %vm994_vm1, %v904_v18, %v1002_v22  ;;  %vm995_vm3 = vcmp.gt.f32.partialorder %v906_v23, 0.0  ;;  %v1003_v29 = vmul.f32 0.01, %v906_v23  ;;  %v867_v30 = vpop.f32.mrf.mxu0  ;;  %v908_v32 = vpop.f32.mrf.mxu1 }
 0x17f   : > { %1018 = vst [vmem:[#allocation2 + $0x18] sm:$0xff] %v1010_v28  ;;  %v1009_v31 = vsel %vm993_vm2, %v865_v21, %v1001_v26 }
 0x180   : > { %1017 = vst [vmem:[#allocation2] sm:$0xff] %v1009_v31  ;;  %v1011_v33 = vsel %vm995_vm3, %v906_v23, %v1003_v29 }
 0x181   : > { %1019 = vst [vmem:[#allocation2 + $0x10] sm:$0xff] %v1011_v33 }
 0x198   : > { %v944_v40 = vpop.f32.mrf.mxu0  ;;  %v985_v43 = vpop.f32.mrf.mxu1 }
 0x199   : > { %v945_v42 = vadd.f32 %v944_v40, %v487_v38  ;;  %v986_v44 = vadd.f32 %v985_v43, %v495_v39 }
 0x19a   : > { %v946_v45 = vpop.f32.mrf.mxu0  ;;  %v987_v48 = vpop.f32.mrf.mxu1 }
 0x19b   : > { %vm996_vm4 = vcmp.gt.f32.partialorder %v945_v42, 0.0  ;;  %v1004_v46 = vmul.f32 0.01, %v945_v42  ;;  %v947_v47 = vadd.f32 %v946_v45, %v491_v8  ;;  %vm998_vm5 = vcmp.gt.f32.partialorder %v986_v44, 0.0 }
 0x19c   : > { %v1006_v49 = vmul.f32 0.01, %v986_v44  ;;  %v988_v50 = vadd.f32 %v987_v48, %v499_v41  ;;  %v948_v51 = vpop.f32.mrf.mxu0  ;;  %v989_v54 = vpop.f32.mrf.mxu1 }
 0x19d   : > { %v1012_v52 = vsel %vm996_vm4, %v945_v42, %v1004_v46  ;;  %vm997_vm6 = vcmp.gt.f32.partialorder %v947_v47, 0.0  ;;  %v1005_v53 = vmul.f32 0.01, %v947_v47 }
 0x19e   : > { %1020 = vst [vmem:[#allocation2 + $0x8] sm:$0xff] %v1012_v52  ;;  %v1014_v55 = vsel %vm998_vm5, %v986_v44, %v1006_v49  ;;  %vm999_vm7 = vcmp.gt.f32.partialorder %v988_v50, 0.0  ;;  %v1007_v56 = vmul.f32 0.01, %v988_v50  ;;  %v949_v57 = vpop.f32.mrf.mxu0  ;;  %v990_v59 = vpop.f32.mrf.mxu1 }
 0x19f   : > { %1022 = vst [vmem:[#allocation2 + $0x28] sm:$0xff] %v1014_v55  ;;  %v1013_v58 = vsel %vm997_vm6, %v947_v47, %v1005_v53 }
 0x1a0   : > { %1021 = vst [vmem:[#allocation2 + $0x20] sm:$0xff] %v1013_v58  ;;  %v1015_v60 = vsel %vm999_vm7, %v988_v50, %v1007_v56 }
 0x1a1   : > { %1023 = vst [vmem:[#allocation2 + $0x38] sm:$0xff] %v1015_v60 }
 0x1a2 PF: > { %v1096_v61 = vld [vmem:[%s7016_s26 + $0x1c0] sm:$0xff]  ;;  %v1025_v50 = vld [vmem:[#allocation2] sm:$0xff]  ;;  %v1027_v51 = vld [vmem:[#allocation2 + $0x10] sm:$0xff]  ;;  %p6258_p9 = scmp.ne.s32.totalorder %s6862_s9, 4 }
 0x1a3   : > { %v1100_v62 = vld [vmem:[%s7016_s26 + $0x1e0] sm:$0xff]  ;;  %v7078_v55 = vpack.c.bf16 %v1025_v50, %v1025_v50  ;;  %v7080_v56 = vpack.c.bf16 %v1027_v51, %v1027_v51 }
 0x1a4   : > { %v1224_v63 = vld [vmem:[%s7016_s26 + $0x5c0] sm:$0xff]  ;;  %v5803_v0 = vcombine.high %v1096_v61, %v1100_v62  ;;  %v5802_v2 = vcombine.low %v1096_v61, %v1100_v62 }
 0x1a5   : > { %v1228_v1 = vld [vmem:[%s7016_s26 + $0x5e0] sm:$0xff]  ;;  %4186 = vmatprep.mubr.bf16.mxu0 %v7078_v55  ;;  %4227 = vmatprep.mubr.bf16.mxu1 %v7080_v56 }
 0x1a6   : > { %v1088_v3 = vld [vmem:[%s7016_s26 + $0x180] sm:$0xff]  ;;  %v5931_v5 = vcombine.high %v1224_v63, %v1228_v1  ;;  %v5930_v6 = vcombine.low %v1224_v63, %v1228_v1  ;;  %4154 = vmatprep.subr.bf16.mxu0 %v5803_v0 }
 0x1a7   : > { %v1092_v4 = vld [vmem:[%s7016_s26 + $0x1a0] sm:$0xff]  ;;  %4155 = vmatpush1.bf16.msra.mxu0 %v5802_v2 }
 0x1a8   : > { %v5795_v7 = vcombine.high %v1088_v3, %v1092_v4  ;;  %v1216_v9 = vld [vmem:[%s7016_s26 + $0x580] sm:$0xff]  ;;  %4195 = vmatprep.subr.bf16.mxu1 %v5931_v5  ;;  %v5794_v17 = vcombine.low %v1088_v3, %v1092_v4 }
 0x1a9   : > { %v1220_v10 = vld [vmem:[%s7016_s26 + $0x5a0] sm:$0xff]  ;;  %4196 = vmatpush1.bf16.msra.mxu1 %v5930_v6 }
 0x1aa   : > { %v1080_v11 = vld [vmem:[%s7016_s26 + $0x140] sm:$0xff]  ;;  %v5923_v13 = vcombine.high %v1216_v9, %v1220_v10  ;;  %4156 = vmatprep.subr.bf16.mxu0 %v5795_v7  ;;  %v5922_v18 = vcombine.low %v1216_v9, %v1220_v10 }
 0x1ab   : > { %v1084_v14 = vld [vmem:[%s7016_s26 + $0x160] sm:$0xff]  ;;  %4157 = vmatpush1.bf16.msra.mxu0 %v5794_v17 }
 0x1ac   : > { %v1208_v15 = vld [vmem:[%s7016_s26 + $0x540] sm:$0xff]  ;;  %v5787_v19 = vcombine.high %v1080_v11, %v1084_v14  ;;  %4197 = vmatprep.subr.bf16.mxu1 %v5923_v13  ;;  %v5786_v24 = vcombine.low %v1080_v11, %v1084_v14 }
 0x1ad   : > { %v1212_v16 = vld [vmem:[%s7016_s26 + $0x560] sm:$0xff]  ;;  %4198 = vmatpush1.bf16.msra.mxu1 %v5922_v18 }
 0x1ae   : > { %v5915_v20 = vcombine.high %v1208_v15, %v1212_v16  ;;  %v1072_v21 = vld [vmem:[%s7016_s26 + $0x100] sm:$0xff]  ;;  %4158 = vmatprep.subr.bf16.mxu0 %v5787_v19  ;;  %v5914_v25 = vcombine.low %v1208_v15, %v1212_v16 }
 0x1af   : > { %v1076_v12 = vld [vmem:[%s7016_s26 + $0x120] sm:$0xff]  ;;  %4159 = vmatpush1.bf16.msra.mxu0 %v5786_v24 }
 0x1b0   : > { %v1200_v22 = vld [vmem:[%s7016_s26 + $0x500] sm:$0xff]  ;;  %v5779_v26 = vcombine.high %v1072_v21, %v1076_v12  ;;  %4199 = vmatprep.subr.bf16.mxu1 %v5915_v20  ;;  %v5778_v32 = vcombine.low %v1072_v21, %v1076_v12 }
 0x1b1   : > { %v1204_v23 = vld [vmem:[%s7016_s26 + $0x520] sm:$0xff]  ;;  %4200 = vmatpush1.bf16.msra.mxu1 %v5914_v25 }
 0x1b2   : > { %v5907_v27 = vcombine.high %v1200_v22, %v1204_v23  ;;  %v1064_v28 = vld [vmem:[%s7016_s26 + $0xc0] sm:$0xff]  ;;  %4160 = vmatprep.subr.bf16.mxu0 %v5779_v26  ;;  %v5906_v33 = vcombine.low %v1200_v22, %v1204_v23 }
 0x1b3   : > { %v1068_v29 = vld [vmem:[%s7016_s26 + $0xe0] sm:$0xff]  ;;  %4161 = vmatpush1.bf16.msra.mxu0 %v5778_v32 }
 0x1b4   : > { %v1192_v30 = vld [vmem:[%s7016_s26 + $0x4c0] sm:$0xff]  ;;  %v5771_v34 = vcombine.high %v1064_v28, %v1068_v29  ;;  %4201 = vmatprep.subr.bf16.mxu1 %v5907_v27  ;;  %v5770_v8 = vcombine.low %v1064_v28, %v1068_v29 }
 0x1b5   : > { %v1196_v31 = vld [vmem:[%s7016_s26 + $0x4e0] sm:$0xff]  ;;  %4202 = vmatpush1.bf16.msra.mxu1 %v5906_v33 }
 0x1b6   : > { %v5899_v35 = vcombine.high %v1192_v30, %v1196_v31  ;;  %v1056_v36 = vld [vmem:[%s7016_s26 + $0x80] sm:$0xff]  ;;  %4162 = vmatprep.subr.bf16.mxu0 %v5771_v34  ;;  %v5898_v40 = vcombine.low %v1192_v30, %v1196_v31 }
 0x1b7   : > { %v1060_v37 = vld [vmem:[%s7016_s26 + $0xa0] sm:$0xff]  ;;  %4163 = vmatpush1.bf16.msra.mxu0 %v5770_v8 }
 0x1b8   : > { %v1184_v38 = vld [vmem:[%s7016_s26 + $0x480] sm:$0xff]  ;;  %v5763_v41 = vcombine.high %v1056_v36, %v1060_v37  ;;  %4203 = vmatprep.subr.bf16.mxu1 %v5899_v35  ;;  %v5762_v47 = vcombine.low %v1056_v36, %v1060_v37 }
 0x1b9   : > { %v1188_v39 = vld [vmem:[%s7016_s26 + $0x4a0] sm:$0xff]  ;;  %4204 = vmatpush1.bf16.msra.mxu1 %v5898_v40 }
 0x1ba   : > { %v5891_v42 = vcombine.high %v1184_v38, %v1188_v39  ;;  %v1048_v43 = vld [vmem:[%s7016_s26 + $0x40] sm:$0xff]  ;;  %4164 = vmatprep.subr.bf16.mxu0 %v5763_v41  ;;  %v5890_v48 = vcombine.low %v1184_v38, %v1188_v39 }
 0x1bb   : > { %v1052_v44 = vld [vmem:[%s7016_s26 + $0x60] sm:$0xff]  ;;  %4165 = vmatpush1.bf16.msra.mxu0 %v5762_v47 }
 0x1bc   : > { %v1176_v45 = vld [vmem:[%s7016_s26 + $0x440] sm:$0xff]  ;;  %v5755_v49 = vcombine.high %v1048_v43, %v1052_v44  ;;  %4205 = vmatprep.subr.bf16.mxu1 %v5891_v42  ;;  %v5754_v59 = vcombine.low %v1048_v43, %v1052_v44 }
 0x1bd   : > { %v1180_v46 = vld [vmem:[%s7016_s26 + $0x460] sm:$0xff]  ;;  %4206 = vmatpush1.bf16.msra.mxu1 %v5890_v48 }
 0x1be   : > { %v5883_v52 = vcombine.high %v1176_v45, %v1180_v46  ;;  %v1040_v53 = vld [vmem:[%s7016_s26] sm:$0xff]  ;;  %4166 = vmatprep.subr.bf16.mxu0 %v5755_v49  ;;  %v5882_v60 = vcombine.low %v1176_v45, %v1180_v46 }
 0x1bf   : > { %v1044_v54 = vld [vmem:[%s7016_s26 + $0x20] sm:$0xff]  ;;  %4167 = vmatpush1.bf16.msra.mxu0 %v5754_v59 }
 0x1c0   : > { %v1168_v57 = vld [vmem:[%s7016_s26 + $0x400] sm:$0xff]  ;;  %v5747_v61 = vcombine.high %v1040_v53, %v1044_v54  ;;  %4207 = vmatprep.subr.bf16.mxu1 %v5883_v52  ;;  %v5746_v3 = vcombine.low %v1040_v53, %v1044_v54 }
 0x1c1   : > { %v1172_v58 = vld [vmem:[%s7016_s26 + $0x420] sm:$0xff]  ;;  %4208 = vmatpush1.bf16.msra.mxu1 %v5882_v60 }
 0x1c2   : > { %v5875_v62 = vcombine.high %v1168_v57, %v1172_v58  ;;  %v1160_v63 = vld [vmem:[%s7016_s26 + $0x3c0] sm:$0xff]  ;;  %4168 = vmatprep.subr.bf16.mxu0 %v5747_v61  ;;  %v5874_v4 = vcombine.low %v1168_v57, %v1172_v58 }
 0x1c3   : > { %v1164_v0 = vld [vmem:[%s7016_s26 + $0x3e0] sm:$0xff]  ;;  %4169 = vmatpush1.bf16.msra.mxu0 %v5746_v3 }
 0x1c4   : > { %v1288_v1 = vld [vmem:[%s7016_s26 + $0x7c0] sm:$0xff]  ;;  %v5867_v5 = vcombine.high %v1160_v63, %v1164_v0  ;;  %4209 = vmatprep.subr.bf16.mxu1 %v5875_v62  ;;  %v5866_v13 = vcombine.low %v1160_v63, %v1164_v0 }
 0x1c5   : > { %v1292_v2 = vld [vmem:[%s7016_s26 + $0x7e0] sm:$0xff]  ;;  %4210 = vmatpush1.bf16.msra.mxu1 %v5874_v4 }
 0x1c6   : > { %v5995_v6 = vcombine.high %v1288_v1, %v1292_v2  ;;  %v1152_v7 = vld [vmem:[%s7016_s26 + $0x380] sm:$0xff]  ;;  %4170 = vmatprep.subr.bf16.mxu0 %v5867_v5  ;;  %v5994_v14 = vcombine.low %v1288_v1, %v1292_v2 }
 0x1c7   : > { %v1156_v9 = vld [vmem:[%s7016_s26 + $0x3a0] sm:$0xff]  ;;  %4171 = vmatpush2.bf16.msra.mxu0 %v5866_v13 }
 0x1c8   : > { %v1280_v10 = vld [vmem:[%s7016_s26 + $0x780] sm:$0xff]  ;;  %v5859_v15 = vcombine.high %v1152_v7, %v1156_v9  ;;  %4211 = vmatprep.subr.bf16.mxu1 %v5995_v6  ;;  %v5858_v21 = vcombine.low %v1152_v7, %v1156_v9  ;;  %v1024_v6 = vld [vmem:[#allocation2 + $0x30] sm:$0xff]  ;;  %v1026_v9 = vld [vmem:[#allocation2 + $0x18] sm:$0xff] }
 0x1c9   : > { %v1284_v11 = vld [vmem:[%s7016_s26 + $0x7a0] sm:$0xff]  ;;  %4212 = vmatpush2.bf16.msra.mxu1 %v5994_v14 }
 0x1ca   : > { %v5987_v16 = vcombine.high %v1280_v10, %v1284_v11  ;;  %v1144_v17 = vld [vmem:[%s7016_s26 + $0x340] sm:$0xff]  ;;  %4172 = vmatprep.subr.bf16.mxu0 %v5859_v15  ;;  %v5986_v12 = vcombine.low %v1280_v10, %v1284_v11  ;;  %v7124_v15 = vpack.c.bf16 %v1024_v6, %v1024_v6 }
 0x1cb   : > { %v1148_v18 = vld [vmem:[%s7016_s26 + $0x360] sm:$0xff]  ;;  %4173 = vmatpush2.bf16.msra.mxu0 %v5858_v21  ;;  %v1031_v21 = vld [vmem:[#allocation2 + $0x38] sm:$0xff] }
 0x1cc   : > { %v1272_v19 = vld [vmem:[%s7016_s26 + $0x740] sm:$0xff]  ;;  %v5851_v22 = vcombine.high %v1144_v17, %v1148_v18  ;;  %4213 = vmatprep.subr.bf16.mxu1 %v5987_v16  ;;  %v5850_v28 = vcombine.low %v1144_v17, %v1148_v18  ;;  %v1029_v18 = vld [vmem:[#allocation2 + $0x20] sm:$0xff] }
 0x1cd   : > { %v1276_v20 = vld [vmem:[%s7016_s26 + $0x760] sm:$0xff]  ;;  %4214 = vmatpush2.bf16.msra.mxu1 %v5986_v12 }
 0x1ce   : > { %v5979_v23 = vcombine.high %v1272_v19, %v1276_v20  ;;  %v1136_v24 = vld [vmem:[%s7016_s26 + $0x300] sm:$0xff]  ;;  %4174 = vmatprep.subr.bf16.mxu0 %v5851_v22  ;;  %v5978_v29 = vcombine.low %v1272_v19, %v1276_v20  ;;  %v7128_v19 = vpack.c.bf16 %v1026_v9, %v1026_v9 }
 0x1cf   : > { %v1140_v25 = vld [vmem:[%s7016_s26 + $0x320] sm:$0xff]  ;;  %4175 = vmatpush2.bf16.msra.mxu0 %v5850_v28 }
 0x1d0   : > { %v1264_v26 = vld [vmem:[%s7016_s26 + $0x700] sm:$0xff]  ;;  %v5843_v30 = vcombine.high %v1136_v24, %v1140_v25  ;;  %4215 = vmatprep.subr.bf16.mxu1 %v5979_v23  ;;  %v5842_v36 = vcombine.low %v1136_v24, %v1140_v25 }
 0x1d1   : > { %v1268_v27 = vld [vmem:[%s7016_s26 + $0x720] sm:$0xff]  ;;  %4216 = vmatpush2.bf16.msra.mxu1 %v5978_v29  ;;  %v7137_v29 = vpack.c.bf16 %v1031_v21, %v1031_v21 }
 0x1d2   : > { %v5971_v31 = vcombine.high %v1264_v26, %v1268_v27  ;;  %v1128_v32 = vld [vmem:[%s7016_s26 + $0x2c0] sm:$0xff]  ;;  %4176 = vmatprep.subr.bf16.mxu0 %v5843_v30  ;;  %v5970_v37 = vcombine.low %v1264_v26, %v1268_v27  ;;  %v7132_v26 = vpack.c.bf16 %v1029_v18, %v1029_v18 }
 0x1d3   : > { %v1132_v33 = vld [vmem:[%s7016_s26 + $0x2e0] sm:$0xff]  ;;  %4177 = vmatpush2.bf16.msra.mxu0 %v5842_v36 }
 0x1d4   : > { %v1256_v34 = vld [vmem:[%s7016_s26 + $0x6c0] sm:$0xff]  ;;  %v5835_v38 = vcombine.high %v1128_v32, %v1132_v33  ;;  %4217 = vmatprep.subr.bf16.mxu1 %v5971_v31  ;;  %v5834_v43 = vcombine.low %v1128_v32, %v1132_v33 }
 0x1d5   : > { %v1260_v35 = vld [vmem:[%s7016_s26 + $0x6e0] sm:$0xff]  ;;  %4218 = vmatpush2.bf16.msra.mxu1 %v5970_v37 }
 0x1d6   : > { %v5963_v39 = vcombine.high %v1256_v34, %v1260_v35  ;;  %v1120_v8 = vld [vmem:[%s7016_s26 + $0x280] sm:$0xff]  ;;  %4178 = vmatprep.subr.bf16.mxu0 %v5835_v38  ;;  %v5962_v44 = vcombine.low %v1256_v34, %v1260_v35 }
 0x1d7   : > { %v1124_v40 = vld [vmem:[%s7016_s26 + $0x2a0] sm:$0xff]  ;;  %4179 = vmatpush2.bf16.msra.mxu0 %v5834_v43 }
 0x1d8   : > { %v1248_v41 = vld [vmem:[%s7016_s26 + $0x680] sm:$0xff]  ;;  %v5827_v45 = vcombine.high %v1120_v8, %v1124_v40  ;;  %4219 = vmatprep.subr.bf16.mxu1 %v5963_v39  ;;  %v5826_v51 = vcombine.low %v1120_v8, %v1124_v40 }
 0x1d9   : > { %v1252_v42 = vld [vmem:[%s7016_s26 + $0x6a0] sm:$0xff]  ;;  %4220 = vmatpush2.bf16.msra.mxu1 %v5962_v44 }
 0x1da   : > { %v5955_v46 = vcombine.high %v1248_v41, %v1252_v42  ;;  %v1112_v47 = vld [vmem:[%s7016_s26 + $0x240] sm:$0xff]  ;;  %4180 = vmatprep.subr.bf16.mxu0 %v5827_v45  ;;  %v5954_v52 = vcombine.low %v1248_v41, %v1252_v42 }
 0x1db   : > { %v1116_v48 = vld [vmem:[%s7016_s26 + $0x260] sm:$0xff]  ;;  %4181 = vmatpush2.bf16.msra.mxu0 %v5826_v51 }
 0x1dc   : > { %v1240_v49 = vld [vmem:[%s7016_s26 + $0x640] sm:$0xff]  ;;  %v5819_v53 = vcombine.high %v1112_v47, %v1116_v48  ;;  %4221 = vmatprep.subr.bf16.mxu1 %v5955_v46  ;;  %v5818_v61 = vcombine.low %v1112_v47, %v1116_v48 }
 0x1dd   : > { %v1244_v50 = vld [vmem:[%s7016_s26 + $0x660] sm:$0xff]  ;;  %4222 = vmatpush2.bf16.msra.mxu1 %v5954_v52 }
 0x1de   : > { %v5947_v54 = vcombine.high %v1240_v49, %v1244_v50  ;;  %v1104_v57 = vld [vmem:[%s7016_s26 + $0x200] sm:$0xff]  ;;  %4182 = vmatprep.subr.bf16.mxu0 %v5819_v53  ;;  %v5946_v62 = vcombine.low %v1240_v49, %v1244_v50 }
 0x1df   : > { %v1108_v58 = vld [vmem:[%s7016_s26 + $0x220] sm:$0xff]  ;;  %4183 = vmatpush2.bf16.msra.mxu0 %v5818_v61 }
 0x1e0   : > { %v1232_v59 = vld [vmem:[%s7016_s26 + $0x600] sm:$0xff]  ;;  %v5811_v63 = vcombine.high %v1104_v57, %v1108_v58  ;;  %4223 = vmatprep.subr.bf16.mxu1 %v5947_v54  ;;  %v5810_v5 = vcombine.low %v1104_v57, %v1108_v58 }
 0x1e1   : > { %v1236_v60 = vld [vmem:[%s7016_s26 + $0x620] sm:$0xff]  ;;  %4224 = vmatpush2.bf16.msra.mxu1 %v5946_v62 }
 0x1e2   : > { %v5939_v0 = vcombine.high %v1232_v59, %v1236_v60  ;;  %v1352_v1 = vld [vmem:[%s7016_s26 + $0x9c0] sm:$0xff]  ;;  %4184 = vmatprep.subr.bf16.mxu0 %v5811_v63  ;;  %v5938_v7 = vcombine.low %v1232_v59, %v1236_v60 }
 0x1e3   : > { %v1356_v2 = vld [vmem:[%s7016_s26 + $0x9e0] sm:$0xff]  ;;  %4185 = vmatpush2.bf16.msra.mxu0 %v5810_v5 }
 0x1e4   : > { %v1480_v3 = vld [vmem:[%s7016_s26 + $0xdc0] sm:$0xff]  ;;  %v6059_v10 = vcombine.high %v1352_v1, %v1356_v2  ;;  %4225 = vmatprep.subr.bf16.mxu1 %v5939_v0  ;;  %v6058_v20 = vcombine.low %v1352_v1, %v1356_v2 }
 0x1e5   : > { %v1484_v4 = vld [vmem:[%s7016_s26 + $0xde0] sm:$0xff]  ;;  %4226 = vmatpush2.bf16.msra.mxu1 %v5938_v7 }
 0x1e6   : > { %v6187_v11 = vcombine.high %v1480_v3, %v1484_v4  ;;  %v1344_v13 = vld [vmem:[%s7016_s26 + $0x980] sm:$0xff]  ;;  %4236 = vmatprep.subr.bf16.mxu0 %v6059_v10  ;;  %v6186_v12 = vcombine.low %v1480_v3, %v1484_v4  ;;  %4187 = vmatmul.mubr.bf16.vlgmr.msra.gmra.mxu0 %v7124_v15 }
 0x1e7   : > { %v1348_v14 = vld [vmem:[%s7016_s26 + $0x9a0] sm:$0xff]  ;;  %4237 = vmatpush1.bf16.msra.mxu0 %v6058_v20  ;;  %4268 = vmatprep.mubr.bf16.mxu0 %v7132_v26 }
 0x1e8   : > { %v1472_v16 = vld [vmem:[%s7016_s26 + $0xd80] sm:$0xff]  ;;  %v6051_v22 = vcombine.high %v1344_v13, %v1348_v14  ;;  %4277 = vmatprep.subr.bf16.mxu1 %v6187_v11  ;;  %4228 = vmatmul.mubr.bf16.vlgmr.msra.gmra.mxu1 %v7128_v19  ;;  %v6050_v30 = vcombine.low %v1344_v13, %v1348_v14 }
 0x1e9   : > { %v1476_v17 = vld [vmem:[%s7016_s26 + $0xda0] sm:$0xff]  ;;  %4278 = vmatpush1.bf16.msra.mxu1 %v6186_v12  ;;  %4309 = vmatprep.mubr.bf16.mxu1 %v7137_v29 }
 0x1ea   : > { %v6179_v23 = vcombine.high %v1472_v16, %v1476_v17  ;;  %v1336_v24 = vld [vmem:[%s7016_s26 + $0x940] sm:$0xff]  ;;  %4238 = vmatprep.subr.bf16.mxu0 %v6051_v22  ;;  %v6178_v31 = vcombine.low %v1472_v16, %v1476_v17 }
 0x1eb   : > { %v1340_v25 = vld [vmem:[%s7016_s26 + $0x960] sm:$0xff]  ;;  %4239 = vmatpush1.bf16.msra.mxu0 %v6050_v30 }
 0x1ec   : > { %v1464_v27 = vld [vmem:[%s7016_s26 + $0xd40] sm:$0xff]  ;;  %v6043_v32 = vcombine.high %v1336_v24, %v1340_v25  ;;  %4279 = vmatprep.subr.bf16.mxu1 %v6179_v23  ;;  %v6042_v38 = vcombine.low %v1336_v24, %v1340_v25 }
 0x1ed   : > { %v1468_v28 = vld [vmem:[%s7016_s26 + $0xd60] sm:$0xff]  ;;  %4280 = vmatpush1.bf16.msra.mxu1 %v6178_v31 }
 0x1ee   : > { %v6171_v33 = vcombine.high %v1464_v27, %v1468_v28  ;;  %v1328_v34 = vld [vmem:[%s7016_s26 + $0x900] sm:$0xff]  ;;  %4240 = vmatprep.subr.bf16.mxu0 %v6043_v32  ;;  %v6170_v39 = vcombine.low %v1464_v27, %v1468_v28 }
 0x1ef   : > { %v1332_v35 = vld [vmem:[%s7016_s26 + $0x920] sm:$0xff]  ;;  %4241 = vmatpush1.bf16.msra.mxu0 %v6042_v38 }
 0x1f0   : > { %v1456_v36 = vld [vmem:[%s7016_s26 + $0xd00] sm:$0xff]  ;;  %v6035_v8 = vcombine.high %v1328_v34, %v1332_v35  ;;  %4281 = vmatprep.subr.bf16.mxu1 %v6171_v33  ;;  %v6034_v45 = vcombine.low %v1328_v34, %v1332_v35 }
 0x1f1   : > { %v1460_v37 = vld [vmem:[%s7016_s26 + $0xd20] sm:$0xff]  ;;  %4282 = vmatpush1.bf16.msra.mxu1 %v6170_v39 }
 0x1f2   : > { %v6163_v40 = vcombine.high %v1456_v36, %v1460_v37  ;;  %v1320_v41 = vld [vmem:[%s7016_s26 + $0x8c0] sm:$0xff]  ;;  %4242 = vmatprep.subr.bf16.mxu0 %v6035_v8  ;;  %v6162_v46 = vcombine.low %v1456_v36, %v1460_v37 }
 0x1f3   : > { %v1324_v42 = vld [vmem:[%s7016_s26 + $0x8e0] sm:$0xff]  ;;  %4243 = vmatpush1.bf16.msra.mxu0 %v6034_v45 }
 0x1f4   : > { %v1448_v43 = vld [vmem:[%s7016_s26 + $0xcc0] sm:$0xff]  ;;  %v6027_v47 = vcombine.high %v1320_v41, %v1324_v42  ;;  %4283 = vmatprep.subr.bf16.mxu1 %v6163_v40  ;;  %v6026_v53 = vcombine.low %v1320_v41, %v1324_v42 }
 0x1f5   : > { %v1452_v44 = vld [vmem:[%s7016_s26 + $0xce0] sm:$0xff]  ;;  %4284 = vmatpush1.bf16.msra.mxu1 %v6162_v46 }
 0x1f6   : > { %v6155_v48 = vcombine.high %v1448_v43, %v1452_v44  ;;  %v1312_v49 = vld [vmem:[%s7016_s26 + $0x880] sm:$0xff]  ;;  %4244 = vmatprep.subr.bf16.mxu0 %v6027_v47  ;;  %v6154_v54 = vcombine.low %v1448_v43, %v1452_v44 }
 0x1f7   : > { %v1316_v50 = vld [vmem:[%s7016_s26 + $0x8a0] sm:$0xff]  ;;  %4245 = vmatpush1.bf16.msra.mxu0 %v6026_v53 }
 0x1f8   : > { %v1440_v51 = vld [vmem:[%s7016_s26 + $0xc80] sm:$0xff]  ;;  %v6019_v57 = vcombine.high %v1312_v49, %v1316_v50  ;;  %4285 = vmatprep.subr.bf16.mxu1 %v6155_v48  ;;  %v6018_v63 = vcombine.low %v1312_v49, %v1316_v50 }
 0x1f9   : > { %v1444_v52 = vld [vmem:[%s7016_s26 + $0xca0] sm:$0xff]  ;;  %4286 = vmatpush1.bf16.msra.mxu1 %v6154_v54 }
 0x1fa   : > { %v6147_v58 = vcombine.high %v1440_v51, %v1444_v52  ;;  %v1304_v59 = vld [vmem:[%s7016_s26 + $0x840] sm:$0xff]  ;;  %4246 = vmatprep.subr.bf16.mxu0 %v6019_v57  ;;  %v6146_v0 = vcombine.low %v1440_v51, %v1444_v52 }
 0x1fb   : > { %v1308_v60 = vld [vmem:[%s7016_s26 + $0x860] sm:$0xff]  ;;  %4247 = vmatpush1.bf16.msra.mxu0 %v6018_v63 }
 0x1fc   : > { %v1432_v61 = vld [vmem:[%s7016_s26 + $0xc40] sm:$0xff]  ;;  %v6011_v1 = vcombine.high %v1304_v59, %v1308_v60  ;;  %4287 = vmatprep.subr.bf16.mxu1 %v6147_v58  ;;  %v6010_v7 = vcombine.low %v1304_v59, %v1308_v60 }
 0x1fd   : > { %v1436_v62 = vld [vmem:[%s7016_s26 + $0xc60] sm:$0xff]  ;;  %4288 = vmatpush1.bf16.msra.mxu1 %v6146_v0 }
 0x1fe   : > { %v6139_v2 = vcombine.high %v1432_v61, %v1436_v62  ;;  %v1296_v3 = vld [vmem:[%s7016_s26 + $0x800] sm:$0xff]  ;;  %4248 = vmatprep.subr.bf16.mxu0 %v6011_v1  ;;  %v6138_v9 = vcombine.low %v1432_v61, %v1436_v62 }
 0x1ff   : > { %v1300_v4 = vld [vmem:[%s7016_s26 + $0x820] sm:$0xff]  ;;  %4249 = vmatpush1.bf16.msra.mxu0 %v6010_v7 }
 0x200   : > { %v1424_v5 = vld [vmem:[%s7016_s26 + $0xc00] sm:$0xff]  ;;  %v6003_v10 = vcombine.high %v1296_v3, %v1300_v4  ;;  %4289 = vmatprep.subr.bf16.mxu1 %v6139_v2  ;;  %v6002_v18 = vcombine.low %v1296_v3, %v1300_v4 }
 0x201   : > { %v1428_v6 = vld [vmem:[%s7016_s26 + $0xc20] sm:$0xff]  ;;  %4290 = vmatpush1.bf16.msra.mxu1 %v6138_v9 }
 0x202   : > { %v6131_v11 = vcombine.high %v1424_v5, %v1428_v6  ;;  %v1416_v13 = vld [vmem:[%s7016_s26 + $0xbc0] sm:$0xff]  ;;  %4250 = vmatprep.subr.bf16.mxu0 %v6003_v10  ;;  %v6130_v20 = vcombine.low %v1424_v5, %v1428_v6 }
 0x203   : > { %v1420_v14 = vld [vmem:[%s7016_s26 + $0xbe0] sm:$0xff]  ;;  %4251 = vmatpush1.bf16.msra.mxu0 %v6002_v18 }
 0x204   : > { %v1544_v16 = vld [vmem:[%s7016_s26 + $0xfc0] sm:$0xff]  ;;  %v6123_v21 = vcombine.high %v1416_v13, %v1420_v14  ;;  %4291 = vmatprep.subr.bf16.mxu1 %v6131_v11  ;;  %v6122_v27 = vcombine.low %v1416_v13, %v1420_v14 }
 0x205   : > { %v1548_v17 = vld [vmem:[%s7016_s26 + $0xfe0] sm:$0xff]  ;;  %4292 = vmatpush1.bf16.msra.mxu1 %v6130_v20 }
 0x206   : > { %v6251_v12 = vcombine.high %v1544_v16, %v1548_v17  ;;  %v1408_v22 = vld [vmem:[%s7016_s26 + $0xb80] sm:$0xff]  ;;  %4252 = vmatprep.subr.bf16.mxu0 %v6123_v21  ;;  %v6250_v28 = vcombine.low %v1544_v16, %v1548_v17  ;;  %v1097_v21 = vld [vmem:[%s7016_s26 + $0x1c8] sm:$0xff] }
 0x207   : > { %v1412_v23 = vld [vmem:[%s7016_s26 + $0xba0] sm:$0xff]  ;;  %4253 = vmatpush2.bf16.msra.mxu0 %v6122_v27 }
 0x208   : > { %v1536_v24 = vld [vmem:[%s7016_s26 + $0xf80] sm:$0xff]  ;;  %v6115_v30 = vcombine.high %v1408_v22, %v1412_v23  ;;  %4293 = vmatprep.subr.bf16.mxu1 %v6251_v12  ;;  %v6114_v36 = vcombine.low %v1408_v22, %v1412_v23  ;;  %v1101_v12 = vld [vmem:[%s7016_s26 + $0x1e8] sm:$0xff] }
 0x209   : > { %v1540_v25 = vld [vmem:[%s7016_s26 + $0xfa0] sm:$0xff]  ;;  %4294 = vmatpush2.bf16.msra.mxu1 %v6250_v28  ;;  %v1225_v22 = vld [vmem:[%s7016_s26 + $0x5c8] sm:$0xff] }
 0x20a   : > { %v6243_v31 = vcombine.high %v1536_v24, %v1540_v25  ;;  %v1400_v32 = vld [vmem:[%s7016_s26 + $0xb40] sm:$0xff]  ;;  %4254 = vmatprep.subr.bf16.mxu0 %v6115_v30  ;;  %v6242_v37 = vcombine.low %v1536_v24, %v1540_v25  ;;  %v1229_v23 = vld [vmem:[%s7016_s26 + $0x5e8] sm:$0xff]  ;;  %v5805_v30 = vcombine.high %v1097_v21, %v1101_v12 }
 0x20b   : > { %v1404_v33 = vld [vmem:[%s7016_s26 + $0xb60] sm:$0xff]  ;;  %4255 = vmatpush2.bf16.msra.mxu0 %v6114_v36  ;;  %v1221_v36 = vld [vmem:[%s7016_s26 + $0x5a8] sm:$0xff] }
 0x20c   : > { %v1528_v34 = vld [vmem:[%s7016_s26 + $0xf40] sm:$0xff]  ;;  %v6107_v38 = vcombine.high %v1400_v32, %v1404_v33  ;;  %4295 = vmatprep.subr.bf16.mxu1 %v6243_v31  ;;  %v6106_v43 = vcombine.low %v1400_v32, %v1404_v33  ;;  %v5933_v31 = vcombine.high %v1225_v22, %v1229_v23  ;;  %v1089_v32 = vld [vmem:[%s7016_s26 + $0x188] sm:$0xff] }
 0x20d   : > { %v1532_v35 = vld [vmem:[%s7016_s26 + $0xf60] sm:$0xff]  ;;  %4296 = vmatpush2.bf16.msra.mxu1 %v6242_v37  ;;  %v1093_v33 = vld [vmem:[%s7016_s26 + $0x1a8] sm:$0xff] }
 0x20e   : > { %v6235_v39 = vcombine.high %v1528_v34, %v1532_v35  ;;  %v1392_v8 = vld [vmem:[%s7016_s26 + $0xb00] sm:$0xff]  ;;  %4256 = vmatprep.subr.bf16.mxu0 %v6107_v38  ;;  %v6234_v44 = vcombine.low %v1528_v34, %v1532_v35  ;;  %v1217_v35 = vld [vmem:[%s7016_s26 + $0x588] sm:$0xff]  ;;  %v5804_v38 = vcombine.low %v1097_v21, %v1101_v12 }
 0x20f   : > { %v1396_v40 = vld [vmem:[%s7016_s26 + $0xb20] sm:$0xff]  ;;  %4257 = vmatpush2.bf16.msra.mxu0 %v6106_v43  ;;  %v1209_v43 = vld [vmem:[%s7016_s26 + $0x548] sm:$0xff] }
 0x210   : > { %v1520_v41 = vld [vmem:[%s7016_s26 + $0xf00] sm:$0xff]  ;;  %v6099_v45 = vcombine.high %v1392_v8, %v1396_v40  ;;  %4297 = vmatprep.subr.bf16.mxu1 %v6235_v39  ;;  %v6098_v51 = vcombine.low %v1392_v8, %v1396_v40  ;;  %v5932_v39 = vcombine.low %v1225_v22, %v1229_v23  ;;  %v5797_v8 = vcombine.high %v1089_v32, %v1093_v33  ;;  %v1041_v22 = vld [vmem:[%s7016_s26 + $0x8] sm:$0xff] }
 0x211   : > { %v1524_v42 = vld [vmem:[%s7016_s26 + $0xf20] sm:$0xff]  ;;  %4298 = vmatpush2.bf16.msra.mxu1 %v6234_v44  ;;  %v5925_v40 = vcombine.high %v1217_v35, %v1221_v36  ;;  %v1213_v44 = vld [vmem:[%s7016_s26 + $0x568] sm:$0xff] }
 0x212   : > { %v6227_v46 = vcombine.high %v1520_v41, %v1524_v42  ;;  %v1384_v47 = vld [vmem:[%s7016_s26 + $0xac0] sm:$0xff]  ;;  %4258 = vmatprep.subr.bf16.mxu0 %v6099_v45  ;;  %v6226_v52 = vcombine.low %v1520_v41, %v1524_v42  ;;  %v1081_v41 = vld [vmem:[%s7016_s26 + $0x148] sm:$0xff]  ;;  %v5796_v45 = vcombine.low %v1089_v32, %v1093_v33 }
 0x213   : > { %v1388_v48 = vld [vmem:[%s7016_s26 + $0xae0] sm:$0xff]  ;;  %4259 = vmatpush2.bf16.msra.mxu0 %v6098_v51  ;;  %v1085_v42 = vld [vmem:[%s7016_s26 + $0x168] sm:$0xff] }
 0x214   : > { %v1512_v49 = vld [vmem:[%s7016_s26 + $0xec0] sm:$0xff]  ;;  %v6091_v53 = vcombine.high %v1384_v47, %v1388_v48  ;;  %4299 = vmatprep.subr.bf16.mxu1 %v6227_v46  ;;  %v6090_v61 = vcombine.low %v1384_v47, %v1388_v48  ;;  %v5924_v46 = vcombine.low %v1217_v35, %v1221_v36  ;;  %v5789_v47 = vcombine.high %v1081_v41, %v1085_v42  ;;  %v1201_v51 = vld [vmem:[%s7016_s26 + $0x508] sm:$0xff] }
 0x215   : > { %v1516_v50 = vld [vmem:[%s7016_s26 + $0xee0] sm:$0xff]  ;;  %4300 = vmatpush2.bf16.msra.mxu1 %v6226_v52  ;;  %v5917_v48 = vcombine.high %v1209_v43, %v1213_v44  ;;  %v1205_v52 = vld [vmem:[%s7016_s26 + $0x528] sm:$0xff] }
 0x216   : > { %v6219_v54 = vcombine.high %v1512_v49, %v1516_v50  ;;  %v1376_v57 = vld [vmem:[%s7016_s26 + $0xa80] sm:$0xff]  ;;  %4260 = vmatprep.subr.bf16.mxu0 %v6091_v53  ;;  %v6218_v62 = vcombine.low %v1512_v49, %v1516_v50  ;;  %v1073_v49 = vld [vmem:[%s7016_s26 + $0x108] sm:$0xff]  ;;  %v5788_v53 = vcombine.low %v1081_v41, %v1085_v42 }
 0x217   : > { %v1380_v58 = vld [vmem:[%s7016_s26 + $0xaa0] sm:$0xff]  ;;  %4261 = vmatpush2.bf16.msra.mxu0 %v6090_v61  ;;  %v1077_v50 = vld [vmem:[%s7016_s26 + $0x128] sm:$0xff] }
 0x218   : > { %v1504_v59 = vld [vmem:[%s7016_s26 + $0xe80] sm:$0xff]  ;;  %v6083_v63 = vcombine.high %v1376_v57, %v1380_v58  ;;  %4301 = vmatprep.subr.bf16.mxu1 %v6219_v54  ;;  %v6082_v5 = vcombine.low %v1376_v57, %v1380_v58  ;;  %v5916_v54 = vcombine.low %v1209_v43, %v1213_v44  ;;  %v5781_v57 = vcombine.high %v1073_v49, %v1077_v50  ;;  %v1193_v61 = vld [vmem:[%s7016_s26 + $0x4c8] sm:$0xff] }
 0x219   : > { %v1508_v60 = vld [vmem:[%s7016_s26 + $0xea0] sm:$0xff]  ;;  %4302 = vmatpush2.bf16.msra.mxu1 %v6218_v62  ;;  %v5909_v58 = vcombine.high %v1201_v51, %v1205_v52  ;;  %v1197_v62 = vld [vmem:[%s7016_s26 + $0x4e8] sm:$0xff] }
 0x21a   : > { %v6211_v0 = vcombine.high %v1504_v59, %v1508_v60  ;;  %v1368_v1 = vld [vmem:[%s7016_s26 + $0xa40] sm:$0xff]  ;;  %4262 = vmatprep.subr.bf16.mxu0 %v6083_v63  ;;  %v6210_v6 = vcombine.low %v1504_v59, %v1508_v60  ;;  %v1065_v59 = vld [vmem:[%s7016_s26 + $0xc8] sm:$0xff]  ;;  %v5780_v63 = vcombine.low %v1073_v49, %v1077_v50 }
 0x21b   : > { %v1372_v2 = vld [vmem:[%s7016_s26 + $0xa60] sm:$0xff]  ;;  %4263 = vmatpush2.bf16.msra.mxu0 %v6082_v5  ;;  %v1069_v60 = vld [vmem:[%s7016_s26 + $0xe8] sm:$0xff] }
 0x21c   : > { %v1496_v3 = vld [vmem:[%s7016_s26 + $0xe40] sm:$0xff]  ;;  %v6075_v7 = vcombine.high %v1368_v1, %v1372_v2  ;;  %4303 = vmatprep.subr.bf16.mxu1 %v6211_v0  ;;  %v6074_v16 = vcombine.low %v1368_v1, %v1372_v2  ;;  %v5908_v0 = vcombine.low %v1201_v51, %v1205_v52  ;;  %v5773_v1 = vcombine.high %v1065_v59, %v1069_v60  ;;  %v1185_v5 = vld [vmem:[%s7016_s26 + $0x488] sm:$0xff] }
 0x21d   : > { %v1500_v4 = vld [vmem:[%s7016_s26 + $0xe60] sm:$0xff]  ;;  %4304 = vmatpush2.bf16.msra.mxu1 %v6210_v6  ;;  %v5901_v2 = vcombine.high %v1193_v61, %v1197_v62  ;;  %v1189_v6 = vld [vmem:[%s7016_s26 + $0x4a8] sm:$0xff] }
 0x21e   : > { %v6203_v9 = vcombine.high %v1496_v3, %v1500_v4  ;;  %v1360_v10 = vld [vmem:[%s7016_s26 + $0xa00] sm:$0xff]  ;;  %4264 = vmatprep.subr.bf16.mxu0 %v6075_v7  ;;  %v6202_v17 = vcombine.low %v1496_v3, %v1500_v4  ;;  %v1057_v3 = vld [vmem:[%s7016_s26 + $0x88] sm:$0xff]  ;;  %v5772_v7 = vcombine.low %v1065_v59, %v1069_v60 }
 0x21f   : > { %v1364_v11 = vld [vmem:[%s7016_s26 + $0xa20] sm:$0xff]  ;;  %4265 = vmatpush2.bf16.msra.mxu0 %v6074_v16  ;;  %v1061_v4 = vld [vmem:[%s7016_s26 + $0xa8] sm:$0xff] }
 0x220   : > { %v1488_v13 = vld [vmem:[%s7016_s26 + $0xe00] sm:$0xff]  ;;  %v6067_v18 = vcombine.high %v1360_v10, %v1364_v11  ;;  %4305 = vmatprep.subr.bf16.mxu1 %v6203_v9  ;;  %v6066_v24 = vcombine.low %v1360_v10, %v1364_v11  ;;  %v5900_v9 = vcombine.low %v1193_v61, %v1197_v62  ;;  %v5765_v10 = vcombine.high %v1057_v3, %v1061_v4  ;;  %v1177_v16 = vld [vmem:[%s7016_s26 + $0x448] sm:$0xff] }
 0x221   : > { %v1492_v14 = vld [vmem:[%s7016_s26 + $0xe20] sm:$0xff]  ;;  %4306 = vmatpush2.bf16.msra.mxu1 %v6202_v17  ;;  %v5893_v11 = vcombine.high %v1185_v5, %v1189_v6  ;;  %v1181_v17 = vld [vmem:[%s7016_s26 + $0x468] sm:$0xff] }
 0x222   : > { %v6195_v20 = vcombine.high %v1488_v13, %v1492_v14  ;;  %v1028_v25 = vld [vmem:[#allocation2 + $0x8] sm:$0xff]  ;;  %4266 = vmatprep.subr.bf16.mxu0 %v6067_v18  ;;  %v6194_v27 = vcombine.low %v1488_v13, %v1492_v14  ;;  %v1049_v13 = vld [vmem:[%s7016_s26 + $0x48] sm:$0xff]  ;;  %v5764_v18 = vcombine.low %v1057_v3, %v1061_v4  ;;  %v5885_v12 = vcombine.high %v1177_v16, %v1181_v17 }
 0x223   : > { %v1030_v28 = vld [vmem:[#allocation2 + $0x28] sm:$0xff]  ;;  %v7200_v34 = vpack.c.bf16 %v1028_v25, %v1028_v25  ;;  %4267 = vmatpush2.bf16.msra.mxu0 %v6066_v24  ;;  %v1053_v14 = vld [vmem:[%s7016_s26 + $0x68] sm:$0xff] }
 0x224   : > { %4307 = vmatprep.subr.bf16.mxu1 %v6195_v20  ;;  %v7204_v37 = vpack.c.bf16 %v1030_v28, %v1030_v28  ;;  %4318 = vmatprep.subr.bf16.mxu0 %v5805_v30  ;;  %v5892_v20 = vcombine.low %v1185_v5, %v1189_v6  ;;  %v5757_v21 = vcombine.high %v1049_v13, %v1053_v14  ;;  %v1045_v23 = vld [vmem:[%s7016_s26 + $0x28] sm:$0xff] }
 0x225   : > { %4308 = vmatpush2.bf16.msra.mxu1 %v6194_v27  ;;  %v1169_v24 = vld [vmem:[%s7016_s26 + $0x408] sm:$0xff]  ;;  %v5756_v27 = vcombine.low %v1049_v13, %v1053_v14  ;;  %v5884_v28 = vcombine.low %v1177_v16, %v1181_v17  ;;  %v5749_v30 = vcombine.high %v1041_v22, %v1045_v23 }
 0x226   : > { %4359 = vmatprep.subr.bf16.mxu1 %v5933_v31  ;;  %4269 = vmatmul.mubr.bf16.vlgmr.msra.gmra.mxu0 %v7200_v34  ;;  %v1173_v25 = vld [vmem:[%s7016_s26 + $0x428] sm:$0xff] }
 0x227   : > { %4319 = vmatpush1.bf16.msra.mxu0 %v5804_v38  ;;  %4350 = vmatprep.mubr.bf16.mxu0 %v7078_v55  ;;  %v5877_v31 = vcombine.high %v1169_v24, %v1173_v25  ;;  %v1161_v32 = vld [vmem:[%s7016_s26 + $0x3c8] sm:$0xff]  ;;  %v5748_v38 = vcombine.low %v1041_v22, %v1045_v23 }
 0x228   : > { %4310 = vmatmul.mubr.bf16.vlgmr.msra.gmra.mxu1 %v7204_v37  ;;  %4320 = vmatprep.subr.bf16.mxu0 %v5797_v8  ;;  %v1165_v33 = vld [vmem:[%s7016_s26 + $0x3e8] sm:$0xff] }
 0x229   : > { %4360 = vmatpush1.bf16.msra.mxu1 %v5932_v39  ;;  %4391 = vmatprep.mubr.bf16.mxu1 %v7080_v56  ;;  %v1289_v35 = vld [vmem:[%s7016_s26 + $0x7c8] sm:$0xff]  ;;  %v5876_v39 = vcombine.low %v1169_v24, %v1173_v25  ;;  %v5869_v8 = vcombine.high %v1161_v32, %v1165_v33 }
 0x22a   : > { %4361 = vmatprep.subr.bf16.mxu1 %v5925_v40  ;;  %v1293_v36 = vld [vmem:[%s7016_s26 + $0x7e8] sm:$0xff] }
 0x22b   : > { %4321 = vmatpush1.bf16.msra.mxu0 %v5796_v45  ;;  %v5997_v40 = vcombine.high %v1289_v35, %v1293_v36  ;;  %v1153_v41 = vld [vmem:[%s7016_s26 + $0x388] sm:$0xff]  ;;  %v5868_v45 = vcombine.low %v1161_v32, %v1165_v33 }
 0x22c   : > { %4322 = vmatprep.subr.bf16.mxu0 %v5789_v47  ;;  %v1157_v42 = vld [vmem:[%s7016_s26 + $0x3a8] sm:$0xff] }
 0x22d   : > { %4362 = vmatpush1.bf16.msra.mxu1 %v5924_v46  ;;  %v1281_v43 = vld [vmem:[%s7016_s26 + $0x788] sm:$0xff]  ;;  %v5996_v46 = vcombine.low %v1289_v35, %v1293_v36  ;;  %v5861_v47 = vcombine.high %v1153_v41, %v1157_v42 }
 0x22e   : > { %4363 = vmatprep.subr.bf16.mxu1 %v5917_v48  ;;  %v1285_v44 = vld [vmem:[%s7016_s26 + $0x7a8] sm:$0xff] }
 0x22f   : > { %4323 = vmatpush1.bf16.msra.mxu0 %v5788_v53  ;;  %v5989_v48 = vcombine.high %v1281_v43, %v1285_v44  ;;  %v1145_v49 = vld [vmem:[%s7016_s26 + $0x348] sm:$0xff]  ;;  %v5860_v53 = vcombine.low %v1153_v41, %v1157_v42 }
 0x230   : > { %4324 = vmatprep.subr.bf16.mxu0 %v5781_v57  ;;  %v1149_v50 = vld [vmem:[%s7016_s26 + $0x368] sm:$0xff] }
 0x231   : > { %4364 = vmatpush1.bf16.msra.mxu1 %v5916_v54  ;;  %v1273_v51 = vld [vmem:[%s7016_s26 + $0x748] sm:$0xff]  ;;  %v5988_v54 = vcombine.low %v1281_v43, %v1285_v44  ;;  %v5853_v57 = vcombine.high %v1145_v49, %v1149_v50 }
 0x232   : > { %4365 = vmatprep.subr.bf16.mxu1 %v5909_v58  ;;  %v1277_v52 = vld [vmem:[%s7016_s26 + $0x768] sm:$0xff] }
 0x233   : > { %4325 = vmatpush1.bf16.msra.mxu0 %v5780_v63  ;;  %v5981_v58 = vcombine.high %v1273_v51, %v1277_v52  ;;  %v1137_v59 = vld [vmem:[%s7016_s26 + $0x308] sm:$0xff]  ;;  %v5852_v63 = vcombine.low %v1145_v49, %v1149_v50 }
 0x234   : > { %4326 = vmatprep.subr.bf16.mxu0 %v5773_v1  ;;  %v1141_v60 = vld [vmem:[%s7016_s26 + $0x328] sm:$0xff] }
 0x235   : > { %4366 = vmatpush1.bf16.msra.mxu1 %v5908_v0  ;;  %v1265_v61 = vld [vmem:[%s7016_s26 + $0x708] sm:$0xff]  ;;  %v5980_v0 = vcombine.low %v1273_v51, %v1277_v52  ;;  %v5845_v1 = vcombine.high %v1137_v59, %v1141_v60 }
 0x236   : > { %4367 = vmatprep.subr.bf16.mxu1 %v5901_v2  ;;  %v1269_v62 = vld [vmem:[%s7016_s26 + $0x728] sm:$0xff] }
 0x237   : > { %4327 = vmatpush1.bf16.msra.mxu0 %v5772_v7  ;;  %v5973_v2 = vcombine.high %v1265_v61, %v1269_v62  ;;  %v1129_v3 = vld [vmem:[%s7016_s26 + $0x2c8] sm:$0xff]  ;;  %v5844_v7 = vcombine.low %v1137_v59, %v1141_v60 }
 0x238   : > { %4328 = vmatprep.subr.bf16.mxu0 %v5765_v10  ;;  %v1133_v4 = vld [vmem:[%s7016_s26 + $0x2e8] sm:$0xff] }
 0x239   : > { %4368 = vmatpush1.bf16.msra.mxu1 %v5900_v9  ;;  %v1257_v5 = vld [vmem:[%s7016_s26 + $0x6c8] sm:$0xff]  ;;  %v5972_v9 = vcombine.low %v1265_v61, %v1269_v62  ;;  %v5837_v10 = vcombine.high %v1129_v3, %v1133_v4 }
 0x23a   : > { %4369 = vmatprep.subr.bf16.mxu1 %v5893_v11  ;;  %v1261_v6 = vld [vmem:[%s7016_s26 + $0x6e8] sm:$0xff] }
 0x23b   : > { %4329 = vmatpush1.bf16.msra.mxu0 %v5764_v18  ;;  %v5965_v11 = vcombine.high %v1257_v5, %v1261_v6  ;;  %v1121_v13 = vld [vmem:[%s7016_s26 + $0x288] sm:$0xff]  ;;  %v5836_v18 = vcombine.low %v1129_v3, %v1133_v4 }
 0x23c   : > { %4330 = vmatprep.subr.bf16.mxu0 %v5757_v21  ;;  %v1125_v14 = vld [vmem:[%s7016_s26 + $0x2a8] sm:$0xff] }
 0x23d   : > { %4370 = vmatpush1.bf16.msra.mxu1 %v5892_v20  ;;  %v1249_v16 = vld [vmem:[%s7016_s26 + $0x688] sm:$0xff]  ;;  %v5964_v20 = vcombine.low %v1257_v5, %v1261_v6  ;;  %v5829_v21 = vcombine.high %v1121_v13, %v1125_v14 }
 0x23e   : > { %4371 = vmatprep.subr.bf16.mxu1 %v5885_v12  ;;  %v1253_v17 = vld [vmem:[%s7016_s26 + $0x6a8] sm:$0xff] }
 0x23f   : > { %4331 = vmatpush1.bf16.msra.mxu0 %v5756_v27  ;;  %v5957_v12 = vcombine.high %v1249_v16, %v1253_v17  ;;  %v1113_v22 = vld [vmem:[%s7016_s26 + $0x248] sm:$0xff]  ;;  %v5828_v27 = vcombine.low %v1121_v13, %v1125_v14 }
 0x240   : > { %4332 = vmatprep.subr.bf16.mxu0 %v5749_v30  ;;  %v1117_v23 = vld [vmem:[%s7016_s26 + $0x268] sm:$0xff] }
 0x241   : > { %4372 = vmatpush1.bf16.msra.mxu1 %v5884_v28  ;;  %v1241_v24 = vld [vmem:[%s7016_s26 + $0x648] sm:$0xff]  ;;  %v5956_v28 = vcombine.low %v1249_v16, %v1253_v17  ;;  %v5821_v30 = vcombine.high %v1113_v22, %v1117_v23 }
 0x242   : > { %4373 = vmatprep.subr.bf16.mxu1 %v5877_v31  ;;  %v1245_v25 = vld [vmem:[%s7016_s26 + $0x668] sm:$0xff] }
 0x243   : > { %4333 = vmatpush1.bf16.msra.mxu0 %v5748_v38  ;;  %v5949_v31 = vcombine.high %v1241_v24, %v1245_v25  ;;  %v1105_v32 = vld [vmem:[%s7016_s26 + $0x208] sm:$0xff]  ;;  %v5820_v38 = vcombine.low %v1113_v22, %v1117_v23 }
 0x244   : > { %4334 = vmatprep.subr.bf16.mxu0 %v5869_v8  ;;  %v1109_v33 = vld [vmem:[%s7016_s26 + $0x228] sm:$0xff] }
 0x245   : > { %4374 = vmatpush1.bf16.msra.mxu1 %v5876_v39  ;;  %v1233_v35 = vld [vmem:[%s7016_s26 + $0x608] sm:$0xff]  ;;  %v5948_v39 = vcombine.low %v1241_v24, %v1245_v25  ;;  %v5813_v8 = vcombine.high %v1105_v32, %v1109_v33 }
 0x246   : > { %4375 = vmatprep.subr.bf16.mxu1 %v5997_v40  ;;  %v1237_v36 = vld [vmem:[%s7016_s26 + $0x628] sm:$0xff] }
 0x247   : > { %4335 = vmatpush2.bf16.msra.mxu0 %v5868_v45  ;;  %v5941_v40 = vcombine.high %v1233_v35, %v1237_v36  ;;  %v1353_v41 = vld [vmem:[%s7016_s26 + $0x9c8] sm:$0xff]  ;;  %v5812_v45 = vcombine.low %v1105_v32, %v1109_v33 }
 0x248   : > { %4336 = vmatprep.subr.bf16.mxu0 %v5861_v47  ;;  %v1357_v42 = vld [vmem:[%s7016_s26 + $0x9e8] sm:$0xff] }
 0x249   : > { %4376 = vmatpush2.bf16.msra.mxu1 %v5996_v46  ;;  %v1481_v43 = vld [vmem:[%s7016_s26 + $0xdc8] sm:$0xff]  ;;  %v5940_v46 = vcombine.low %v1233_v35, %v1237_v36  ;;  %v6061_v47 = vcombine.high %v1353_v41, %v1357_v42 }
 0x24a   : > { %4377 = vmatprep.subr.bf16.mxu1 %v5989_v48  ;;  %v1485_v44 = vld [vmem:[%s7016_s26 + $0xde8] sm:$0xff] }
 0x24b   : > { %4337 = vmatpush2.bf16.msra.mxu0 %v5860_v53  ;;  %v6189_v48 = vcombine.high %v1481_v43, %v1485_v44  ;;  %v1345_v49 = vld [vmem:[%s7016_s26 + $0x988] sm:$0xff]  ;;  %v6060_v53 = vcombine.low %v1353_v41, %v1357_v42 }
 0x24c   : > { %4338 = vmatprep.subr.bf16.mxu0 %v5853_v57  ;;  %v1349_v50 = vld [vmem:[%s7016_s26 + $0x9a8] sm:$0xff] }
 0x24d   : > { %4378 = vmatpush2.bf16.msra.mxu1 %v5988_v54  ;;  %v1473_v51 = vld [vmem:[%s7016_s26 + $0xd88] sm:$0xff]  ;;  %v6188_v54 = vcombine.low %v1481_v43, %v1485_v44  ;;  %v6053_v57 = vcombine.high %v1345_v49, %v1349_v50 }
 0x24e   : > { %4379 = vmatprep.subr.bf16.mxu1 %v5981_v58  ;;  %v1477_v52 = vld [vmem:[%s7016_s26 + $0xda8] sm:$0xff] }
 0x24f   : > { %4339 = vmatpush2.bf16.msra.mxu0 %v5852_v63  ;;  %v6181_v58 = vcombine.high %v1473_v51, %v1477_v52  ;;  %v1337_v59 = vld [vmem:[%s7016_s26 + $0x948] sm:$0xff]  ;;  %v6052_v63 = vcombine.low %v1345_v49, %v1349_v50 }
 0x250   : > { %4340 = vmatprep.subr.bf16.mxu0 %v5845_v1  ;;  %v1341_v60 = vld [vmem:[%s7016_s26 + $0x968] sm:$0xff] }
 0x251   : > { %4380 = vmatpush2.bf16.msra.mxu1 %v5980_v0  ;;  %v1465_v61 = vld [vmem:[%s7016_s26 + $0xd48] sm:$0xff]  ;;  %v6180_v0 = vcombine.low %v1473_v51, %v1477_v52  ;;  %v6045_v1 = vcombine.high %v1337_v59, %v1341_v60 }
 0x252   : > { %4381 = vmatprep.subr.bf16.mxu1 %v5973_v2  ;;  %v1469_v62 = vld [vmem:[%s7016_s26 + $0xd68] sm:$0xff] }
 0x253   : > { %4341 = vmatpush2.bf16.msra.mxu0 %v5844_v7  ;;  %v6173_v2 = vcombine.high %v1465_v61, %v1469_v62  ;;  %v1329_v3 = vld [vmem:[%s7016_s26 + $0x908] sm:$0xff]  ;;  %v6044_v7 = vcombine.low %v1337_v59, %v1341_v60 }
 0x254   : > { %4342 = vmatprep.subr.bf16.mxu0 %v5837_v10  ;;  %v1333_v4 = vld [vmem:[%s7016_s26 + $0x928] sm:$0xff] }
 0x255   : > { %4382 = vmatpush2.bf16.msra.mxu1 %v5972_v9  ;;  %v1457_v5 = vld [vmem:[%s7016_s26 + $0xd08] sm:$0xff]  ;;  %v6172_v9 = vcombine.low %v1465_v61, %v1469_v62  ;;  %v6037_v10 = vcombine.high %v1329_v3, %v1333_v4 }
 0x256   : > { %4383 = vmatprep.subr.bf16.mxu1 %v5965_v11  ;;  %v1461_v6 = vld [vmem:[%s7016_s26 + $0xd28] sm:$0xff] }
 0x257   : > { %4343 = vmatpush2.bf16.msra.mxu0 %v5836_v18  ;;  %v6165_v11 = vcombine.high %v1457_v5, %v1461_v6  ;;  %v1321_v13 = vld [vmem:[%s7016_s26 + $0x8c8] sm:$0xff]  ;;  %v6036_v18 = vcombine.low %v1329_v3, %v1333_v4 }
 0x258   : > { %4344 = vmatprep.subr.bf16.mxu0 %v5829_v21  ;;  %v1325_v14 = vld [vmem:[%s7016_s26 + $0x8e8] sm:$0xff] }
 0x259   : > { %4384 = vmatpush2.bf16.msra.mxu1 %v5964_v20  ;;  %v1449_v16 = vld [vmem:[%s7016_s26 + $0xcc8] sm:$0xff]  ;;  %v6164_v20 = vcombine.low %v1457_v5, %v1461_v6  ;;  %v6029_v21 = vcombine.high %v1321_v13, %v1325_v14 }
 0x25a   : > { %4385 = vmatprep.subr.bf16.mxu1 %v5957_v12  ;;  %v1453_v17 = vld [vmem:[%s7016_s26 + $0xce8] sm:$0xff] }
 0x25b   : > { %4345 = vmatpush2.bf16.msra.mxu0 %v5828_v27  ;;  %v6157_v12 = vcombine.high %v1449_v16, %v1453_v17  ;;  %v1313_v22 = vld [vmem:[%s7016_s26 + $0x888] sm:$0xff]  ;;  %v6028_v27 = vcombine.low %v1321_v13, %v1325_v14 }
 0x25c   : > { %4346 = vmatprep.subr.bf16.mxu0 %v5821_v30  ;;  %v1317_v23 = vld [vmem:[%s7016_s26 + $0x8a8] sm:$0xff] }
 0x25d   : > { %4386 = vmatpush2.bf16.msra.mxu1 %v5956_v28  ;;  %v1441_v24 = vld [vmem:[%s7016_s26 + $0xc88] sm:$0xff]  ;;  %v6156_v28 = vcombine.low %v1449_v16, %v1453_v17  ;;  %v6021_v30 = vcombine.high %v1313_v22, %v1317_v23 }
 0x25e   : > { %4387 = vmatprep.subr.bf16.mxu1 %v5949_v31  ;;  %v1445_v25 = vld [vmem:[%s7016_s26 + $0xca8] sm:$0xff] }
 0x25f   : > { %4347 = vmatpush2.bf16.msra.mxu0 %v5820_v38  ;;  %v6149_v31 = vcombine.high %v1441_v24, %v1445_v25  ;;  %v1305_v32 = vld [vmem:[%s7016_s26 + $0x848] sm:$0xff]  ;;  %v6020_v38 = vcombine.low %v1313_v22, %v1317_v23 }
 0x260   : > { %4348 = vmatprep.subr.bf16.mxu0 %v5813_v8  ;;  %v1309_v33 = vld [vmem:[%s7016_s26 + $0x868] sm:$0xff] }
 0x261   : > { %4388 = vmatpush2.bf16.msra.mxu1 %v5948_v39  ;;  %v1433_v35 = vld [vmem:[%s7016_s26 + $0xc48] sm:$0xff]  ;;  %v6148_v39 = vcombine.low %v1441_v24, %v1445_v25  ;;  %v6013_v8 = vcombine.high %v1305_v32, %v1309_v33 }
 0x262   : > { %4389 = vmatprep.subr.bf16.mxu1 %v5941_v40  ;;  %v1437_v36 = vld [vmem:[%s7016_s26 + $0xc68] sm:$0xff] }
 0x263   : > { %4349 = vmatpush2.bf16.msra.mxu0 %v5812_v45  ;;  %v6141_v40 = vcombine.high %v1433_v35, %v1437_v36  ;;  %v1297_v41 = vld [vmem:[%s7016_s26 + $0x808] sm:$0xff]  ;;  %v6012_v45 = vcombine.low %v1305_v32, %v1309_v33 }
 0x264   : > { %4400 = vmatprep.subr.bf16.mxu0 %v6061_v47  ;;  %v1301_v42 = vld [vmem:[%s7016_s26 + $0x828] sm:$0xff] }
 0x265   : > { %4390 = vmatpush2.bf16.msra.mxu1 %v5940_v46  ;;  %v1425_v43 = vld [vmem:[%s7016_s26 + $0xc08] sm:$0xff]  ;;  %v6140_v46 = vcombine.low %v1433_v35, %v1437_v36  ;;  %v6005_v47 = vcombine.high %v1297_v41, %v1301_v42 }
 0x266   : > { %4441 = vmatprep.subr.bf16.mxu1 %v6189_v48  ;;  %4351 = vmatmul.mubr.bf16.vlgmr.msra.gmra.mxu0 %v7124_v15  ;;  %v1429_v44 = vld [vmem:[%s7016_s26 + $0xc28] sm:$0xff] }
 0x267   : > { %4401 = vmatpush1.bf16.msra.mxu0 %v6060_v53  ;;  %4432 = vmatprep.mubr.bf16.mxu0 %v7132_v26  ;;  %v6133_v48 = vcombine.high %v1425_v43, %v1429_v44  ;;  %v1417_v49 = vld [vmem:[%s7016_s26 + $0xbc8] sm:$0xff]  ;;  %v6004_v53 = vcombine.low %v1297_v41, %v1301_v42 }
 0x268   : > { %4392 = vmatmul.mubr.bf16.vlgmr.msra.gmra.mxu1 %v7128_v19  ;;  %4402 = vmatprep.subr.bf16.mxu0 %v6053_v57  ;;  %v1421_v50 = vld [vmem:[%s7016_s26 + $0xbe8] sm:$0xff] }
 0x269   : > { %4442 = vmatpush1.bf16.msra.mxu1 %v6188_v54  ;;  %4473 = vmatprep.mubr.bf16.mxu1 %v7137_v29  ;;  %v1545_v51 = vld [vmem:[%s7016_s26 + $0xfc8] sm:$0xff]  ;;  %v6132_v54 = vcombine.low %v1425_v43, %v1429_v44  ;;  %v6125_v57 = vcombine.high %v1417_v49, %v1421_v50 }
 0x26a   : > { %4443 = vmatprep.subr.bf16.mxu1 %v6181_v58  ;;  %v1549_v52 = vld [vmem:[%s7016_s26 + $0xfe8] sm:$0xff] }
 0x26b   : > { %4403 = vmatpush1.bf16.msra.mxu0 %v6052_v63  ;;  %v6253_v58 = vcombine.high %v1545_v51, %v1549_v52  ;;  %v1409_v59 = vld [vmem:[%s7016_s26 + $0xb88] sm:$0xff]  ;;  %v6124_v63 = vcombine.low %v1417_v49, %v1421_v50 }
 0x26c   : > { %4404 = vmatprep.subr.bf16.mxu0 %v6045_v1  ;;  %v1413_v60 = vld [vmem:[%s7016_s26 + $0xba8] sm:$0xff] }
 0x26d   : > { %4444 = vmatpush1.bf16.msra.mxu1 %v6180_v0  ;;  %v1537_v61 = vld [vmem:[%s7016_s26 + $0xf88] sm:$0xff]  ;;  %v6252_v0 = vcombine.low %v1545_v51, %v1549_v52  ;;  %v6117_v1 = vcombine.high %v1409_v59, %v1413_v60 }
 0x26e   : > { %4445 = vmatprep.subr.bf16.mxu1 %v6173_v2  ;;  %v1541_v62 = vld [vmem:[%s7016_s26 + $0xfa8] sm:$0xff] }
 0x26f   : > { %4405 = vmatpush1.bf16.msra.mxu0 %v6044_v7  ;;  %v6245_v2 = vcombine.high %v1537_v61, %v1541_v62  ;;  %v1401_v3 = vld [vmem:[%s7016_s26 + $0xb48] sm:$0xff]  ;;  %v6116_v7 = vcombine.low %v1409_v59, %v1413_v60  ;;  %v1098_v59 = vld [vmem:[%s7016_s26 + $0x1d0] sm:$0xff] }
 0x270   : > { %4406 = vmatprep.subr.bf16.mxu0 %v6037_v10  ;;  %v1405_v4 = vld [vmem:[%s7016_s26 + $0xb68] sm:$0xff]  ;;  %v1102_v60 = vld [vmem:[%s7016_s26 + $0x1f0] sm:$0xff] }
 0x271   : > { %4446 = vmatpush1.bf16.msra.mxu1 %v6172_v9  ;;  %v1529_v5 = vld [vmem:[%s7016_s26 + $0xf48] sm:$0xff]  ;;  %v6244_v9 = vcombine.low %v1537_v61, %v1541_v62  ;;  %v6109_v10 = vcombine.high %v1401_v3, %v1405_v4  ;;  %v1226_v61 = vld [vmem:[%s7016_s26 + $0x5d0] sm:$0xff] }
 0x272   : > { %4447 = vmatprep.subr.bf16.mxu1 %v6165_v11  ;;  %v1533_v6 = vld [vmem:[%s7016_s26 + $0xf68] sm:$0xff]  ;;  %v1230_v62 = vld [vmem:[%s7016_s26 + $0x5f0] sm:$0xff] }
 0x273   : > { %4407 = vmatpush1.bf16.msra.mxu0 %v6036_v18  ;;  %v6237_v11 = vcombine.high %v1529_v5, %v1533_v6  ;;  %v1393_v13 = vld [vmem:[%s7016_s26 + $0xb08] sm:$0xff]  ;;  %v6108_v18 = vcombine.low %v1401_v3, %v1405_v4  ;;  %v1090_v3 = vld [vmem:[%s7016_s26 + $0x190] sm:$0xff] }
 0x274   : > { %4408 = vmatprep.subr.bf16.mxu0 %v6029_v21  ;;  %v1397_v14 = vld [vmem:[%s7016_s26 + $0xb28] sm:$0xff]  ;;  %v1094_v4 = vld [vmem:[%s7016_s26 + $0x1b0] sm:$0xff] }
 0x275   : > { %4448 = vmatpush1.bf16.msra.mxu1 %v6164_v20  ;;  %v1521_v16 = vld [vmem:[%s7016_s26 + $0xf08] sm:$0xff]  ;;  %v6236_v20 = vcombine.low %v1529_v5, %v1533_v6  ;;  %v6101_v21 = vcombine.high %v1393_v13, %v1397_v14  ;;  %v1218_v5 = vld [vmem:[%s7016_s26 + $0x590] sm:$0xff] }
 0x276   : > { %4449 = vmatprep.subr.bf16.mxu1 %v6157_v12  ;;  %v1525_v17 = vld [vmem:[%s7016_s26 + $0xf28] sm:$0xff]  ;;  %v1222_v6 = vld [vmem:[%s7016_s26 + $0x5b0] sm:$0xff] }
 0x277   : > { %4409 = vmatpush1.bf16.msra.mxu0 %v6028_v27  ;;  %v6229_v12 = vcombine.high %v1521_v16, %v1525_v17  ;;  %v1385_v22 = vld [vmem:[%s7016_s26 + $0xac8] sm:$0xff]  ;;  %v6100_v27 = vcombine.low %v1393_v13, %v1397_v14  ;;  %v1082_v13 = vld [vmem:[%s7016_s26 + $0x150] sm:$0xff] }
 0x278   : > { %4410 = vmatprep.subr.bf16.mxu0 %v6021_v30  ;;  %v1389_v23 = vld [vmem:[%s7016_s26 + $0xae8] sm:$0xff]  ;;  %v1086_v14 = vld [vmem:[%s7016_s26 + $0x170] sm:$0xff] }
 0x279   : > { %4450 = vmatpush1.bf16.msra.mxu1 %v6156_v28  ;;  %v1513_v24 = vld [vmem:[%s7016_s26 + $0xec8] sm:$0xff]  ;;  %v6228_v28 = vcombine.low %v1521_v16, %v1525_v17  ;;  %v6093_v30 = vcombine.high %v1385_v22, %v1389_v23  ;;  %v1210_v17 = vld [vmem:[%s7016_s26 + $0x550] sm:$0xff] }
 0x27a   : > { %4451 = vmatprep.subr.bf16.mxu1 %v6149_v31  ;;  %v1517_v25 = vld [vmem:[%s7016_s26 + $0xee8] sm:$0xff] }
 0x27b   : > { %4411 = vmatpush1.bf16.msra.mxu0 %v6020_v38  ;;  %v6221_v31 = vcombine.high %v1513_v24, %v1517_v25  ;;  %v1377_v32 = vld [vmem:[%s7016_s26 + $0xa88] sm:$0xff]  ;;  %v6092_v38 = vcombine.low %v1385_v22, %v1389_v23  ;;  %v5926_v22 = vcombine.low %v1218_v5, %v1222_v6  ;;  %v5791_v23 = vcombine.high %v1082_v13, %v1086_v14 }
 0x27c   : > { %4412 = vmatprep.subr.bf16.mxu0 %v6013_v8  ;;  %v1381_v33 = vld [vmem:[%s7016_s26 + $0xaa8] sm:$0xff] }
 0x27d   : > { %4452 = vmatpush1.bf16.msra.mxu1 %v6148_v39  ;;  %v1505_v35 = vld [vmem:[%s7016_s26 + $0xe88] sm:$0xff]  ;;  %v6220_v39 = vcombine.low %v1513_v24, %v1517_v25  ;;  %v6085_v8 = vcombine.high %v1377_v32, %v1381_v33 }
 0x27e   : > { %4453 = vmatprep.subr.bf16.mxu1 %v6141_v40  ;;  %v1509_v36 = vld [vmem:[%s7016_s26 + $0xea8] sm:$0xff] }
 0x27f   : > { %4413 = vmatpush1.bf16.msra.mxu0 %v6012_v45  ;;  %v6213_v40 = vcombine.high %v1505_v35, %v1509_v36  ;;  %v1369_v41 = vld [vmem:[%s7016_s26 + $0xa48] sm:$0xff]  ;;  %v6084_v45 = vcombine.low %v1377_v32, %v1381_v33  ;;  %v1206_v32 = vld [vmem:[%s7016_s26 + $0x530] sm:$0xff] }
 0x280   : > { %4414 = vmatprep.subr.bf16.mxu0 %v6005_v47  ;;  %v1373_v42 = vld [vmem:[%s7016_s26 + $0xa68] sm:$0xff] }
 0x281   : > { %4454 = vmatpush1.bf16.msra.mxu1 %v6140_v46  ;;  %v1497_v43 = vld [vmem:[%s7016_s26 + $0xe48] sm:$0xff]  ;;  %v6212_v46 = vcombine.low %v1505_v35, %v1509_v36  ;;  %v6077_v47 = vcombine.high %v1369_v41, %v1373_v42  ;;  %v5790_v35 = vcombine.low %v1082_v13, %v1086_v14  ;;  %v1162_v13 = vld [vmem:[%s7016_s26 + $0x3d0] sm:$0xff] }
 0x282   : > { %4455 = vmatprep.subr.bf16.mxu1 %v6133_v48  ;;  %v1501_v44 = vld [vmem:[%s7016_s26 + $0xe68] sm:$0xff]  ;;  %v1166_v14 = vld [vmem:[%s7016_s26 + $0x3f0] sm:$0xff] }
 0x283   : > { %4415 = vmatpush1.bf16.msra.mxu0 %v6004_v53  ;;  %v6205_v48 = vcombine.high %v1497_v43, %v1501_v44  ;;  %v1361_v49 = vld [vmem:[%s7016_s26 + $0xa08] sm:$0xff]  ;;  %v6076_v53 = vcombine.low %v1369_v41, %v1373_v42  ;;  %v1066_v41 = vld [vmem:[%s7016_s26 + $0xd0] sm:$0xff] }
 0x284   : > { %4416 = vmatprep.subr.bf16.mxu0 %v6125_v57  ;;  %v1365_v50 = vld [vmem:[%s7016_s26 + $0xa28] sm:$0xff]  ;;  %v1070_v42 = vld [vmem:[%s7016_s26 + $0xf0] sm:$0xff] }
 0x285   : > { %4456 = vmatpush1.bf16.msra.mxu1 %v6132_v54  ;;  %v1489_v51 = vld [vmem:[%s7016_s26 + $0xe08] sm:$0xff]  ;;  %v6204_v54 = vcombine.low %v1497_v43, %v1501_v44  ;;  %v6069_v57 = vcombine.high %v1361_v49, %v1365_v50  ;;  %v1194_v43 = vld [vmem:[%s7016_s26 + $0x4d0] sm:$0xff] }
 0x286   : > { %4457 = vmatprep.subr.bf16.mxu1 %v6253_v58  ;;  %v1493_v52 = vld [vmem:[%s7016_s26 + $0xe28] sm:$0xff]  ;;  %v1198_v44 = vld [vmem:[%s7016_s26 + $0x4f0] sm:$0xff] }
 0x287   : > { %4417 = vmatpush2.bf16.msra.mxu0 %v6124_v63  ;;  %v6197_v58 = vcombine.high %v1489_v51, %v1493_v52  ;;  %v6068_v63 = vcombine.low %v1361_v49, %v1365_v50  ;;  %v1058_v49 = vld [vmem:[%s7016_s26 + $0x90] sm:$0xff] }
 0x288   : > { %4418 = vmatprep.subr.bf16.mxu0 %v6117_v1  ;;  %v5807_v1 = vcombine.high %v1098_v59, %v1102_v60  ;;  %v1062_v50 = vld [vmem:[%s7016_s26 + $0xb0] sm:$0xff] }
 0x289   : > { %4458 = vmatpush2.bf16.msra.mxu1 %v6252_v0  ;;  %v6196_v0 = vcombine.low %v1489_v51, %v1493_v52  ;;  %v1186_v51 = vld [vmem:[%s7016_s26 + $0x490] sm:$0xff] }
 0x28a   : > { %4459 = vmatprep.subr.bf16.mxu1 %v6245_v2  ;;  %v5935_v2 = vcombine.high %v1226_v61, %v1230_v62  ;;  %v1190_v52 = vld [vmem:[%s7016_s26 + $0x4b0] sm:$0xff] }
 0x28b   : > { %4419 = vmatpush2.bf16.msra.mxu0 %v6116_v7  ;;  %v5806_v7 = vcombine.low %v1098_v59, %v1102_v60  ;;  %v1050_v59 = vld [vmem:[%s7016_s26 + $0x50] sm:$0xff] }
 0x28c   : > { %4420 = vmatprep.subr.bf16.mxu0 %v6109_v10  ;;  %v5799_v10 = vcombine.high %v1090_v3, %v1094_v4  ;;  %v1054_v60 = vld [vmem:[%s7016_s26 + $0x70] sm:$0xff] }
 0x28d   : > { %4460 = vmatpush2.bf16.msra.mxu1 %v6244_v9  ;;  %v5934_v9 = vcombine.low %v1226_v61, %v1230_v62  ;;  %v1178_v61 = vld [vmem:[%s7016_s26 + $0x450] sm:$0xff] }
 0x28e   : > { %4461 = vmatprep.subr.bf16.mxu1 %v6237_v11  ;;  %v5927_v11 = vcombine.high %v1218_v5, %v1222_v6  ;;  %v1182_v62 = vld [vmem:[%s7016_s26 + $0x470] sm:$0xff] }
 0x28f   : > { %4421 = vmatpush2.bf16.msra.mxu0 %v6108_v18  ;;  %v1214_v18 = vld [vmem:[%s7016_s26 + $0x570] sm:$0xff] }
 0x290   : > { %4422 = vmatprep.subr.bf16.mxu0 %v6101_v21  ;;  %v5798_v21 = vcombine.low %v1090_v3, %v1094_v4  ;;  %v5919_v25 = vcombine.high %v1210_v17, %v1214_v18  ;;  %v1042_v3 = vld [vmem:[%s7016_s26 + $0x10] sm:$0xff] }
 0x291   : > { %4462 = vmatpush2.bf16.msra.mxu1 %v6236_v20  ;;  %v1046_v4 = vld [vmem:[%s7016_s26 + $0x30] sm:$0xff] }
 0x292   : > { %4463 = vmatprep.subr.bf16.mxu1 %v6229_v12  ;;  %v1170_v5 = vld [vmem:[%s7016_s26 + $0x410] sm:$0xff] }
 0x293   : > { %4423 = vmatpush2.bf16.msra.mxu0 %v6100_v27  ;;  %v1074_v27 = vld [vmem:[%s7016_s26 + $0x110] sm:$0xff] }
 0x294   : > { %4424 = vmatprep.subr.bf16.mxu0 %v6093_v30  ;;  %v1174_v6 = vld [vmem:[%s7016_s26 + $0x430] sm:$0xff] }
 0x295   : > { %4464 = vmatpush2.bf16.msra.mxu1 %v6228_v28  ;;  %v1078_v28 = vld [vmem:[%s7016_s26 + $0x130] sm:$0xff] }
 0x296   : > { %4465 = vmatprep.subr.bf16.mxu1 %v6221_v31  ;;  %v1202_v31 = vld [vmem:[%s7016_s26 + $0x510] sm:$0xff] }
 0x297   : > { %4425 = vmatpush2.bf16.msra.mxu0 %v6092_v38  ;;  %v5918_v38 = vcombine.low %v1210_v17, %v1214_v18  ;;  %v1290_v17 = vld [vmem:[%s7016_s26 + $0x7d0] sm:$0xff] }
 0x298   : > { %4426 = vmatprep.subr.bf16.mxu0 %v6085_v8  ;;  %v1294_v18 = vld [vmem:[%s7016_s26 + $0x7f0] sm:$0xff] }
 0x299   : > { %4466 = vmatpush2.bf16.msra.mxu1 %v6220_v39  ;;  %v5783_v39 = vcombine.high %v1074_v27, %v1078_v28 }
 0x29a   : > { %4467 = vmatprep.subr.bf16.mxu1 %v6213_v40  ;;  %v5911_v40 = vcombine.high %v1202_v31, %v1206_v32 }
 0x29b   : > { %4427 = vmatpush2.bf16.msra.mxu0 %v6084_v45  ;;  %v5782_v45 = vcombine.low %v1074_v27, %v1078_v28  ;;  %v1154_v27 = vld [vmem:[%s7016_s26 + $0x390] sm:$0xff] }
 0x29c   : > { %4428 = vmatprep.subr.bf16.mxu0 %v6077_v47  ;;  %v5775_v47 = vcombine.high %v1066_v41, %v1070_v42  ;;  %v1158_v28 = vld [vmem:[%s7016_s26 + $0x3b0] sm:$0xff] }
 0x29d   : > { %4468 = vmatpush2.bf16.msra.mxu1 %v6212_v46  ;;  %v5910_v46 = vcombine.low %v1202_v31, %v1206_v32  ;;  %v1286_v31 = vld [vmem:[%s7016_s26 + $0x7b0] sm:$0xff]  ;;  %v5870_v32 = vcombine.low %v1162_v13, %v1166_v14 }
 0x29e   : > { %4469 = vmatprep.subr.bf16.mxu1 %v6205_v48  ;;  %v5903_v48 = vcombine.high %v1194_v43, %v1198_v44 }
 0x29f   : > { %4429 = vmatpush2.bf16.msra.mxu0 %v6076_v53  ;;  %v5774_v53 = vcombine.low %v1066_v41, %v1070_v42  ;;  %v5862_v41 = vcombine.low %v1154_v27, %v1158_v28 }
 0x2a0   : > { %4430 = vmatprep.subr.bf16.mxu0 %v6069_v57  ;;  %v5767_v57 = vcombine.high %v1058_v49, %v1062_v50 }
 0x2a1   : > { %4470 = vmatpush2.bf16.msra.mxu1 %v6204_v54  ;;  %v5902_v54 = vcombine.low %v1194_v43, %v1198_v44 }
 0x2a2   : > { %4471 = vmatprep.subr.bf16.mxu1 %v6197_v58  ;;  %v5895_v58 = vcombine.high %v1186_v51, %v1190_v52 }
 0x2a3   : > { %4431 = vmatpush2.bf16.msra.mxu0 %v6068_v63  ;;  %v5766_v63 = vcombine.low %v1058_v49, %v1062_v50 }
 0x2a4   : > { %4482 = vmatprep.subr.bf16.mxu0 %v5807_v1  ;;  %v5759_v1 = vcombine.high %v1050_v59, %v1054_v60 }
 0x2a5   : > { %4472 = vmatpush2.bf16.msra.mxu1 %v6196_v0  ;;  %v5894_v0 = vcombine.low %v1186_v51, %v1190_v52 }
 0x2a6   : > { %4523 = vmatprep.subr.bf16.mxu1 %v5935_v2  ;;  %v7344_v16 = vpop.f32.mrf.mxu0  ;;  %4433 = vmatmul.mubr.bf16.vlgmr.msra.gmra.mxu0 %v7200_v34  ;;  %v5887_v2 = vcombine.high %v1178_v61, %v1182_v62 }
 0x2a7   : > { %4483 = vmatpush1.bf16.msra.mxu0 %v5806_v7  ;;  %4514 = vmatprep.mubr.bf16.mxu0 %v7078_v55  ;;  %v5758_v7 = vcombine.low %v1050_v59, %v1054_v60 }
 0x2a8   : > { %v7349_v20 = vpop.f32.mrf.mxu1  ;;  %4474 = vmatmul.mubr.bf16.vlgmr.msra.gmra.mxu1 %v7204_v37  ;;  %v7352_v12 = vpop.f32.mrf.mxu0  ;;  %4484 = vmatprep.subr.bf16.mxu0 %v5799_v10  ;;  %v5751_v10 = vcombine.high %v1042_v3, %v1046_v4 }
 0x2a9   : > { %4524 = vmatpush1.bf16.msra.mxu1 %v5934_v9  ;;  %4555 = vmatprep.mubr.bf16.mxu1 %v7080_v56  ;;  %v5886_v9 = vcombine.low %v1178_v61, %v1182_v62  ;;  %v1554_v62 = vlaneseq }
 0x2aa   : > { %v7354_v24 = vpop.f32.mrf.mxu1  ;;  %4525 = vmatprep.subr.bf16.mxu1 %v5927_v11  ;;  %v4192_v30 = vpop.f32.mrf.mxu0  ;;  %v5879_v11 = vcombine.high %v1170_v5, %v1174_v6 }
 0x2ab   : > { %4485 = vmatpush1.bf16.msra.mxu0 %v5798_v21  ;;  %v5750_v21 = vcombine.low %v1042_v3, %v1046_v4  ;;  %v1282_v30 = vld [vmem:[%s7016_s26 + $0x790] sm:$0xff] }
 0x2ac   : > { %v4233_v33 = vpop.f32.mrf.mxu1  ;;  %v4193_v36 = vpop.f32.mrf.mxu0  ;;  %4486 = vmatprep.subr.bf16.mxu0 %v5791_v23  ;;  %v5871_v23 = vcombine.high %v1162_v13, %v1166_v14  ;;  %v5990_v42 = vcombine.low %v1282_v30, %v1286_v31  ;;  %v1254_v3 = vld [vmem:[%s7016_s26 + $0x6b0] sm:$0xff] }
 0x2ad   : > { %4526 = vmatpush1.bf16.msra.mxu1 %v5926_v22  ;;  %v5878_v22 = vcombine.low %v1170_v5, %v1174_v6  ;;  %v5998_v33 = vcombine.low %v1290_v17, %v1294_v18  ;;  %v5991_v36 = vcombine.high %v1282_v30, %v1286_v31  ;;  %v1242_v13 = vld [vmem:[%s7016_s26 + $0x650] sm:$0xff] }
 0x2ae   : > { %v4234_v8 = vpop.f32.mrf.mxu1  ;;  %4527 = vmatprep.subr.bf16.mxu1 %v5919_v25  ;;  %v5999_v25 = vcombine.high %v1290_v17, %v1294_v18  ;;  %v1246_v14 = vld [vmem:[%s7016_s26 + $0x670] sm:$0xff] }
 0x2af   : > { %4487 = vmatpush1.bf16.msra.mxu0 %v5790_v35  ;;  %v5863_v35 = vcombine.high %v1154_v27, %v1158_v28  ;;  %v1274_v8 = vld [vmem:[%s7016_s26 + $0x750] sm:$0xff]  ;;  %v7414_v28 = vld [vmem:[%s355_s24] sm:$0xff] }
 0x2b0   : > { %4488 = vmatprep.subr.bf16.mxu0 %v5783_v39  ;;  %v1150_v39 = vld [vmem:[%s7016_s26 + $0x370] sm:$0xff] }
 0x2b1   : > { %4528 = vmatpush1.bf16.msra.mxu1 %v5918_v38  ;;  %v1146_v38 = vld [vmem:[%s7016_s26 + $0x350] sm:$0xff] }
 0x2b2   : > { %4529 = vmatprep.subr.bf16.mxu1 %v5911_v40  ;;  %v1278_v40 = vld [vmem:[%s7016_s26 + $0x770] sm:$0xff]  ;;  %v5855_v43 = vcombine.high %v1146_v38, %v1150_v39  ;;  %v5854_v49 = vcombine.low %v1146_v38, %v1150_v39 }
 0x2b3   : > { %4489 = vmatpush1.bf16.msra.mxu0 %v5782_v45  ;;  %v5983_v44 = vcombine.high %v1274_v8, %v1278_v40  ;;  %v1138_v45 = vld [vmem:[%s7016_s26 + $0x310] sm:$0xff]  ;;  %v5982_v50 = vcombine.low %v1274_v8, %v1278_v40 }
 0x2b4   : > { %4490 = vmatprep.subr.bf16.mxu0 %v5775_v47  ;;  %v1266_v47 = vld [vmem:[%s7016_s26 + $0x710] sm:$0xff] }
 0x2b5   : > { %4530 = vmatpush1.bf16.msra.mxu1 %v5910_v46  ;;  %v1142_v46 = vld [vmem:[%s7016_s26 + $0x330] sm:$0xff] }
 0x2b6   : > { %4531 = vmatprep.subr.bf16.mxu1 %v5903_v48  ;;  %v1270_v48 = vld [vmem:[%s7016_s26 + $0x730] sm:$0xff]  ;;  %v5847_v51 = vcombine.high %v1138_v45, %v1142_v46  ;;  %v5846_v59 = vcombine.low %v1138_v45, %v1142_v46 }
 0x2b7   : > { %4491 = vmatpush1.bf16.msra.mxu0 %v5774_v53  ;;  %v5975_v52 = vcombine.high %v1266_v47, %v1270_v48  ;;  %v1130_v53 = vld [vmem:[%s7016_s26 + $0x2d0] sm:$0xff]  ;;  %v5974_v60 = vcombine.low %v1266_v47, %v1270_v48 }
 0x2b8   : > { %4492 = vmatprep.subr.bf16.mxu0 %v5767_v57  ;;  %v1258_v57 = vld [vmem:[%s7016_s26 + $0x6d0] sm:$0xff] }
 0x2b9   : > { %4532 = vmatpush1.bf16.msra.mxu1 %v5902_v54  ;;  %v1134_v54 = vld [vmem:[%s7016_s26 + $0x2f0] sm:$0xff] }
 0x2ba   : > { %4533 = vmatprep.subr.bf16.mxu1 %v5895_v58  ;;  %v1262_v58 = vld [vmem:[%s7016_s26 + $0x6f0] sm:$0xff]  ;;  %v5839_v61 = vcombine.high %v1130_v53, %v1134_v54  ;;  %v5838_v4 = vcombine.low %v1130_v53, %v1134_v54 }
 0x2bb   : > { %4493 = vmatpush1.bf16.msra.mxu0 %v5766_v63  ;;  %v5967_v63 = vcombine.high %v1258_v57, %v1262_v58  ;;  %v5966_v5 = vcombine.low %v1258_v57, %v1262_v58  ;;  %v1110_v27 = vld [vmem:[%s7016_s26 + $0x230] sm:$0xff] }
 0x2bc   : > { %4494 = vmatprep.subr.bf16.mxu0 %v5759_v1  ;;  %v1126_v1 = vld [vmem:[%s7016_s26 + $0x2b0] sm:$0xff] }
 0x2bd   : > { %4534 = vmatpush1.bf16.msra.mxu1 %v5894_v0  ;;  %v1122_v0 = vld [vmem:[%s7016_s26 + $0x290] sm:$0xff] }
 0x2be   : > { %4535 = vmatprep.subr.bf16.mxu1 %v5887_v2  ;;  %v1250_v2 = vld [vmem:[%s7016_s26 + $0x690] sm:$0xff]  ;;  %v5831_v6 = vcombine.high %v1122_v0, %v1126_v1  ;;  %v5830_v17 = vcombine.low %v1122_v0, %v1126_v1 }
 0x2bf   : > { %4495 = vmatpush1.bf16.msra.mxu0 %v5758_v7  ;;  %v7403_v7 = vshrl.u32 %v1554_v62, 7  ;;  %v5958_v18 = vcombine.low %v1250_v2, %v1254_v3  ;;  %v1234_v30 = vld [vmem:[%s7016_s26 + $0x610] sm:$0xff] }
 0x2c0   : > { %4496 = vmatprep.subr.bf16.mxu0 %v5751_v10  ;;  %v1114_v10 = vld [vmem:[%s7016_s26 + $0x250] sm:$0xff] }
 0x2c1   : > { %4536 = vmatpush1.bf16.msra.mxu1 %v5886_v9  ;;  %v5959_v9 = vcombine.high %v1250_v2, %v1254_v3  ;;  %v1238_v31 = vld [vmem:[%s7016_s26 + $0x630] sm:$0xff] }
 0x2c2   : > { %4537 = vmatprep.subr.bf16.mxu1 %v5879_v11  ;;  %v1118_v11 = vld [vmem:[%s7016_s26 + $0x270] sm:$0xff]  ;;  %v5943_v39 = vcombine.high %v1234_v30, %v1238_v31  ;;  %v5942_v45 = vcombine.low %v1234_v30, %v1238_v31 }
 0x2c3   : > { %4497 = vmatpush1.bf16.msra.mxu0 %v5750_v21  ;;  %v5823_v21 = vcombine.high %v1114_v10, %v1118_v11  ;;  %v1354_v8 = vld [vmem:[%s7016_s26 + $0x9d0] sm:$0xff] }
 0x2c4   : > { %4498 = vmatprep.subr.bf16.mxu0 %v5871_v23  ;;  %v5951_v23 = vcombine.high %v1242_v13, %v1246_v14  ;;  %v1358_v40 = vld [vmem:[%s7016_s26 + $0x9f0] sm:$0xff] }
 0x2c5   : > { %4538 = vmatpush1.bf16.msra.mxu1 %v5878_v22  ;;  %v1556_v22 = vsub.s32 0, %v7403_v7  ;;  %v6063_v46 = vcombine.high %v1354_v8, %v1358_v40  ;;  %v6062_v54 = vcombine.low %v1354_v8, %v1358_v40  ;;  %v1466_v0 = vld [vmem:[%s7016_s26 + $0xd50] sm:$0xff] }
 0x2c6   : > { %4539 = vmatprep.subr.bf16.mxu1 %v5999_v25  ;;  %v1106_v25 = vld [vmem:[%s7016_s26 + $0x210] sm:$0xff] }
 0x2c7   : > { %4499 = vmatpush2.bf16.msra.mxu0 %v5870_v32  ;;  %v1560_v32 = vsub.s32 1, %v7403_v7  ;;  %v1557_v38 = vrot.slane %v7414_v28, %v1556_v22  ;;  %v1470_v1 = vld [vmem:[%s7016_s26 + $0xd70] sm:$0xff] }
 0x2c8   : > { %4500 = vmatprep.subr.bf16.mxu0 %v5863_v35  ;;  %v5950_v35 = vcombine.low %v1242_v13, %v1246_v14  ;;  %v1330_v13 = vld [vmem:[%s7016_s26 + $0x910] sm:$0xff]  ;;  %v6174_v31 = vcombine.low %v1466_v0, %v1470_v1 }
 0x2c9   : > { %4540 = vmatpush2.bf16.msra.mxu1 %v5998_v33  ;;  %v5822_v33 = vcombine.low %v1114_v10, %v1118_v11  ;;  %v4189_v47 = vadd.f32 %v7344_v16, %v1557_v38  ;;  %v1334_v14 = vld [vmem:[%s7016_s26 + $0x930] sm:$0xff] }
 0x2ca   : > { %4541 = vmatprep.subr.bf16.mxu1 %v5991_v36  ;;  %v5815_v36 = vcombine.high %v1106_v25, %v1110_v27  ;;  %v1326_v8 = vld [vmem:[%s7016_s26 + $0x8f0] sm:$0xff] }
 0x2cb   : > { %4501 = vmatpush2.bf16.msra.mxu0 %v5862_v41  ;;  %v1482_v41 = vld [vmem:[%s7016_s26 + $0xdd0] sm:$0xff]  ;;  %v4230_v16 = vadd.f32 %v7349_v20, %v4189_v47 }
 0x2cc   : > { %4502 = vmatprep.subr.bf16.mxu0 %v5855_v43  ;;  %v1561_v43 = vrot.slane %v7414_v28, %v1560_v32  ;;  %v6039_v32 = vcombine.high %v1330_v13, %v1334_v14  ;;  %v1450_v40 = vld [vmem:[%s7016_s26 + $0xcd0] sm:$0xff] }
 0x2cd   : > { %4542 = vmatpush2.bf16.msra.mxu1 %v5990_v42  ;;  %v1486_v42 = vld [vmem:[%s7016_s26 + $0xdf0] sm:$0xff] }
 0x2ce   : > { %4543 = vmatprep.subr.bf16.mxu1 %v5983_v44  ;;  %v5814_v44 = vcombine.low %v1106_v25, %v1110_v27  ;;  %v6191_v48 = vcombine.high %v1482_v41, %v1486_v42  ;;  %v4191_v53 = vadd.f32 %v7352_v12, %v1561_v43  ;;  %v6190_v57 = vcombine.low %v1482_v41, %v1486_v42  ;;  %v1454_v41 = vld [vmem:[%s7016_s26 + $0xcf0] sm:$0xff] }
 0x2cf   : > { %4503 = vmatpush2.bf16.msra.mxu0 %v5854_v49  ;;  %v1346_v49 = vld [vmem:[%s7016_s26 + $0x990] sm:$0xff]  ;;  %v6038_v43 = vcombine.low %v1330_v13, %v1334_v14 }
 0x2d0   : > { %4504 = vmatprep.subr.bf16.mxu0 %v5847_v51  ;;  %v1474_v51 = vld [vmem:[%s7016_s26 + $0xd90] sm:$0xff]  ;;  %v4232_v2 = vadd.f32 %v7354_v24, %v4191_v53  ;;  %v6175_v24 = vcombine.high %v1466_v0, %v1470_v1 }
 0x2d1   : > { %4544 = vmatpush2.bf16.msra.mxu1 %v5982_v50  ;;  %v1350_v50 = vld [vmem:[%s7016_s26 + $0x9b0] sm:$0xff] }
 0x2d2   : > { %4545 = vmatprep.subr.bf16.mxu1 %v5975_v52  ;;  %v1478_v52 = vld [vmem:[%s7016_s26 + $0xdb0] sm:$0xff]  ;;  %v6055_v58 = vcombine.high %v1346_v49, %v1350_v50  ;;  %v6054_v20 = vcombine.low %v1346_v49, %v1350_v50 }
 0x2d3   : > { %4505 = vmatpush2.bf16.msra.mxu0 %v5846_v59  ;;  %v6183_v59 = vcombine.high %v1474_v51, %v1478_v52  ;;  %v1314_v47 = vld [vmem:[%s7016_s26 + $0x890] sm:$0xff] }
 0x2d4   : > { %4506 = vmatprep.subr.bf16.mxu0 %v5839_v61  ;;  %v1342_v61 = vld [vmem:[%s7016_s26 + $0x970] sm:$0xff] }
 0x2d5   : > { %4546 = vmatpush2.bf16.msra.mxu1 %v5974_v60  ;;  %v1338_v60 = vld [vmem:[%s7016_s26 + $0x950] sm:$0xff] }
 0x2d6   : > { %4547 = vmatprep.subr.bf16.mxu1 %v5967_v63  ;;  %v6046_v27 = vcombine.low %v1338_v60, %v1342_v61  ;;  %v1442_v49 = vld [vmem:[%s7016_s26 + $0xc90] sm:$0xff] }
 0x2d7   : > { %4507 = vmatpush2.bf16.msra.mxu0 %v5838_v4  ;;  %v1446_v50 = vld [vmem:[%s7016_s26 + $0xcb0] sm:$0xff] }
 0x2d8   : > { %4508 = vmatprep.subr.bf16.mxu0 %v5831_v6  ;;  %v6047_v6 = vcombine.high %v1338_v60, %v1342_v61  ;;  %v6150_v61 = vcombine.low %v1442_v49, %v1446_v50  ;;  %v1298_v1 = vld [vmem:[%s7016_s26 + $0x810] sm:$0xff] }
 0x2d9   : > { %4548 = vmatpush2.bf16.msra.mxu1 %v5966_v5  ;;  %v6182_v5 = vcombine.low %v1474_v51, %v1478_v52  ;;  %v6158_v52 = vcombine.low %v1450_v40, %v1454_v41 }
 0x2da   : > { %4549 = vmatprep.subr.bf16.mxu1 %v5959_v9 }
 0x2db   : > { %4509 = vmatpush2.bf16.msra.mxu0 %v5830_v17 }
 0x2dc   : > { %4510 = vmatprep.subr.bf16.mxu0 %v5823_v21  ;;  %v1462_v21 = vld [vmem:[%s7016_s26 + $0xd30] sm:$0xff] }
 0x2dd   : > { %4550 = vmatpush2.bf16.msra.mxu1 %v5958_v18  ;;  %v1458_v18 = vld [vmem:[%s7016_s26 + $0xd10] sm:$0xff] }
 0x2de   : > { %4551 = vmatprep.subr.bf16.mxu1 %v5951_v23  ;;  %v6167_v38 = vcombine.high %v1458_v18, %v1462_v21 }
 0x2df   : > { %4511 = vmatpush2.bf16.msra.mxu0 %v5822_v33 }
 0x2e0   : > { %4512 = vmatprep.subr.bf16.mxu0 %v5815_v36 }
 0x2e1   : > { %4552 = vmatpush2.bf16.msra.mxu1 %v5950_v35 }
 0x2e2   : > { %4553 = vmatprep.subr.bf16.mxu1 %v5943_v39  ;;  %v1322_v39 = vld [vmem:[%s7016_s26 + $0x8d0] sm:$0xff] }
 0x2e3   : > { %4513 = vmatpush2.bf16.msra.mxu0 %v5814_v44  ;;  %v6166_v44 = vcombine.low %v1458_v18, %v1462_v21  ;;  %v6030_v51 = vcombine.low %v1322_v39, %v1326_v8  ;;  %v1410_v21 = vld [vmem:[%s7016_s26 + $0xb90] sm:$0xff] }
 0x2e4   : > { %4564 = vmatprep.subr.bf16.mxu0 %v6063_v46  ;;  %v6159_v46 = vcombine.high %v1450_v40, %v1454_v41 }
 0x2e5   : > { %4554 = vmatpush2.bf16.msra.mxu1 %v5942_v45  ;;  %v6031_v45 = vcombine.high %v1322_v39, %v1326_v8 }
 0x2e6   : > { %4605 = vmatprep.subr.bf16.mxu1 %v6191_v48  ;;  %v4270_v63 = vpop.f32.mrf.mxu0  ;;  %4515 = vmatmul.mubr.bf16.vlgmr.msra.gmra.mxu0 %v7124_v15  ;;  %v1318_v48 = vld [vmem:[%s7016_s26 + $0x8b0] sm:$0xff] }
 0x2e7   : > { %v4271_v12 = vadd.f32 %v4270_v63, %v4230_v16  ;;  %4565 = vmatpush1.bf16.msra.mxu0 %v6062_v54  ;;  %4596 = vmatprep.mubr.bf16.mxu0 %v7132_v26  ;;  %v6023_v53 = vcombine.high %v1314_v47, %v1318_v48  ;;  %v6151_v54 = vcombine.high %v1442_v49, %v1446_v50  ;;  %v1434_v16 = vld [vmem:[%s7016_s26 + $0xc50] sm:$0xff] }
 0x2e8   : > { %v4311_v3 = vpop.f32.mrf.mxu1  ;;  %4556 = vmatmul.mubr.bf16.vlgmr.msra.gmra.mxu1 %v7128_v19  ;;  %v4272_v4 = vpop.f32.mrf.mxu0  ;;  %4566 = vmatprep.subr.bf16.mxu0 %v6055_v58  ;;  %v1310_v58 = vld [vmem:[%s7016_s26 + $0x870] sm:$0xff]  ;;  %v6022_v60 = vcombine.low %v1314_v47, %v1318_v48 }
 0x2e9   : > { %4606 = vmatpush1.bf16.msra.mxu1 %v6190_v57  ;;  %v4312_v9 = vadd.f32 %v4311_v3, %v4271_v12  ;;  %v4273_v10 = vadd.f32 %v4272_v4, %v4232_v2  ;;  %4637 = vmatprep.mubr.bf16.mxu1 %v7137_v29  ;;  %v1306_v57 = vld [vmem:[%s7016_s26 + $0x850] sm:$0xff] }
 0x2ea   : > { %v4313_v11 = vpop.f32.mrf.mxu1  ;;  %4607 = vmatprep.subr.bf16.mxu1 %v6183_v59  ;;  %v4274_v17 = vpop.f32.mrf.mxu0  ;;  %v1438_v59 = vld [vmem:[%s7016_s26 + $0xc70] sm:$0xff]  ;;  %v6015_v63 = vcombine.high %v1306_v57, %v1310_v58 }
 0x2eb   : > { %vm4810_vm8 = vcmp.gt.f32.partialorder %v4312_v9, 0.0  ;;  %v4818_v22 = vmul.f32 0.01, %v4312_v9  ;;  %v4314_v23 = vadd.f32 %v4313_v11, %v4273_v10  ;;  %4567 = vmatpush1.bf16.msra.mxu0 %v6054_v20  ;;  %v6143_v0 = vcombine.high %v1434_v16, %v1438_v59  ;;  %v1302_v2 = vld [vmem:[%s7016_s26 + $0x830] sm:$0xff] }
 0x2ec   : > { %v4315_v25 = vpop.f32.mrf.mxu1  ;;  %v4275_v30 = vpop.f32.mrf.mxu0  ;;  %4568 = vmatprep.subr.bf16.mxu0 %v6047_v6  ;;  %v1426_v12 = vld [vmem:[%s7016_s26 + $0xc10] sm:$0xff]  ;;  %v6014_v20 = vcombine.low %v1306_v57, %v1310_v58  ;;  %v6142_v4 = vcombine.low %v1434_v16, %v1438_v59  ;;  %v6006_v13 = vcombine.low %v1298_v1, %v1302_v2 }
 0x2ed   : > { %4608 = vmatpush1.bf16.msra.mxu1 %v6182_v5  ;;  %v4826_v33 = vsel %vm4810_vm8, %v4312_v9, %v4818_v22  ;;  %vm4811_vm9 = vcmp.gt.f32.partialorder %v4314_v23, 0.0  ;;  %v4819_v35 = vmul.f32 0.01, %v4314_v23  ;;  %v1430_v3 = vld [vmem:[%s7016_s26 + $0xc30] sm:$0xff]  ;;  %v6007_v5 = vcombine.high %v1298_v1, %v1302_v2 }
 0x2ee   : > { %v4316_v36 = vpop.f32.mrf.mxu1  ;;  %4609 = vmatprep.subr.bf16.mxu1 %v6175_v24  ;;  %4834 = vst [vmem:[#allocation2 + $0x30] sm:$0xff] %v4826_v33  ;;  %v6135_v6 = vcombine.high %v1426_v12, %v1430_v3  ;;  %v1418_v9 = vld [vmem:[%s7016_s26 + $0xbd0] sm:$0xff]  ;;  %v6134_v14 = vcombine.low %v1426_v12, %v1430_v3 }
 0x2ef   : > { %v4827_v42 = vsel %vm4811_vm9, %v4314_v23, %v4819_v35  ;;  %4569 = vmatpush1.bf16.msra.mxu0 %v6046_v27  ;;  %v1422_v10 = vld [vmem:[%s7016_s26 + $0xbf0] sm:$0xff] }
 0x2f0   : > { %4835 = vst [vmem:[#allocation2] sm:$0xff] %v4827_v42  ;;  %4570 = vmatprep.subr.bf16.mxu0 %v6039_v32  ;;  %v1546_v11 = vld [vmem:[%s7016_s26 + $0xfd0] sm:$0xff]  ;;  %v6127_v17 = vcombine.high %v1418_v9, %v1422_v10  ;;  %v6126_v27 = vcombine.low %v1418_v9, %v1422_v10 }
 0x2f1   : > { %4610 = vmatpush1.bf16.msra.mxu1 %v6174_v31  ;;  %v1550_v24 = vld [vmem:[%s7016_s26 + $0xff0] sm:$0xff] }
 0x2f2   : > { %4611 = vmatprep.subr.bf16.mxu1 %v6167_v38  ;;  %v6255_v18 = vcombine.high %v1546_v11, %v1550_v24  ;;  %v1414_v22 = vld [vmem:[%s7016_s26 + $0xbb0] sm:$0xff]  ;;  %v6254_v30 = vcombine.low %v1546_v11, %v1550_v24 }
 0x2f3   : > { %4571 = vmatpush1.bf16.msra.mxu0 %v6038_v43  ;;  %v1538_v23 = vld [vmem:[%s7016_s26 + $0xf90] sm:$0xff]  ;;  %v6119_v31 = vcombine.high %v1410_v21, %v1414_v22  ;;  %v6118_v39 = vcombine.low %v1410_v21, %v1414_v22 }
 0x2f4   : > { %4572 = vmatprep.subr.bf16.mxu0 %v6031_v45  ;;  %v1542_v25 = vld [vmem:[%s7016_s26 + $0xfb0] sm:$0xff] }
 0x2f5   : > { %4612 = vmatpush1.bf16.msra.mxu1 %v6166_v44  ;;  %v6247_v32 = vcombine.high %v1538_v23, %v1542_v25  ;;  %v1402_v33 = vld [vmem:[%s7016_s26 + $0xb50] sm:$0xff]  ;;  %v6246_v8 = vcombine.low %v1538_v23, %v1542_v25  ;;  %v1099_v25 = vld [vmem:[%s7016_s26 + $0x1d8] sm:$0xff] }
 0x2f6   : > { %4613 = vmatprep.subr.bf16.mxu1 %v6159_v46  ;;  %v1406_v35 = vld [vmem:[%s7016_s26 + $0xb70] sm:$0xff] }
 0x2f7   : > { %4573 = vmatpush1.bf16.msra.mxu0 %v6030_v51  ;;  %v1530_v36 = vld [vmem:[%s7016_s26 + $0xf50] sm:$0xff]  ;;  %v6111_v40 = vcombine.high %v1402_v33, %v1406_v35  ;;  %v6110_v46 = vcombine.low %v1402_v33, %v1406_v35 }
 0x2f8   : > { %4574 = vmatprep.subr.bf16.mxu0 %v6023_v53  ;;  %v1534_v38 = vld [vmem:[%s7016_s26 + $0xf70] sm:$0xff] }
 0x2f9   : > { %4614 = vmatpush1.bf16.msra.mxu1 %v6158_v52  ;;  %v6239_v41 = vcombine.high %v1530_v36, %v1534_v38  ;;  %v1394_v42 = vld [vmem:[%s7016_s26 + $0xb10] sm:$0xff]  ;;  %v6238_v47 = vcombine.low %v1530_v36, %v1534_v38  ;;  %v1091_v38 = vld [vmem:[%s7016_s26 + $0x198] sm:$0xff] }
 0x2fa   : > { %4615 = vmatprep.subr.bf16.mxu1 %v6151_v54  ;;  %v1398_v43 = vld [vmem:[%s7016_s26 + $0xb30] sm:$0xff] }
 0x2fb   : > { %4575 = vmatpush1.bf16.msra.mxu0 %v6022_v60  ;;  %v1522_v44 = vld [vmem:[%s7016_s26 + $0xf10] sm:$0xff]  ;;  %v6103_v48 = vcombine.high %v1394_v42, %v1398_v43  ;;  %v6102_v54 = vcombine.low %v1394_v42, %v1398_v43 }
 0x2fc   : > { %4576 = vmatprep.subr.bf16.mxu0 %v6015_v63  ;;  %v1526_v45 = vld [vmem:[%s7016_s26 + $0xf30] sm:$0xff] }
 0x2fd   : > { %4616 = vmatpush1.bf16.msra.mxu1 %v6150_v61  ;;  %v6231_v49 = vcombine.high %v1522_v44, %v1526_v45  ;;  %v1386_v50 = vld [vmem:[%s7016_s26 + $0xad0] sm:$0xff]  ;;  %v6230_v57 = vcombine.low %v1522_v44, %v1526_v45  ;;  %v1083_v45 = vld [vmem:[%s7016_s26 + $0x158] sm:$0xff] }
 0x2fe   : > { %4617 = vmatprep.subr.bf16.mxu1 %v6143_v0  ;;  %v1390_v51 = vld [vmem:[%s7016_s26 + $0xaf0] sm:$0xff] }
 0x2ff   : > { %4577 = vmatpush1.bf16.msra.mxu0 %v6014_v20  ;;  %v1514_v52 = vld [vmem:[%s7016_s26 + $0xed0] sm:$0xff]  ;;  %v6095_v58 = vcombine.high %v1386_v50, %v1390_v51  ;;  %v6094_v0 = vcombine.low %v1386_v50, %v1390_v51 }
 0x300   : > { %4578 = vmatprep.subr.bf16.mxu0 %v6007_v5  ;;  %v1518_v53 = vld [vmem:[%s7016_s26 + $0xef0] sm:$0xff] }
 0x301   : > { %4618 = vmatpush1.bf16.msra.mxu1 %v6142_v4  ;;  %v6223_v16 = vcombine.high %v1514_v52, %v1518_v53  ;;  %v1378_v59 = vld [vmem:[%s7016_s26 + $0xa90] sm:$0xff]  ;;  %v6222_v1 = vcombine.low %v1514_v52, %v1518_v53 }
 0x302   : > { %4619 = vmatprep.subr.bf16.mxu1 %v6135_v6  ;;  %v1382_v60 = vld [vmem:[%s7016_s26 + $0xab0] sm:$0xff] }
 0x303   : > { %4579 = vmatpush1.bf16.msra.mxu0 %v6006_v13  ;;  %v1506_v61 = vld [vmem:[%s7016_s26 + $0xe90] sm:$0xff]  ;;  %v6087_v2 = vcombine.high %v1378_v59, %v1382_v60  ;;  %v6086_v6 = vcombine.low %v1378_v59, %v1382_v60  ;;  %v1079_v59 = vld [vmem:[%s7016_s26 + $0x138] sm:$0xff] }
 0x304   : > { %4580 = vmatprep.subr.bf16.mxu0 %v6127_v17  ;;  %v1510_v63 = vld [vmem:[%s7016_s26 + $0xeb0] sm:$0xff] }
 0x305   : > { %4620 = vmatpush1.bf16.msra.mxu1 %v6134_v14  ;;  %v6215_v12 = vcombine.high %v1506_v61, %v1510_v63  ;;  %v1370_v3 = vld [vmem:[%s7016_s26 + $0xa50] sm:$0xff]  ;;  %v6214_v9 = vcombine.low %v1506_v61, %v1510_v63  ;;  %v1203_v61 = vld [vmem:[%s7016_s26 + $0x518] sm:$0xff] }
 0x306   : > { %4621 = vmatprep.subr.bf16.mxu1 %v6255_v18  ;;  %v1374_v20 = vld [vmem:[%s7016_s26 + $0xa70] sm:$0xff]  ;;  %v1207_v63 = vld [vmem:[%s7016_s26 + $0x538] sm:$0xff] }
 0x307   : > { %4581 = vmatpush2.bf16.msra.mxu0 %v6126_v27  ;;  %v1498_v4 = vld [vmem:[%s7016_s26 + $0xe50] sm:$0xff]  ;;  %v6079_v10 = vcombine.high %v1370_v3, %v1374_v20  ;;  %v6078_v18 = vcombine.low %v1370_v3, %v1374_v20  ;;  %v1103_v27 = vld [vmem:[%s7016_s26 + $0x1f8] sm:$0xff] }
 0x308   : > { %4582 = vmatprep.subr.bf16.mxu0 %v6119_v31  ;;  %v1502_v5 = vld [vmem:[%s7016_s26 + $0xe70] sm:$0xff]  ;;  %v1231_v31 = vld [vmem:[%s7016_s26 + $0x5f8] sm:$0xff]  ;;  %v5809_v35 = vcombine.high %v1099_v25, %v1103_v27 }
 0x309   : > { %4622 = vmatpush2.bf16.msra.mxu1 %v6254_v30  ;;  %v6207_v11 = vcombine.high %v1498_v4, %v1502_v5  ;;  %v1362_v24 = vld [vmem:[%s7016_s26 + $0xa10] sm:$0xff]  ;;  %v6206_v21 = vcombine.low %v1498_v4, %v1502_v5  ;;  %v1227_v30 = vld [vmem:[%s7016_s26 + $0x5d8] sm:$0xff] }
 0x30a   : > { %4623 = vmatprep.subr.bf16.mxu1 %v6247_v32  ;;  %v1366_v13 = vld [vmem:[%s7016_s26 + $0xa30] sm:$0xff]  ;;  %v5937_v36 = vcombine.high %v1227_v30, %v1231_v31  ;;  %v5936_v42 = vcombine.low %v1227_v30, %v1231_v31  ;;  %v1067_v4 = vld [vmem:[%s7016_s26 + $0xd8] sm:$0xff] }
 0x30b   : > { %4583 = vmatpush2.bf16.msra.mxu0 %v6118_v39  ;;  %v1490_v14 = vld [vmem:[%s7016_s26 + $0xe10] sm:$0xff]  ;;  %v6071_v22 = vcombine.high %v1362_v24, %v1366_v13  ;;  %v6070_v32 = vcombine.low %v1362_v24, %v1366_v13  ;;  %v1095_v39 = vld [vmem:[%s7016_s26 + $0x1b8] sm:$0xff] }
 0x30c   : > { %4584 = vmatprep.subr.bf16.mxu0 %v6111_v40  ;;  %v1494_v17 = vld [vmem:[%s7016_s26 + $0xe30] sm:$0xff]  ;;  %v1223_v40 = vld [vmem:[%s7016_s26 + $0x5b8] sm:$0xff]  ;;  %v5801_v43 = vcombine.high %v1091_v38, %v1095_v39  ;;  %v5800_v51 = vcombine.low %v1091_v38, %v1095_v39 }
 0x30d   : > { %4624 = vmatpush2.bf16.msra.mxu1 %v6246_v8  ;;  %v6199_v23 = vcombine.high %v1490_v14, %v1494_v17  ;;  %v6198_v33 = vcombine.low %v1490_v14, %v1494_v17  ;;  %v1219_v8 = vld [vmem:[%s7016_s26 + $0x598] sm:$0xff] }
 0x30e   : > { %4625 = vmatprep.subr.bf16.mxu1 %v6239_v41  ;;  %v5808_v41 = vcombine.low %v1099_v25, %v1103_v27  ;;  %v5929_v44 = vcombine.high %v1219_v8, %v1223_v40  ;;  %v5928_v53 = vcombine.low %v1219_v8, %v1223_v40  ;;  %v1071_v5 = vld [vmem:[%s7016_s26 + $0xf8] sm:$0xff] }
 0x30f   : > { %4585 = vmatpush2.bf16.msra.mxu0 %v6110_v46  ;;  %v1087_v46 = vld [vmem:[%s7016_s26 + $0x178] sm:$0xff] }
 0x310   : > { %4586 = vmatprep.subr.bf16.mxu0 %v6103_v48  ;;  %v1211_v48 = vld [vmem:[%s7016_s26 + $0x558] sm:$0xff] }
 0x311   : > { %4626 = vmatpush2.bf16.msra.mxu1 %v6238_v47  ;;  %v1059_v13 = vld [vmem:[%s7016_s26 + $0x98] sm:$0xff] }
 0x312   : > { %4627 = vmatprep.subr.bf16.mxu1 %v6231_v49  ;;  %v1215_v49 = vld [vmem:[%s7016_s26 + $0x578] sm:$0xff] }
 0x313   : > { %4587 = vmatpush2.bf16.msra.mxu0 %v6102_v54  ;;  %v5793_v54 = vcombine.high %v1083_v45, %v1087_v46  ;;  %v1063_v14 = vld [vmem:[%s7016_s26 + $0xb8] sm:$0xff] }
 0x314   : > { %4588 = vmatprep.subr.bf16.mxu0 %v6095_v58  ;;  %v5921_v58 = vcombine.high %v1211_v48, %v1215_v49  ;;  %v1187_v17 = vld [vmem:[%s7016_s26 + $0x498] sm:$0xff] }
 0x315   : > { %4628 = vmatpush2.bf16.msra.mxu1 %v6230_v57  ;;  %v1051_v27 = vld [vmem:[%s7016_s26 + $0x58] sm:$0xff] }
 0x316   : > { %4629 = vmatprep.subr.bf16.mxu1 %v6223_v16  ;;  %v1075_v16 = vld [vmem:[%s7016_s26 + $0x118] sm:$0xff] }
 0x317   : > { %4589 = vmatpush2.bf16.msra.mxu0 %v6094_v0  ;;  %v5785_v3 = vcombine.high %v1075_v16, %v1079_v59  ;;  %v1055_v30 = vld [vmem:[%s7016_s26 + $0x78] sm:$0xff] }
 0x318   : > { %4590 = vmatprep.subr.bf16.mxu0 %v6087_v2  ;;  %v1179_v31 = vld [vmem:[%s7016_s26 + $0x458] sm:$0xff] }
 0x319   : > { %4630 = vmatpush2.bf16.msra.mxu1 %v6222_v1  ;;  %v5792_v1 = vcombine.low %v1083_v45, %v1087_v46  ;;  %v1043_v39 = vld [vmem:[%s7016_s26 + $0x18] sm:$0xff] }
 0x31a   : > { %4631 = vmatprep.subr.bf16.mxu1 %v6215_v12  ;;  %v5920_v12 = vcombine.low %v1211_v48, %v1215_v49  ;;  %v1047_v8 = vld [vmem:[%s7016_s26 + $0x38] sm:$0xff] }
 0x31b   : > { %4591 = vmatpush2.bf16.msra.mxu0 %v6086_v6  ;;  %v1195_v6 = vld [vmem:[%s7016_s26 + $0x4d8] sm:$0xff] }
 0x31c   : > { %4592 = vmatprep.subr.bf16.mxu0 %v6079_v10  ;;  %v5912_v10 = vcombine.low %v1203_v61, %v1207_v63  ;;  %v1171_v40 = vld [vmem:[%s7016_s26 + $0x418] sm:$0xff] }
 0x31d   : > { %4632 = vmatpush2.bf16.msra.mxu1 %v6214_v9  ;;  %v1199_v9 = vld [vmem:[%s7016_s26 + $0x4f8] sm:$0xff] }
 0x31e   : > { %4633 = vmatprep.subr.bf16.mxu1 %v6207_v11  ;;  %v5777_v11 = vcombine.high %v1067_v4, %v1071_v5  ;;  %v5905_v24 = vcombine.high %v1195_v6, %v1199_v9  ;;  %v1163_v46 = vld [vmem:[%s7016_s26 + $0x3d8] sm:$0xff] }
 0x31f   : > { %4593 = vmatpush2.bf16.msra.mxu0 %v6078_v18  ;;  %v1191_v18 = vld [vmem:[%s7016_s26 + $0x4b8] sm:$0xff] }
 0x320   : > { %4594 = vmatprep.subr.bf16.mxu0 %v6071_v22  ;;  %v5904_v22 = vcombine.low %v1195_v6, %v1199_v9  ;;  %v5897_v25 = vcombine.high %v1187_v17, %v1191_v18  ;;  %v1167_v48 = vld [vmem:[%s7016_s26 + $0x3f8] sm:$0xff] }
 0x321   : > { %4634 = vmatpush2.bf16.msra.mxu1 %v6206_v21  ;;  %v5776_v21 = vcombine.low %v1067_v4, %v1071_v5  ;;  %v1291_v49 = vld [vmem:[%s7016_s26 + $0x7d8] sm:$0xff] }
 0x322   : > { %4635 = vmatprep.subr.bf16.mxu1 %v6199_v23  ;;  %v5769_v23 = vcombine.high %v1059_v13, %v1063_v14  ;;  %v1279_v4 = vld [vmem:[%s7016_s26 + $0x778] sm:$0xff] }
 0x323   : > { %4595 = vmatpush2.bf16.msra.mxu0 %v6070_v32  ;;  %v1183_v32 = vld [vmem:[%s7016_s26 + $0x478] sm:$0xff] }
 0x324   : > { %4646 = vmatprep.subr.bf16.mxu0 %v5809_v35  ;;  %v5896_v35 = vcombine.low %v1187_v17, %v1191_v18  ;;  %v5889_v38 = vcombine.high %v1179_v31, %v1183_v32 }
 0x325   : > { %4636 = vmatpush2.bf16.msra.mxu1 %v6198_v33  ;;  %v5768_v33 = vcombine.low %v1059_v13, %v1063_v14  ;;  %v1271_v13 = vld [vmem:[%s7016_s26 + $0x738] sm:$0xff] }
 0x326   : > { %4687 = vmatprep.subr.bf16.mxu1 %v5937_v36  ;;  %v7503_v47 = vpop.f32.mrf.mxu0  ;;  %4597 = vmatmul.mubr.bf16.vlgmr.msra.gmra.mxu0 %v7200_v34  ;;  %v5761_v36 = vcombine.high %v1051_v27, %v1055_v30 }
 0x327   : > { %4647 = vmatpush1.bf16.msra.mxu0 %v5808_v41  ;;  %4678 = vmatprep.mubr.bf16.mxu0 %v7078_v55  ;;  %v5913_v55 = vcombine.high %v1203_v61, %v1207_v63  ;;  %v1175_v41 = vld [vmem:[%s7016_s26 + $0x438] sm:$0xff] }
 0x328   : > { %v7508_v50 = vpop.f32.mrf.mxu1  ;;  %4638 = vmatmul.mubr.bf16.vlgmr.msra.gmra.mxu1 %v7204_v37  ;;  %v7511_v52 = vpop.f32.mrf.mxu0  ;;  %4648 = vmatprep.subr.bf16.mxu0 %v5801_v43  ;;  %v5888_v43 = vcombine.low %v1179_v31, %v1183_v32  ;;  %v5881_v45 = vcombine.high %v1171_v40, %v1175_v41  ;;  %v1283_v61 = vld [vmem:[%s7016_s26 + $0x798] sm:$0xff] }
 0x329   : > { %4688 = vmatpush1.bf16.msra.mxu1 %v5936_v42  ;;  %4719 = vmatprep.mubr.bf16.mxu1 %v7080_v56  ;;  %v5784_v56 = vcombine.low %v1075_v16, %v1079_v59  ;;  %v5760_v42 = vcombine.low %v1051_v27, %v1055_v30  ;;  %v1155_v59 = vld [vmem:[%s7016_s26 + $0x398] sm:$0xff] }
 0x32a   : > { %v7513_v57 = vpop.f32.mrf.mxu1  ;;  %4689 = vmatprep.subr.bf16.mxu1 %v5929_v44  ;;  %v4356_v60 = vpop.f32.mrf.mxu0  ;;  %v5753_v44 = vcombine.high %v1043_v39, %v1047_v8  ;;  %v1287_v63 = vld [vmem:[%s7016_s26 + $0x7b8] sm:$0xff] }
 0x32b   : > { %4649 = vmatpush1.bf16.msra.mxu0 %v5800_v51  ;;  %v1295_v51 = vld [vmem:[%s7016_s26 + $0x7f8] sm:$0xff]  ;;  %v5992_v6 = vcombine.low %v1283_v61, %v1287_v63 }
 0x32c   : > { %v4397_v0 = vpop.f32.mrf.mxu1  ;;  %v4357_v2 = vpop.f32.mrf.mxu0  ;;  %4650 = vmatprep.subr.bf16.mxu0 %v5793_v54  ;;  %v5880_v54 = vcombine.low %v1171_v40, %v1175_v41  ;;  %v6001_v16 = vcombine.high %v1291_v49, %v1295_v51  ;;  %v1159_v60 = vld [vmem:[%s7016_s26 + $0x3b8] sm:$0xff] }
 0x32d   : > { %4690 = vmatpush1.bf16.msra.mxu1 %v5928_v53  ;;  %v5752_v53 = vcombine.low %v1043_v39, %v1047_v8  ;;  %v5872_v0 = vcombine.low %v1163_v46, %v1167_v48  ;;  %v5865_v2 = vcombine.high %v1155_v59, %v1159_v60  ;;  %v5864_v5 = vcombine.low %v1155_v59, %v1159_v60  ;;  %v1263_v27 = vld [vmem:[%s7016_s26 + $0x6f8] sm:$0xff] }
 0x32e   : > { %v4398_v20 = vpop.f32.mrf.mxu1  ;;  %4691 = vmatprep.subr.bf16.mxu1 %v5921_v58  ;;  %v5873_v58 = vcombine.high %v1163_v46, %v1167_v48  ;;  %v1255_v39 = vld [vmem:[%s7016_s26 + $0x6b8] sm:$0xff] }
 0x32f   : > { %4651 = vmatpush1.bf16.msra.mxu0 %v5792_v1  ;;  %v6000_v1 = vcombine.low %v1291_v49, %v1295_v51  ;;  %v1151_v20 = vld [vmem:[%s7016_s26 + $0x378] sm:$0xff] }
 0x330   : > { %4652 = vmatprep.subr.bf16.mxu0 %v5785_v3  ;;  %v1147_v3 = vld [vmem:[%s7016_s26 + $0x358] sm:$0xff] }
 0x331   : > { %4692 = vmatpush1.bf16.msra.mxu1 %v5920_v12  ;;  %v5993_v12 = vcombine.high %v1283_v61, %v1287_v63  ;;  %v5857_v9 = vcombine.high %v1147_v3, %v1151_v20  ;;  %v5856_v14 = vcombine.low %v1147_v3, %v1151_v20  ;;  %v1247_v46 = vld [vmem:[%s7016_s26 + $0x678] sm:$0xff]  ;;  %v1568_v61 = vsub.s32 3, %v7403_v7 }
 0x332   : > { %4693 = vmatprep.subr.bf16.mxu1 %v5913_v55  ;;  %v1275_v55 = vld [vmem:[%s7016_s26 + $0x758] sm:$0xff] }
 0x333   : > { %4653 = vmatpush1.bf16.msra.mxu0 %v5784_v56  ;;  %v5985_v56 = vcombine.high %v1275_v55, %v1279_v4  ;;  %v5984_v17 = vcombine.low %v1275_v55, %v1279_v4  ;;  %v1235_v59 = vld [vmem:[%s7016_s26 + $0x618] sm:$0xff] }
 0x334   : > { %4654 = vmatprep.subr.bf16.mxu0 %v5777_v11  ;;  %v1143_v11 = vld [vmem:[%s7016_s26 + $0x338] sm:$0xff] }
 0x335   : > { %4694 = vmatpush1.bf16.msra.mxu1 %v5912_v10  ;;  %v1139_v10 = vld [vmem:[%s7016_s26 + $0x318] sm:$0xff] }
 0x336   : > { %4695 = vmatprep.subr.bf16.mxu1 %v5905_v24  ;;  %v1267_v24 = vld [vmem:[%s7016_s26 + $0x718] sm:$0xff]  ;;  %v5849_v18 = vcombine.high %v1139_v10, %v1143_v11  ;;  %v5848_v30 = vcombine.low %v1139_v10, %v1143_v11 }
 0x337   : > { %4655 = vmatpush1.bf16.msra.mxu0 %v5776_v21  ;;  %v5977_v21 = vcombine.high %v1267_v24, %v1271_v13  ;;  %v5976_v31 = vcombine.low %v1267_v24, %v1271_v13  ;;  %v1239_v60 = vld [vmem:[%s7016_s26 + $0x638] sm:$0xff] }
 0x338   : > { %4656 = vmatprep.subr.bf16.mxu0 %v5769_v23  ;;  %v1135_v23 = vld [vmem:[%s7016_s26 + $0x2f8] sm:$0xff] }
 0x339   : > { %4696 = vmatpush1.bf16.msra.mxu1 %v5904_v22  ;;  %v1131_v22 = vld [vmem:[%s7016_s26 + $0x2d8] sm:$0xff] }
 0x33a   : > { %4697 = vmatprep.subr.bf16.mxu1 %v5897_v25  ;;  %v1259_v25 = vld [vmem:[%s7016_s26 + $0x6d8] sm:$0xff]  ;;  %v5841_v32 = vcombine.high %v1131_v22, %v1135_v23  ;;  %v5840_v8 = vcombine.low %v1131_v22, %v1135_v23 }
 0x33b   : > { %4657 = vmatpush1.bf16.msra.mxu0 %v5768_v33  ;;  %v5969_v33 = vcombine.high %v1259_v25, %v1263_v27  ;;  %v5968_v40 = vcombine.low %v1259_v25, %v1263_v27  ;;  %v1355_v3 = vld [vmem:[%s7016_s26 + $0x9d8] sm:$0xff] }
 0x33c   : > { %4658 = vmatprep.subr.bf16.mxu0 %v5761_v36  ;;  %v1127_v36 = vld [vmem:[%s7016_s26 + $0x2b8] sm:$0xff] }
 0x33d   : > { %4698 = vmatpush1.bf16.msra.mxu1 %v5896_v35  ;;  %v1123_v35 = vld [vmem:[%s7016_s26 + $0x298] sm:$0xff] }
 0x33e   : > { %4699 = vmatprep.subr.bf16.mxu1 %v5889_v38  ;;  %v1251_v38 = vld [vmem:[%s7016_s26 + $0x698] sm:$0xff]  ;;  %v5833_v41 = vcombine.high %v1123_v35, %v1127_v36  ;;  %v5832_v48 = vcombine.low %v1123_v35, %v1127_v36 }
 0x33f   : > { %4659 = vmatpush1.bf16.msra.mxu0 %v5760_v42  ;;  %v5961_v42 = vcombine.high %v1251_v38, %v1255_v39  ;;  %v5960_v49 = vcombine.low %v1251_v38, %v1255_v39  ;;  %v1359_v20 = vld [vmem:[%s7016_s26 + $0x9f8] sm:$0xff] }
 0x340   : > { %4660 = vmatprep.subr.bf16.mxu0 %v5753_v44  ;;  %v1119_v44 = vld [vmem:[%s7016_s26 + $0x278] sm:$0xff] }
 0x341   : > { %4700 = vmatpush1.bf16.msra.mxu1 %v5888_v43  ;;  %v1115_v43 = vld [vmem:[%s7016_s26 + $0x258] sm:$0xff] }
 0x342   : > { %4701 = vmatprep.subr.bf16.mxu1 %v5881_v45  ;;  %v1243_v45 = vld [vmem:[%s7016_s26 + $0x658] sm:$0xff]  ;;  %v5825_v51 = vcombine.high %v1115_v43, %v1119_v44  ;;  %v5824_v63 = vcombine.low %v1115_v43, %v1119_v44 }
 0x343   : > { %4661 = vmatpush1.bf16.msra.mxu0 %v5752_v53  ;;  %v1564_v53 = vsub.s32 2, %v7403_v7  ;;  %v1483_v55 = vld [vmem:[%s7016_s26 + $0xdd8] sm:$0xff] }
 0x344   : > { %4662 = vmatprep.subr.bf16.mxu0 %v5873_v58  ;;  %v1107_v58 = vld [vmem:[%s7016_s26 + $0x218] sm:$0xff] }
 0x345   : > { %4702 = vmatpush1.bf16.msra.mxu1 %v5880_v54  ;;  %v5953_v54 = vcombine.high %v1243_v45, %v1247_v46  ;;  %v1487_v4 = vld [vmem:[%s7016_s26 + $0xdf8] sm:$0xff] }
 0x346   : > { %4703 = vmatprep.subr.bf16.mxu1 %v6001_v16  ;;  %v1111_v16 = vld [vmem:[%s7016_s26 + $0x238] sm:$0xff]  ;;  %v6193_v11 = vcombine.high %v1483_v55, %v1487_v4 }
 0x347   : > { %4663 = vmatpush2.bf16.msra.mxu0 %v5872_v0  ;;  %v5952_v0 = vcombine.low %v1243_v45, %v1247_v46  ;;  %v1347_v24 = vld [vmem:[%s7016_s26 + $0x998] sm:$0xff] }
 0x348   : > { %4664 = vmatprep.subr.bf16.mxu0 %v5865_v2  ;;  %v1565_v2 = vrot.slane %v7414_v28, %v1564_v53  ;;  %v1351_v13 = vld [vmem:[%s7016_s26 + $0x9b8] sm:$0xff] }
 0x349   : > { %4704 = vmatpush2.bf16.msra.mxu1 %v6000_v1  ;;  %v5817_v1 = vcombine.high %v1107_v58, %v1111_v16  ;;  %v6057_v22 = vcombine.high %v1347_v24, %v1351_v13  ;;  %v1339_v25 = vld [vmem:[%s7016_s26 + $0x958] sm:$0xff] }
 0x34a   : > { %4705 = vmatprep.subr.bf16.mxu1 %v5993_v12  ;;  %v5945_v12 = vcombine.high %v1235_v59, %v1239_v60  ;;  %v4353_v10 = vadd.f32 %v7503_v47, %v1565_v2  ;;  %v1343_v27 = vld [vmem:[%s7016_s26 + $0x978] sm:$0xff] }
 0x34b   : > { %4665 = vmatpush2.bf16.msra.mxu0 %v5864_v5  ;;  %v1569_v5 = vrot.slane %v7414_v28, %v1568_v61  ;;  %v6049_v39 = vcombine.high %v1339_v25, %v1343_v27  ;;  %v1463_v44 = vld [vmem:[%s7016_s26 + $0xd38] sm:$0xff] }
 0x34c   : > { %4666 = vmatprep.subr.bf16.mxu0 %v5857_v9  ;;  %v5944_v9 = vcombine.low %v1235_v59, %v1239_v60  ;;  %v4394_v47 = vadd.f32 %v7508_v50, %v4353_v10  ;;  %v6056_v50 = vcombine.low %v1347_v24, %v1351_v13  ;;  %v1323_v59 = vld [vmem:[%s7016_s26 + $0x8d8] sm:$0xff] }
 0x34d   : > { %4706 = vmatpush2.bf16.msra.mxu1 %v5992_v6  ;;  %v5816_v6 = vcombine.low %v1107_v58, %v1111_v16  ;;  %v4355_v28 = vadd.f32 %v7511_v52, %v1569_v5  ;;  %v1327_v60 = vld [vmem:[%s7016_s26 + $0x8f8] sm:$0xff] }
 0x34e   : > { %4707 = vmatprep.subr.bf16.mxu1 %v5985_v56  ;;  %v6065_v56 = vcombine.high %v1355_v3, %v1359_v20  ;;  %v1451_v61 = vld [vmem:[%s7016_s26 + $0xcd8] sm:$0xff] }
 0x34f   : > { %4667 = vmatpush2.bf16.msra.mxu0 %v5856_v14  ;;  %v1475_v14 = vld [vmem:[%s7016_s26 + $0xd98] sm:$0xff] }
 0x350   : > { %4668 = vmatprep.subr.bf16.mxu0 %v5849_v18  ;;  %v6064_v18 = vcombine.low %v1355_v3, %v1359_v20  ;;  %v1315_v20 = vld [vmem:[%s7016_s26 + $0x898] sm:$0xff] }
 0x351   : > { %4708 = vmatpush2.bf16.msra.mxu1 %v5984_v17  ;;  %v1479_v17 = vld [vmem:[%s7016_s26 + $0xdb8] sm:$0xff] }
 0x352   : > { %4709 = vmatprep.subr.bf16.mxu1 %v5977_v21  ;;  %v6192_v21 = vcombine.low %v1483_v55, %v1487_v4  ;;  %v6185_v23 = vcombine.high %v1475_v14, %v1479_v17  ;;  %v6184_v38 = vcombine.low %v1475_v14, %v1479_v17  ;;  %v1319_v55 = vld [vmem:[%s7016_s26 + $0x8b8] sm:$0xff] }
 0x353   : > { %4669 = vmatpush2.bf16.msra.mxu0 %v5848_v30  ;;  %v1443_v4 = vld [vmem:[%s7016_s26 + $0xc98] sm:$0xff]  ;;  %v6024_v17 = vcombine.low %v1315_v20, %v1319_v55 }
 0x354   : > { %4670 = vmatprep.subr.bf16.mxu0 %v5841_v32  ;;  %v1471_v32 = vld [vmem:[%s7016_s26 + $0xd78] sm:$0xff] }
 0x355   : > { %4710 = vmatpush2.bf16.msra.mxu1 %v5976_v31  ;;  %v1467_v31 = vld [vmem:[%s7016_s26 + $0xd58] sm:$0xff] }
 0x356   : > { %4711 = vmatprep.subr.bf16.mxu1 %v5969_v33  ;;  %v4396_v33 = vadd.f32 %v7513_v57, %v4355_v28  ;;  %v6177_v57 = vcombine.high %v1467_v31, %v1471_v32  ;;  %v6176_v53 = vcombine.low %v1467_v31, %v1471_v32  ;;  %v1447_v5 = vld [vmem:[%s7016_s26 + $0xcb8] sm:$0xff] }
 0x357   : > { %4671 = vmatpush2.bf16.msra.mxu0 %v5840_v8  ;;  %v6153_v10 = vcombine.high %v1443_v4, %v1447_v5  ;;  %v1311_v24 = vld [vmem:[%s7016_s26 + $0x878] sm:$0xff]  ;;  %v6152_v28 = vcombine.low %v1443_v4, %v1447_v5 }
 0x358   : > { %4672 = vmatprep.subr.bf16.mxu0 %v5833_v41  ;;  %v1331_v41 = vld [vmem:[%s7016_s26 + $0x918] sm:$0xff] }
 0x359   : > { %4712 = vmatpush2.bf16.msra.mxu1 %v5968_v40  ;;  %v1435_v13 = vld [vmem:[%s7016_s26 + $0xc58] sm:$0xff] }
 0x35a   : > { %4713 = vmatprep.subr.bf16.mxu1 %v5961_v42  ;;  %v1335_v42 = vld [vmem:[%s7016_s26 + $0x938] sm:$0xff] }
 0x35b   : > { %4673 = vmatpush2.bf16.msra.mxu0 %v5832_v48  ;;  %v1439_v14 = vld [vmem:[%s7016_s26 + $0xc78] sm:$0xff] }
 0x35c   : > { %4674 = vmatprep.subr.bf16.mxu0 %v5825_v51 }
 0x35d   : > { %4714 = vmatpush2.bf16.msra.mxu1 %v5960_v49  ;;  %v6048_v49 = vcombine.low %v1339_v25, %v1343_v27  ;;  %v1431_v25 = vld [vmem:[%s7016_s26 + $0xc38] sm:$0xff] }
 0x35e   : > { %4715 = vmatprep.subr.bf16.mxu1 %v5953_v54 }
 0x35f   : > { %4675 = vmatpush2.bf16.msra.mxu0 %v5824_v63  ;;  %v1455_v63 = vld [vmem:[%s7016_s26 + $0xcf8] sm:$0xff] }
 0x360   : > { %4676 = vmatprep.subr.bf16.mxu0 %v5817_v1  ;;  %v6040_v1 = vcombine.low %v1331_v41, %v1335_v42  ;;  %v6161_v3 = vcombine.high %v1451_v61, %v1455_v63 }
 0x361   : > { %4716 = vmatpush2.bf16.msra.mxu1 %v5952_v0 }
 0x362   : > { %4717 = vmatprep.subr.bf16.mxu1 %v5945_v12  ;;  %v6033_v12 = vcombine.high %v1323_v59, %v1327_v60 }
 0x363   : > { %4677 = vmatpush2.bf16.msra.mxu0 %v5816_v6  ;;  %v6032_v6 = vcombine.low %v1323_v59, %v1327_v60  ;;  %v1527_v59 = vld [vmem:[%s7016_s26 + $0xf38] sm:$0xff] }
 0x364   : > { %4728 = vmatprep.subr.bf16.mxu0 %v6065_v56  ;;  %v6025_v56 = vcombine.high %v1315_v20, %v1319_v55 }
 0x365   : > { %4718 = vmatpush2.bf16.msra.mxu1 %v5944_v9  ;;  %v6160_v9 = vcombine.low %v1451_v61, %v1455_v63 }
 0x366   : > { %4769 = vmatprep.subr.bf16.mxu1 %v6193_v11  ;;  %v4434_v30 = vpop.f32.mrf.mxu0  ;;  %4679 = vmatmul.mubr.bf16.vlgmr.msra.gmra.mxu0 %v7124_v15  ;;  %v1307_v11 = vld [vmem:[%s7016_s26 + $0x858] sm:$0xff] }
 0x367   : > { %v4435_v52 = vadd.f32 %v4434_v30, %v4394_v47  ;;  %4729 = vmatpush1.bf16.msra.mxu0 %v6064_v18  ;;  %4760 = vmatprep.mubr.bf16.mxu0 %v7132_v26  ;;  %v6041_v26 = vcombine.high %v1331_v41, %v1335_v42  ;;  %v6017_v18 = vcombine.high %v1307_v11, %v1311_v24  ;;  %v1303_v47 = vld [vmem:[%s7016_s26 + $0x838] sm:$0xff] }
 0x368   : > { %v4475_v35 = vpop.f32.mrf.mxu1  ;;  %4720 = vmatmul.mubr.bf16.vlgmr.msra.gmra.mxu1 %v7128_v19  ;;  %v4436_v36 = vpop.f32.mrf.mxu0  ;;  %4730 = vmatprep.subr.bf16.mxu0 %v6057_v22  ;;  %v1459_v19 = vld [vmem:[%s7016_s26 + $0xd18] sm:$0xff]  ;;  %v6016_v27 = vcombine.low %v1307_v11, %v1311_v24  ;;  %v6144_v30 = vcombine.low %v1435_v13, %v1439_v14 }
 0x369   : > { %4770 = vmatpush1.bf16.msra.mxu1 %v6192_v21  ;;  %v4476_v15 = vadd.f32 %v4475_v35, %v4435_v52  ;;  %v4437_v8 = vadd.f32 %v4436_v36, %v4396_v33  ;;  %4801 = vmatprep.mubr.bf16.mxu1 %v7137_v29  ;;  %v6169_v29 = vcombine.high %v1459_v19, %v1463_v44  ;;  %v1299_v22 = vld [vmem:[%s7016_s26 + $0x818] sm:$0xff] }
 0x36a   : > { %v4477_v40 = vpop.f32.mrf.mxu1  ;;  %4771 = vmatprep.subr.bf16.mxu1 %v6185_v23  ;;  %v4438_v43 = vpop.f32.mrf.mxu0  ;;  %v6168_v2 = vcombine.low %v1459_v19, %v1463_v44  ;;  %v6145_v21 = vcombine.high %v1435_v13, %v1439_v14  ;;  %v1427_v23 = vld [vmem:[%s7016_s26 + $0xc18] sm:$0xff]  ;;  %v6009_v31 = vcombine.high %v1299_v22, %v1303_v47  ;;  %v6008_v36 = vcombine.low %v1299_v22, %v1303_v47 }
 0x36b   : > { %vm4812_vm10 = vcmp.gt.f32.partialorder %v4476_v15, 0.0  ;;  %v4820_v45 = vmul.f32 0.01, %v4476_v15  ;;  %v4478_v46 = vadd.f32 %v4477_v40, %v4437_v8  ;;  %4731 = vmatpush1.bf16.msra.mxu0 %v6056_v50  ;;  %v6137_v32 = vcombine.high %v1427_v23, %v1431_v25  ;;  %v1419_v33 = vld [vmem:[%s7016_s26 + $0xbd8] sm:$0xff] }
 0x36c   : > { %v4479_v48 = vpop.f32.mrf.mxu1  ;;  %v4439_v51 = vpop.f32.mrf.mxu0  ;;  %4732 = vmatprep.subr.bf16.mxu0 %v6049_v39  ;;  %v1423_v52 = vld [vmem:[%s7016_s26 + $0xbf8] sm:$0xff] }
 0x36d   : > { %4772 = vmatpush1.bf16.msra.mxu1 %v6184_v38  ;;  %v4828_v54 = vsel %vm4812_vm10, %v4476_v15, %v4820_v45  ;;  %vm4813_vm11 = vcmp.gt.f32.partialorder %v4478_v46, 0.0  ;;  %v4821_v58 = vmul.f32 0.01, %v4478_v46  ;;  %v1547_v35 = vld [vmem:[%s7016_s26 + $0xfd8] sm:$0xff]  ;;  %v6136_v38 = vcombine.low %v1427_v23, %v1431_v25 }
 0x36e   : > { %v4480_v16 = vpop.f32.mrf.mxu1  ;;  %4773 = vmatprep.subr.bf16.mxu1 %v6177_v57  ;;  %4836 = vst [vmem:[#allocation2 + $0x18] sm:$0xff] %v4828_v54  ;;  %v1551_v50 = vld [vmem:[%s7016_s26 + $0xff8] sm:$0xff]  ;;  %v6129_v39 = vcombine.high %v1419_v33, %v1423_v52  ;;  %v6128_v42 = vcombine.low %v1419_v33, %v1423_v52 }
 0x36f   : > { %v4829_v0 = vsel %vm4813_vm11, %v4478_v46, %v4821_v58  ;;  %4733 = vmatpush1.bf16.msra.mxu0 %v6048_v49  ;;  %v6257_v15 = vcombine.high %v1547_v35, %v1551_v50  ;;  %v1411_v8 = vld [vmem:[%s7016_s26 + $0xb98] sm:$0xff]  ;;  %v6256_v43 = vcombine.low %v1547_v35, %v1551_v50 }
 0x370   : > { %4837 = vst [vmem:[#allocation2 + $0x10] sm:$0xff] %v4829_v0  ;;  %4734 = vmatprep.subr.bf16.mxu0 %v6041_v26  ;;  %v1415_v40 = vld [vmem:[%s7016_s26 + $0xbb8] sm:$0xff] }
 0x371   : > { %4774 = vmatpush1.bf16.msra.mxu1 %v6176_v53  ;;  %v1539_v57 = vld [vmem:[%s7016_s26 + $0xf98] sm:$0xff]  ;;  %v6121_v19 = vcombine.high %v1411_v8, %v1415_v40  ;;  %v6120_v51 = vcombine.low %v1411_v8, %v1415_v40 }
 0x372   : > { %4775 = vmatprep.subr.bf16.mxu1 %v6169_v29  ;;  %v1543_v41 = vld [vmem:[%s7016_s26 + $0xfb8] sm:$0xff] }
 0x373   : > { %4735 = vmatpush1.bf16.msra.mxu0 %v6040_v1  ;;  %v6249_v44 = vcombine.high %v1539_v57, %v1543_v41  ;;  %v1403_v45 = vld [vmem:[%s7016_s26 + $0xb58] sm:$0xff]  ;;  %v6248_v53 = vcombine.low %v1539_v57, %v1543_v41 }
 0x374   : > { %4736 = vmatprep.subr.bf16.mxu0 %v6033_v12  ;;  %v1407_v46 = vld [vmem:[%s7016_s26 + $0xb78] sm:$0xff] }
 0x375   : > { %4776 = vmatpush1.bf16.msra.mxu1 %v6168_v2  ;;  %v1531_v48 = vld [vmem:[%s7016_s26 + $0xf58] sm:$0xff]  ;;  %v6113_v26 = vcombine.high %v1403_v45, %v1407_v46  ;;  %v6112_v60 = vcombine.low %v1403_v45, %v1407_v46  ;;  %v6506_v45 = vld [vmem:[%s355_s24] sm:$0xff] }
 0x376   : > { %4777 = vmatprep.subr.bf16.mxu1 %v6161_v3  ;;  %v1535_v49 = vld [vmem:[%s7016_s26 + $0xf78] sm:$0xff] }
 0x377   : > { %4737 = vmatpush1.bf16.msra.mxu0 %v6032_v6  ;;  %v6241_v54 = vcombine.high %v1531_v48, %v1535_v49  ;;  %v1395_v58 = vld [vmem:[%s7016_s26 + $0xb18] sm:$0xff]  ;;  %v6240_v61 = vcombine.low %v1531_v48, %v1535_v49 }
 0x378   : > { %4738 = vmatprep.subr.bf16.mxu0 %v6025_v56  ;;  %v1399_v16 = vld [vmem:[%s7016_s26 + $0xb38] sm:$0xff] }
 0x379   : > { %4778 = vmatpush1.bf16.msra.mxu1 %v6160_v9  ;;  %v1523_v29 = vld [vmem:[%s7016_s26 + $0xf18] sm:$0xff]  ;;  %v6105_v63 = vcombine.high %v1395_v58, %v1399_v16  ;;  %v6104_v20 = vcombine.low %v1395_v58, %v1399_v16 }
 0x37a   : > { %4779 = vmatprep.subr.bf16.mxu1 %v6153_v10  ;;  %v6233_v0 = vcombine.high %v1523_v29, %v1527_v59  ;;  %v1387_v1 = vld [vmem:[%s7016_s26 + $0xad8] sm:$0xff]  ;;  %v6232_v55 = vcombine.low %v1523_v29, %v1527_v59 }
 0x37b   : > { %4739 = vmatpush1.bf16.msra.mxu0 %v6024_v17  ;;  %v1391_v2 = vld [vmem:[%s7016_s26 + $0xaf8] sm:$0xff] }
 0x37c   : > { %4740 = vmatprep.subr.bf16.mxu0 %v6017_v18  ;;  %v1515_v12 = vld [vmem:[%s7016_s26 + $0xed8] sm:$0xff]  ;;  %v6097_v4 = vcombine.high %v1387_v1, %v1391_v2  ;;  %v6096_v11 = vcombine.low %v1387_v1, %v1391_v2 }
 0x37d   : > { %4780 = vmatpush1.bf16.msra.mxu1 %v6152_v28  ;;  %v1519_v3 = vld [vmem:[%s7016_s26 + $0xef8] sm:$0xff] }
 0x37e   : > { %4781 = vmatprep.subr.bf16.mxu1 %v6145_v21  ;;  %v6225_v5 = vcombine.high %v1515_v12, %v1519_v3  ;;  %v1379_v6 = vld [vmem:[%s7016_s26 + $0xa98] sm:$0xff]  ;;  %v6224_v24 = vcombine.low %v1515_v12, %v1519_v3 }
 0x37f   : > { %4741 = vmatpush1.bf16.msra.mxu0 %v6016_v27  ;;  %v1383_v9 = vld [vmem:[%s7016_s26 + $0xab8] sm:$0xff] }
 0x380   : > { %4742 = vmatprep.subr.bf16.mxu0 %v6009_v31  ;;  %v1507_v56 = vld [vmem:[%s7016_s26 + $0xe98] sm:$0xff]  ;;  %v6089_v13 = vcombine.high %v1379_v6, %v1383_v9  ;;  %v6088_v22 = vcombine.low %v1379_v6, %v1383_v9 }
 0x381   : > { %4782 = vmatpush1.bf16.msra.mxu1 %v6144_v30  ;;  %v1511_v10 = vld [vmem:[%s7016_s26 + $0xeb8] sm:$0xff] }
 0x382   : > { %4783 = vmatprep.subr.bf16.mxu1 %v6137_v32  ;;  %v6217_v14 = vcombine.high %v1507_v56, %v1511_v10  ;;  %v1371_v17 = vld [vmem:[%s7016_s26 + $0xa58] sm:$0xff]  ;;  %v6216_v47 = vcombine.low %v1507_v56, %v1511_v10 }
 0x383   : > { %4743 = vmatpush1.bf16.msra.mxu0 %v6008_v36  ;;  %v1375_v28 = vld [vmem:[%s7016_s26 + $0xa78] sm:$0xff] }
 0x384   : > { %4744 = vmatprep.subr.bf16.mxu0 %v6129_v39  ;;  %v1499_v18 = vld [vmem:[%s7016_s26 + $0xe58] sm:$0xff]  ;;  %v6081_v23 = vcombine.high %v1371_v17, %v1375_v28  ;;  %v6080_v33 = vcombine.low %v1371_v17, %v1375_v28 }
 0x385   : > { %4784 = vmatpush1.bf16.msra.mxu1 %v6136_v38  ;;  %v1503_v21 = vld [vmem:[%s7016_s26 + $0xe78] sm:$0xff] }
 0x386   : > { %4785 = vmatprep.subr.bf16.mxu1 %v6257_v15  ;;  %v6209_v25 = vcombine.high %v1499_v18, %v1503_v21  ;;  %v1363_v27 = vld [vmem:[%s7016_s26 + $0xa18] sm:$0xff]  ;;  %v6208_v52 = vcombine.low %v1499_v18, %v1503_v21 }
 0x387   : > { %4745 = vmatpush2.bf16.msra.mxu0 %v6128_v42  ;;  %v1367_v30 = vld [vmem:[%s7016_s26 + $0xa38] sm:$0xff] }
 0x388   : > { %4746 = vmatprep.subr.bf16.mxu0 %v6121_v19  ;;  %v1491_v31 = vld [vmem:[%s7016_s26 + $0xe18] sm:$0xff]  ;;  %v6073_v35 = vcombine.high %v1363_v27, %v1367_v30  ;;  %v6072_v36 = vcombine.low %v1363_v27, %v1367_v30  ;;  %v1572_v19 = vsub.s32 4, %v7403_v7 }
 0x389   : > { %4786 = vmatpush2.bf16.msra.mxu1 %v6256_v43  ;;  %v1495_v32 = vld [vmem:[%s7016_s26 + $0xe38] sm:$0xff] }
 0x38a   : > { %4787 = vmatprep.subr.bf16.mxu1 %v6249_v44  ;;  %v6201_v50 = vcombine.high %v1491_v31, %v1495_v32  ;;  %v6200_v38 = vcombine.low %v1491_v31, %v1495_v32  ;;  %v1576_v44 = vsub.s32 5, %v7403_v7  ;;  %v1573_v46 = vrot.slane %v6506_v45, %v1572_v19 }
 0x38b   : > { %4747 = vmatpush2.bf16.msra.mxu0 %v6120_v51 }
 0x38c   : > { %4748 = vmatprep.subr.bf16.mxu0 %v6113_v26  ;;  %v1577_v48 = vrot.slane %v6506_v45, %v1576_v44 }
 0x38d   : > { %4788 = vmatpush2.bf16.msra.mxu1 %v6248_v53 }
 0x38e   : > { %4789 = vmatprep.subr.bf16.mxu1 %v6241_v54 }
 0x38f   : > { %4749 = vmatpush2.bf16.msra.mxu0 %v6112_v60 }
 0x390   : > { %4750 = vmatprep.subr.bf16.mxu0 %v6105_v63 }
 0x391   : > { %4790 = vmatpush2.bf16.msra.mxu1 %v6240_v61 }
 0x392   : > { %4791 = vmatprep.subr.bf16.mxu1 %v6233_v0 }
 0x393   : > { %4751 = vmatpush2.bf16.msra.mxu0 %v6104_v20 }
 0x394   : > { %4752 = vmatprep.subr.bf16.mxu0 %v6097_v4 }
 0x395   : > { %4792 = vmatpush2.bf16.msra.mxu1 %v6232_v55 }
 0x396   : > { %4793 = vmatprep.subr.bf16.mxu1 %v6225_v5 }
 0x397   : > { %4753 = vmatpush2.bf16.msra.mxu0 %v6096_v11 }
 0x398   : > { %4754 = vmatprep.subr.bf16.mxu0 %v6089_v13  ;;  %v1584_v13 = vsub.s32 7, %v7403_v7 }
 0x399   : > { %4794 = vmatpush2.bf16.msra.mxu1 %v6224_v24  ;;  %v1580_v24 = vsub.s32 6, %v7403_v7 }
 0x39a   : > { %4795 = vmatprep.subr.bf16.mxu1 %v6217_v14  ;;  %v1585_v17 = vrot.slane %v6506_v45, %v1584_v13 }
 0x39b   : > { %4755 = vmatpush2.bf16.msra.mxu0 %v6088_v22  ;;  %v1581_v14 = vrot.slane %v6506_v45, %v1580_v24 }
 0x39c   : > { %4756 = vmatprep.subr.bf16.mxu0 %v6081_v23 }
 0x39d   : > { %4796 = vmatpush2.bf16.msra.mxu1 %v6216_v47 }
 0x39e   : > { %4797 = vmatprep.subr.bf16.mxu1 %v6209_v25 }
 0x39f   : > { %4757 = vmatpush2.bf16.msra.mxu0 %v6080_v33 }
 0x3a0   : > { %4758 = vmatprep.subr.bf16.mxu0 %v6073_v35 }
 0x3a1   : > { %4798 = vmatpush2.bf16.msra.mxu1 %v6208_v52 }
 0x3a2   : > { %4799 = vmatprep.subr.bf16.mxu1 %v6201_v50 }
 0x3a3   : > { %4759 = vmatpush2.bf16.msra.mxu0 %v6072_v36 }
 0x3a5   : > { %4800 = vmatpush2.bf16.msra.mxu1 %v6200_v38 }
 0x3a6   : > { %v4516_v39 = vpop.f32.mrf.mxu0  ;;  %4761 = vmatmul.mubr.bf16.vlgmr.msra.gmra.mxu0 %v7200_v34 }
 0x3a7   : > { %v4517_v49 = vadd.f32 %v4516_v39, %v1573_v46 }
 0x3a8   : > { %v4557_v15 = vpop.f32.mrf.mxu1  ;;  %4802 = vmatmul.mubr.bf16.vlgmr.msra.gmra.mxu1 %v7204_v37  ;;  %v4518_v8 = vpop.f32.mrf.mxu0 }
 0x3a9   : > { %v4519_v51 = vadd.f32 %v4518_v8, %v1577_v48  ;;  %v4558_v34 = vadd.f32 %v4557_v15, %v4517_v49 }
 0x3aa   : > { %v4559_v40 = vpop.f32.mrf.mxu1  ;;  %v4520_v57 = vpop.f32.mrf.mxu0 }
 0x3ab   : > { %v4560_v26 = vadd.f32 %v4559_v40, %v4519_v51 }
 0x3ac   : > { %v4561_v41 = vpop.f32.mrf.mxu1  ;;  %v4521_v42 = vpop.f32.mrf.mxu0 }
 0x3ae   : > { %v4562_v43 = vpop.f32.mrf.mxu1 }
 0x3e6   : > { %v4598_v53 = vpop.f32.mrf.mxu0 }
 0x3e7   : > { %v4599_v37 = vadd.f32 %v4598_v53, %v4558_v34 }
 0x3e8   : > { %v4639_v54 = vpop.f32.mrf.mxu1  ;;  %v4600_v58 = vpop.f32.mrf.mxu0 }
 0x3e9   : > { %v4640_v16 = vadd.f32 %v4639_v54, %v4599_v37  ;;  %v4601_v29 = vadd.f32 %v4600_v58, %v4560_v26 }
 0x3ea   : > { %v4641_v59 = vpop.f32.mrf.mxu1  ;;  %v4602_v60 = vpop.f32.mrf.mxu0 }
 0x3eb   : > { %vm4814_vm12 = vcmp.gt.f32.partialorder %v4640_v16, 0.0  ;;  %v4822_v61 = vmul.f32 0.01, %v4640_v16  ;;  %v4642_v63 = vadd.f32 %v4641_v59, %v4601_v29 }
 0x3ec   : > { %v4643_v0 = vpop.f32.mrf.mxu1  ;;  %v4603_v1 = vpop.f32.mrf.mxu0 }
 0x3ed   : > { %v4830_v2 = vsel %vm4814_vm12, %v4640_v16, %v4822_v61  ;;  %vm4815_vm13 = vcmp.gt.f32.partialorder %v4642_v63, 0.0  ;;  %v4823_v12 = vmul.f32 0.01, %v4642_v63 }
 0x3ee   : > { %v4644_v3 = vpop.f32.mrf.mxu1  ;;  %4838 = vst [vmem:[#allocation2 + $0x8] sm:$0xff] %v4830_v2 }
 0x3ef   : > { %v4831_v20 = vsel %vm4815_vm13, %v4642_v63, %v4823_v12 }
 0x3f0   : > { %4839 = vst [vmem:[#allocation2 + $0x20] sm:$0xff] %v4831_v20 }
 0x426   : > { %v4680_v55 = vpop.f32.mrf.mxu0 }
 0x427   : > { %v4681_v28 = vadd.f32 %v4680_v55, %v1581_v14 }
 0x428   : > { %v4721_v4 = vpop.f32.mrf.mxu1  ;;  %v4682_v5 = vpop.f32.mrf.mxu0 }
 0x429   : > { %v4683_v18 = vadd.f32 %v4682_v5, %v1585_v17  ;;  %v4722_v21 = vadd.f32 %v4721_v4, %v4681_v28 }
 0x42a   : > { %v4723_v6 = vpop.f32.mrf.mxu1  ;;  %v4684_v9 = vpop.f32.mrf.mxu0 }
 0x42b   : > { %v4724_v47 = vadd.f32 %v4723_v6, %v4683_v18 }
 0x42c   : > { %v4725_v56 = vpop.f32.mrf.mxu1  ;;  %v4685_v10 = vpop.f32.mrf.mxu0 }
 0x42e   : > { %v4726_v11 = vpop.f32.mrf.mxu1 }
 0x466   : > { %v4762_v22 = vpop.f32.mrf.mxu0 }
 0x467   : > { %v4763_v23 = vadd.f32 %v4762_v22, %v4722_v21 }
 0x468   : > { %v4803_v25 = vpop.f32.mrf.mxu1  ;;  %v4764_v27 = vpop.f32.mrf.mxu0 }
 0x469   : > { %v4804_v30 = vadd.f32 %v4803_v25, %v4763_v23  ;;  %v4765_v31 = vadd.f32 %v4764_v27, %v4724_v47 }
 0x46a   : > { %v4805_v32 = vpop.f32.mrf.mxu1  ;;  %v4766_v33 = vpop.f32.mrf.mxu0 }
 0x46b   : > { %vm4816_vm14 = vcmp.gt.f32.partialorder %v4804_v30, 0.0  ;;  %v4824_v52 = vmul.f32 0.01, %v4804_v30  ;;  %v4806_v35 = vadd.f32 %v4805_v32, %v4765_v31 }
 0x46c   : > { %v4807_v50 = vpop.f32.mrf.mxu1  ;;  %v4767_v36 = vpop.f32.mrf.mxu0  ;;  %4845 = sbr.rel (%p6258_p9) target bundleno = 1720 (0x6b8), region = 80 }
 0x46d   : > { %v4832_v7 = vsel %vm4816_vm14, %v4804_v30, %v4824_v52  ;;  %vm4817_vm15 = vcmp.gt.f32.partialorder %v4806_v35, 0.0  ;;  %v4825_v38 = vmul.f32 0.01, %v4806_v35 }
 0x46e   : > { %v4808_v39 = vpop.f32.mrf.mxu1  ;;  %4840 = vst [vmem:[#allocation2 + $0x28] sm:$0xff] %v4832_v7 }
 0x46f   : > { %v4833_v15 = vsel %vm4817_vm15, %v4806_v35, %v4825_v38 }
 0x470   : > { %4841 = vst [vmem:[#allocation2 + $0x38] sm:$0xff] %v4833_v15 }
 0x471   : > { %v6507_v8 = vld [vmem:[#allocation9 + $0x78] sm:$0xff]   ;;  %v6511_v42 = vld [vmem:[#allocation9 + $0x70] sm:$0xff]   ;;  %v6515_v45 = vld [vmem:[#allocation9 + $0x68] sm:$0xff]  }
 0x472   : > { %v6508_v40 = vld [vmem:[#allocation9 + $0xf8] sm:$0xff]   ;;  %6328 = vmatprep.subr.bf16.mxu0 %v6507_v8  ;;  %v6512_v43 = vld [vmem:[#allocation9 + $0xf0] sm:$0xff]   ;;  %v6516_v46 = vld [vmem:[#allocation9 + $0xe8] sm:$0xff]  }
 0x473   : > { %v6509_v57 = vld [vmem:[#allocation9 + $0x38] sm:$0xff]   ;;  %6350 = vmatprep.subr.bf16.mxu1 %v6508_v40  ;;  %v6513_v19 = vld [vmem:[#allocation9 + $0x30] sm:$0xff]   ;;  %v6517_v48 = vld [vmem:[#allocation9 + $0x28] sm:$0xff]  }
 0x474   : > { %v6510_v41 = vld [vmem:[#allocation9 + $0xb8] sm:$0xff]   ;;  %6329 = vmatpush3.bf16.msra.mxu0 %v6509_v57  ;;  %v6514_v44 = vld [vmem:[#allocation9 + $0xb0] sm:$0xff]   ;;  %v6518_v49 = vld [vmem:[#allocation9 + $0xa8] sm:$0xff]  }
 0x475   : > { %6351 = vmatpush3.bf16.msra.mxu1 %v6510_v41  ;;  %6330 = vmatprep.subr.bf16.mxu0 %v6511_v42  ;;  %v6519_v51 = vld [vmem:[#allocation9 + $0x60] sm:$0xff]   ;;  %v6523_v37 = vld [vmem:[#allocation9 + $0x58] sm:$0xff]   ;;  %v6527_v29 = vld [vmem:[#allocation9 + $0x50] sm:$0xff]  }
 0x476   : > { %6352 = vmatprep.subr.bf16.mxu1 %v6512_v43  ;;  %v6520_v34 = vld [vmem:[#allocation9 + $0xe0] sm:$0xff]   ;;  %v6524_v54 = vld [vmem:[#allocation9 + $0xd8] sm:$0xff]   ;;  %v6528_v59 = vld [vmem:[#allocation9 + $0xd0] sm:$0xff]  }
 0x477   : > { %v6521_v53 = vld [vmem:[#allocation9 + $0x20] sm:$0xff]   ;;  %v6525_v58 = vld [vmem:[#allocation9 + $0x18] sm:$0xff]   ;;  %v6529_v60 = vld [vmem:[#allocation9 + $0x10] sm:$0xff]  }
 0x478   : > { %6331 = vmatpush3.bf16.msra.mxu0 %v6513_v19  ;;  %v6522_v26 = vld [vmem:[#allocation9 + $0xa0] sm:$0xff]   ;;  %v6526_v16 = vld [vmem:[#allocation9 + $0x98] sm:$0xff]   ;;  %v6530_v61 = vld [vmem:[#allocation9 + $0x90] sm:$0xff]  }
 0x479   : > { %6353 = vmatpush3.bf16.msra.mxu1 %v6514_v44  ;;  %6332 = vmatprep.subr.bf16.mxu0 %v6515_v45  ;;  %v6531_v63 = vld [vmem:[#allocation9 + $0x48] sm:$0xff]   ;;  %v6535_v12 = vld [vmem:[#allocation9 + $0x40] sm:$0xff]   ;;  %v4849_v5 = vld [vmem:[#allocation2 + $0x10] sm:$0xff] }
 0x47a   : > { %6354 = vmatprep.subr.bf16.mxu1 %v6516_v46  ;;  %v6532_v0 = vld [vmem:[#allocation9 + $0xc8] sm:$0xff]   ;;  %v6536_v3 = vld [vmem:[#allocation9 + $0xc0] sm:$0xff]   ;;  %v4846_v6 = vld [vmem:[#allocation2 + $0x30] sm:$0xff]  ;;  %v4857_v56 = vpack.c.bf16 %v4849_v5, %v4849_v5 }
 0x47b   : > { %v6533_v1 = vld [vmem:[#allocation9 + $0x8] sm:$0xff]   ;;  %v6537_v20 = vld [vmem:[#allocation9] sm:$0xff]   ;;  %v4854_v10 = vpack.c.bf16 %v4846_v6, %v4846_v6  ;;  %v6539_v13 = vld [vmem:[#allocation9 + $0x178] sm:$0xff]  }
 0x47c   : > { %6333 = vmatpush3.bf16.msra.mxu0 %v6517_v48  ;;  %v6534_v2 = vld [vmem:[#allocation9 + $0x88] sm:$0xff]   ;;  %v6538_v55 = vld [vmem:[#allocation9 + $0x80] sm:$0xff]   ;;  %5453 = vmatprep.mubr.bf16.mxu1 %v4857_v56  ;;  %v6540_v14 = vld [vmem:[#allocation9 + $0x1f8] sm:$0xff]  }
 0x47d   : > { %6355 = vmatpush3.bf16.msra.mxu1 %v6518_v49  ;;  %6334 = vmatprep.subr.bf16.mxu0 %v6519_v51  ;;  %v4847_v4 = vld [vmem:[#allocation2] sm:$0xff]  ;;  %v4848_v11 = vld [vmem:[#allocation2 + $0x18] sm:$0xff]  ;;  %v6541_v17 = vld [vmem:[#allocation9 + $0x138] sm:$0xff]  }
 0x47e   : > { %6356 = vmatprep.subr.bf16.mxu1 %v6520_v34  ;;  %v4855_v9 = vpack.c.bf16 %v4847_v4, %v4847_v4  ;;  %v4856_v24 = vpack.c.bf16 %v4848_v11, %v4848_v11  ;;  %v6542_v28 = vld [vmem:[#allocation9 + $0x1b8] sm:$0xff]   ;;  %v6543_v18 = vld [vmem:[#allocation9 + $0x170] sm:$0xff]   ;;  %v6547_v23 = vld [vmem:[#allocation9 + $0x168] sm:$0xff]   ;;  %v5543_v4 = vand.u32 127, %v1554_v62 }
 0x47f   : > { %v6544_v21 = vld [vmem:[#allocation9 + $0x1f0] sm:$0xff]   ;;  %v6548_v25 = vld [vmem:[#allocation9 + $0x1e8] sm:$0xff]   ;;  %v6551_v31 = vld [vmem:[#allocation9 + $0x160] sm:$0xff]  }
 0x480   : > { %6335 = vmatpush3.bf16.msra.mxu0 %v6521_v53  ;;  %5413 = vmatprep.mubr.bf16.mxu0 %v4855_v9  ;;  %v6545_v22 = vld [vmem:[#allocation9 + $0x130] sm:$0xff]   ;;  %v6549_v27 = vld [vmem:[#allocation9 + $0x128] sm:$0xff]   ;;  %v6552_v32 = vld [vmem:[#allocation9 + $0x1e0] sm:$0xff]   ;;  %vm5544_vm0 = vcmp.lt.s32.totalorder %v5543_v4, 2 }
 0x481   : > { %6357 = vmatpush3.bf16.msra.mxu1 %v6522_v26  ;;  %6336 = vmatprep.subr.bf16.mxu0 %v6523_v37  ;;  %v6546_v47 = vld [vmem:[#allocation9 + $0x1b0] sm:$0xff]   ;;  %v6550_v30 = vld [vmem:[#allocation9 + $0x1a8] sm:$0xff]   ;;  %v6553_v33 = vld [vmem:[#allocation9 + $0x120] sm:$0xff]  }
 0x482   : > { %6358 = vmatprep.subr.bf16.mxu1 %v6524_v54  ;;  %v6554_v52 = vld [vmem:[#allocation9 + $0x1a0] sm:$0xff]   ;;  %v6555_v35 = vld [vmem:[#allocation9 + $0x158] sm:$0xff]   ;;  %v6559_v38 = vld [vmem:[#allocation9 + $0x150] sm:$0xff]  }
 0x483   : > { %v6556_v50 = vld [vmem:[#allocation9 + $0x1d8] sm:$0xff]   ;;  %v6560_v39 = vld [vmem:[#allocation9 + $0x1d0] sm:$0xff]   ;;  %v6563_v40 = vld [vmem:[#allocation9 + $0x148] sm:$0xff]  }
 0x484   : > { %6337 = vmatpush3.bf16.msra.mxu0 %v6525_v58  ;;  %v6557_v36 = vld [vmem:[#allocation9 + $0x118] sm:$0xff]   ;;  %v6561_v15 = vld [vmem:[#allocation9 + $0x110] sm:$0xff]   ;;  %v6564_v57 = vld [vmem:[#allocation9 + $0x1c8] sm:$0xff]  }
 0x485   : > { %6359 = vmatpush3.bf16.msra.mxu1 %v6526_v16  ;;  %6338 = vmatprep.subr.bf16.mxu0 %v6527_v29  ;;  %v6558_v7 = vld [vmem:[#allocation9 + $0x198] sm:$0xff]   ;;  %v6562_v8 = vld [vmem:[#allocation9 + $0x190] sm:$0xff]   ;;  %v6565_v41 = vld [vmem:[#allocation9 + $0x108] sm:$0xff]  }
 0x486   : > { %6360 = vmatprep.subr.bf16.mxu1 %v6528_v59  ;;  %v6566_v42 = vld [vmem:[#allocation9 + $0x188] sm:$0xff]   ;;  %v6567_v43 = vld [vmem:[#allocation9 + $0x140] sm:$0xff]   ;;  %v4850_v34 = vld [vmem:[#allocation2 + $0x8] sm:$0xff] }
 0x487   : > { %v6568_v19 = vld [vmem:[#allocation9 + $0x1c0] sm:$0xff]   ;;  %v4851_v46 = vld [vmem:[#allocation2 + $0x20] sm:$0xff]  ;;  %v4852_v53 = vld [vmem:[#allocation2 + $0x28] sm:$0xff]  ;;  %v4858_v26 = vpack.c.bf16 %v4850_v34, %v4850_v34 }
 0x488   : > { %6339 = vmatpush3.bf16.msra.mxu0 %v6529_v60  ;;  %v6569_v44 = vld [vmem:[#allocation9 + $0x100] sm:$0xff]   ;;  %v4859_v49 = vpack.c.bf16 %v4851_v46, %v4851_v46  ;;  %v4860_v37 = vpack.c.bf16 %v4852_v53, %v4852_v53 }
 0x489   : > { %6361 = vmatpush3.bf16.msra.mxu1 %v6530_v61  ;;  %6340 = vmatprep.subr.bf16.mxu0 %v6531_v63  ;;  %v6570_v45 = vld [vmem:[#allocation9 + $0x180] sm:$0xff]  }
 0x48a   : > { %6362 = vmatprep.subr.bf16.mxu1 %v6532_v0  ;;  %v4853_v48 = vld [vmem:[#allocation2 + $0x38] sm:$0xff] }
 0x48b   : > { %v4861_v51 = vpack.c.bf16 %v4853_v48, %v4853_v48 }
 0x48c   : > { %6341 = vmatpush3.bf16.msra.mxu0 %v6533_v1  ;;  %v6259_v1 = vld [vmem:[#allocation10] ss:$0 sm:$0xff] }
 0x48d   : > { %6363 = vmatpush3.bf16.msra.mxu1 %v6534_v2  ;;  %6342 = vmatprep.subr.bf16.mxu0 %v6535_v12 }
 0x48e   : > { %6364 = vmatprep.subr.bf16.mxu1 %v6536_v3 }
 0x490   : > { %6343 = vmatpush3.bf16.msra.mxu0 %v6537_v20 }
 0x491   : > { %6365 = vmatpush3.bf16.msra.mxu1 %v6538_v55  ;;  %6372 = vmatprep.subr.bf16.mxu0 %v6539_v13 }
 0x492   : > { %6394 = vmatprep.subr.bf16.mxu1 %v6540_v14 }
 0x493   : > { %5414 = vmatmul.mubr.bf16.vlgmr.msra.gmra.mxu0 %v4854_v10 }
 0x494   : > { %5454 = vmatmul.mubr.bf16.vlgmr.msra.gmra.mxu1 %v4856_v24  ;;  %6373 = vmatpush3.bf16.msra.mxu0 %v6541_v17 }
 0x495   : > { %6395 = vmatpush3.bf16.msra.mxu1 %v6542_v28  ;;  %6374 = vmatprep.subr.bf16.mxu0 %v6543_v18 }
 0x496   : > { %6396 = vmatprep.subr.bf16.mxu1 %v6544_v21  ;;  %5493 = vmatprep.mubr.bf16.mxu0 %v4859_v49 }
 0x497   : > { %5533 = vmatprep.mubr.bf16.mxu1 %v4861_v51 }
 0x498   : > { %6375 = vmatpush3.bf16.msra.mxu0 %v6545_v22 }
 0x499   : > { %6397 = vmatpush3.bf16.msra.mxu1 %v6546_v47  ;;  %6376 = vmatprep.subr.bf16.mxu0 %v6547_v23 }
 0x49a   : > { %6398 = vmatprep.subr.bf16.mxu1 %v6548_v25 }
 0x49c   : > { %6377 = vmatpush3.bf16.msra.mxu0 %v6549_v27 }
 0x49d   : > { %6399 = vmatpush3.bf16.msra.mxu1 %v6550_v30  ;;  %6378 = vmatprep.subr.bf16.mxu0 %v6551_v31 }
 0x49e   : > { %6400 = vmatprep.subr.bf16.mxu1 %v6552_v32 }
 0x4a0   : > { %6379 = vmatpush3.bf16.msra.mxu0 %v6553_v33 }
 0x4a1   : > { %6401 = vmatpush3.bf16.msra.mxu1 %v6554_v52  ;;  %6380 = vmatprep.subr.bf16.mxu0 %v6555_v35 }
 0x4a2   : > { %6402 = vmatprep.subr.bf16.mxu1 %v6556_v50 }
 0x4a4   : > { %6381 = vmatpush3.bf16.msra.mxu0 %v6557_v36 }
 0x4a5   : > { %6403 = vmatpush3.bf16.msra.mxu1 %v6558_v7  ;;  %6382 = vmatprep.subr.bf16.mxu0 %v6559_v38 }
 0x4a6   : > { %6404 = vmatprep.subr.bf16.mxu1 %v6560_v39 }
 0x4a8   : > { %6383 = vmatpush3.bf16.msra.mxu0 %v6561_v15 }
 0x4a9   : > { %6405 = vmatpush3.bf16.msra.mxu1 %v6562_v8  ;;  %6384 = vmatprep.subr.bf16.mxu0 %v6563_v40 }
 0x4aa   : > { %6406 = vmatprep.subr.bf16.mxu1 %v6564_v57 }
 0x4ac   : > { %6385 = vmatpush3.bf16.msra.mxu0 %v6565_v41 }
 0x4ad   : > { %6407 = vmatpush3.bf16.msra.mxu1 %v6566_v42  ;;  %6386 = vmatprep.subr.bf16.mxu0 %v6567_v43 }
 0x4ae   : > { %6408 = vmatprep.subr.bf16.mxu1 %v6568_v19 }
 0x4b0   : > { %6387 = vmatpush3.bf16.msra.mxu0 %v6569_v44 }
 0x4b1   : > { %6409 = vmatpush3.bf16.msra.mxu1 %v6570_v45 }
 0x4b3   : > { %5494 = vmatmul.mubr.bf16.vlgmr.msra.gmra.mxu0 %v4858_v26 }
 0x4b4   : > { %5534 = vmatmul.mubr.bf16.vlgmr.msra.gmra.mxu1 %v4860_v37 }
 0x553   : > { %v6344_v54 = vpop.f32.mrf.mxu0 }
 0x554   : > { %v6366_v58 = vpop.f32.mrf.mxu1 }
 0x555   : > { %v6345_v16 = vpop.f32.mrf.mxu0 }
 0x556   : > { %v6367_v29 = vpop.f32.mrf.mxu1  ;;  %v6346_v0 = vadd.f32 %v6345_v16, %v6344_v54 }
 0x557   : > { %v6347_v59 = vpop.f32.mrf.mxu0  ;;  %v6368_v12 = vadd.f32 %v6367_v29, %v6366_v58 }
 0x558   : > { %v6369_v60 = vpop.f32.mrf.mxu1  ;;  %v5416_v2 = vadd.f32 %v6346_v0, %v6259_v1 }
 0x559   : > { %v6348_v61 = vpop.f32.mrf.mxu0 }
 0x55a   : > { %v6370_v63 = vpop.f32.mrf.mxu1  ;;  %v5456_v5 = vadd.f32 %v6368_v12, %v5416_v2 }
 0x573   : > { %v6388_v3 = vpop.f32.mrf.mxu0 }
 0x574   : > { %v6410_v20 = vpop.f32.mrf.mxu1 }
 0x575   : > { %v6389_v55 = vpop.f32.mrf.mxu0 }
 0x576   : > { %v6390_v6 = vadd.f32 %v6389_v55, %v6388_v3  ;;  %v6411_v9 = vpop.f32.mrf.mxu1 }
 0x577   : > { %v6391_v56 = vpop.f32.mrf.mxu0  ;;  %v6412_v11 = vadd.f32 %v6411_v9, %v6410_v20 }
 0x578   : > { %v5496_v10 = vadd.f32 %v6390_v6, %v5456_v5  ;;  %v6413_v24 = vpop.f32.mrf.mxu1 }
 0x579   : > { %v6392_v13 = vpop.f32.mrf.mxu0 }
 0x57a   : > { %v6414_v14 = vpop.f32.mrf.mxu1  ;;  %v5536_v17 = vadd.f32 %v6412_v11, %v5496_v10 }
 0x57c   : > { %v5545_v28 = vsel %vm5544_vm0, %v5536_v17, -inf  ;;  %5541 = vst [vmem:[%s7681_s7] sm:$0xff] %v5536_v17 }
 0x57d   : > { %5546 = vmax.xlane.f32.xlu0 %v5545_v28 }
 0x606   : > { %v5547_v18 = vpop.xlane.xlu0 %5546 }
 0x607   : > { %v5548_v21 = vsub.f32 %v5545_v28, %v5547_v18 }
 0x609   : > { %v5549_v62 = vmul.f32 1.442695, %v5548_v21 }
 0x60b   : > { %6571 = vpow2.f32 %v5549_v62 }
 0x618   : > { %v6572_v22 = vpop.eup %6571 }
 0x619   : > { %5551 = vadd.xlane.f32.xlu0 %v6572_v22 }
 0x6a2   : > { %v5552_v47 = vpop.xlane.xlu0 %5551 }
 0x6a3   : > { %6573 = vrcp.f32 %v5552_v47 }
 0x6b0   : > { %v6574_v23 = vpop.eup %6573 }
 0x6b1   : > { %v5554_v25 = vmul.f32 %v6574_v23, %v6572_v22 }
 0x6b3   : > { %v5555_v27 = vmax.f32 %v5554_v25, 1e-06 }
 0x6b5   : > { %v5556_v30 = vmin.f32 %v5555_v27, 0.999999 }
 0x6b7   : > { %5557 = vst [vmem:[%s7682_s8] sm:$0xff] %v5556_v30 }
 0x6b8 PF: > { %p19_p7 = scmp.ge.s32.totalorder %s6909_s25, 7   ;;  %s7712_s27 = smov %s6777_s28 }
 0x6b9   : > { %s7713_s28 = smov %s6781_s29  ;;  %s7714_s29 = smov %s6920_s13 }
 0x6ba   : > { %s7715_s30 = smov %s6909_s25  ;;  %21 = sbr.rel (!%p19_p7) target bundleno = 6 (0x6), region = 126 }
 0x6bf   :  { %5575 = vsyncpa [#allocation4], 1 }
 0x6c0   :  { %5577 = vsyncpa [#allocation4 + $0x1], 1 }
 0x6c1   :  { %5578 = vsyncpa [#allocation6], 1 }
 0x6c2   :  { %5579 = vsyncpa [#allocation11], 1 }

</bundles_post_ra>
